<compile_context>
chip_gen: v6e
topology: v6e:2x2x1
jax: 0.10.0
libtpu: 0.0.40
codegen_flags: <defaults>
</compile_context>

<pallas_src>
import jax
import jax.numpy as jnp
from jax import lax
from jax.experimental import pallas as pl
from jax.experimental.pallas import tpu as pltpu

# ----------------------- static problem configuration ---------------------- #
B = 2
C = 8                     # `channel` (hchannel == channel, so lf has C channels)
CQ = C // 4               # quarter-branch width
H = 16
W = 16
HW = H * W                # 256 -> lane-dense last dim
DILS = (1, 2, 3, 4)       # dilations of conv3_1 / dconv5_1 / dconv7_1 / dconv9_1
PAD = 128                 # flat zero border (>= max shift = 4*W + 4), lane aligned
SEG = PAD + HW + PAD      # scratch row length
EPS = 1e-5


# ------------------------------ Pallas kernel ------------------------------ #
def kffm_kernel(lf_ref, wmat_ref, wq_ref, bias_ref, mask_ref, o_ref, pad_ref):
    # lf_ref   (1, C, HW)       one batch element (channels x flat spatial)
    # wmat_ref (11*C, C)        rows [0:C)   = folded conv1_1 (cat(lf,lf) collapsed)
    #                           rows [C:2C)  = folded conv1_2
    #                           rows [2C+t*C : 2C+(t+1)*C) = tap t of folded conv3_3
    # wq_ref   (4*9*CQ, CQ)     tap t of quarter-branch q at rows (q*9+t)*CQ ...
    # bias_ref (C, 4)           col0=conv1_1, col1=conv1_2, col2=conv3_3,
    #                           col3=quarter-branch biases packed (CQ each)
    # mask_ref (8, HW)          lane masks for column shifts of +-d, d=1..4
    # o_ref    (1, C, HW)
    # pad_ref  (C, SEG) VMEM scratch; its zero borders act as conv zero padding

    # Zero the padded scratch once; only the interior is rewritten below, so the
    # borders stay zero for the whole invocation.
    pad_ref[...] = jnp.zeros_like(pad_ref)

    def conv3x3(x, cin, tap, d, bias):
        """ReLU(BN(dilated 3x3 conv(x))) with BN folded into `tap`/`bias`.

        x: (cin, HW); tap(t) -> (cout, cin) folded weight of tap t; d: dilation;
        bias: (cout, 1).  Returns (cout, HW) float32.
        """
        pad_ref[0:cin, PAD:PAD + HW] = x
        acc = None
        for dy in range(3):
            for dx in range(3):
                s = ((dy - 1) * W + (dx - 1)) * d          # flat spatial shift
                win = pad_ref[0:cin, PAD + s:PAD + s + HW]
                if dx != 1:                                # mask row-wrap columns
                    r = 2 * (d - 1) + (0 if dx == 0 else 1)
                    win = win * mask_ref[r:r + 1, :]
                t = jnp.dot(tap(dy * 3 + dx), win,
                            preferred_element_type=jnp.float32)
                acc = t if acc is None else acc + t
        return jnp.maximum(acc + bias, 0.0)

    lf = lf_ref[0]                                          # (C, HW)

    # conv1_1 on cat(lf, lf): folded into one (C, C) channel matmul + BN + ReLU.
    x = jnp.maximum(
        jnp.dot(wmat_ref[0:C, :], lf, preferred_element_type=jnp.float32)
        + bias_ref[:, 0:1], 0.0)                            # (C, HW)

    xc = [x[q * CQ:(q + 1) * CQ, :] for q in range(4)]

    def qtap(q):
        return lambda t: wq_ref[(q * 9 + t) * CQ:(q * 9 + t + 1) * CQ, :]

    def qbias(q):
        return bias_ref[q * CQ:(q + 1) * CQ, 3:4]

    x0 = conv3x3(xc[0] + xc[1],      CQ, qtap(0), DILS[0], qbias(0))
    x1 = conv3x3(xc[1] + x0 + xc[2], CQ, qtap(1), DILS[1], qbias(1))
    x2 = conv3x3(xc[2] + x1 + xc[3], CQ, qtap(2), DILS[2], qbias(2))
    x3 = conv3x3(xc[3] + x2,         CQ, qtap(3), DILS[3], qbias(3))

    # conv1_2 on concat(x0..x3): four (C, CQ)@(CQ, HW) dots (no in-kernel concat).
    w5 = wmat_ref[C:2 * C, :]
    xx = (jnp.dot(w5[:, 0 * CQ:1 * CQ], x0, preferred_element_type=jnp.float32) +
          jnp.dot(w5[:, 1 * CQ:2 * CQ], x1, preferred_element_type=jnp.float32) +
          jnp.dot(w5[:, 2 * CQ:3 * CQ], x2, preferred_element_type=jnp.float32) +
          jnp.dot(w5[:, 3 * CQ:4 * CQ], x3, preferred_element_type=jnp.float32))
    xx = jnp.maximum(xx + bias_ref[:, 1:2], 0.0)

    # conv3_3 (KConvBNR): standard 3x3 conv stand-in for KAN_Convolution.
    def tap6(t):
        return wmat_ref[2 * C + t * C:2 * C + (t + 1) * C, :]

    out = conv3x3(x + xx, C, tap6, 1, bias_ref[:, 2:3])     # (C, HW)
    o_ref[0] = out.astype(o_ref.dtype)


# ------------------------------- wrapper ----------------------------------- #
def kffm_forward(lf_nchw, params):
    """Pallas implementation of KFFM.forward(lf) (BatchNorm in inference mode)."""
    bsz = lf_nchw.shape[0]

    def bn_fold(pre):
        scale = params[pre + "_gamma"] / jnp.sqrt(params[pre + "_var"] + EPS)
        return scale, params[pre + "_beta"] - scale * params[pre + "_mean"]

    # conv1_1: cat(lf, lf) collapses the 1x1 weight to w[:, :C] + w[:, C:].
    s1, t1 = bn_fold("bn1")
    w1eff = params["w1"][:, :C, 0, 0] + params["w1"][:, C:, 0, 0]
    w0 = s1[:, None] * w1eff
    b0 = s1 * params["b1"] + t1

    s5, t5 = bn_fold("bn5")
    w5 = s5[:, None] * params["w5"][:, :, 0, 0]
    b5 = s5 * params["b5"] + t5

    s6, t6 = bn_fold("bn6")
    w6f = s6[:, None, None, None] * params["w6"]                    # (C, C, 3, 3)
    w6taps = jnp.transpose(w6f, (2, 3, 0, 1)).reshape(9 * C, C)     # row = t*C + o
    b6 = t6

    wmat = jnp.concatenate([w0, w5, w6taps], axis=0).astype(jnp.float32)  # (11C, C)

    wq_rows, bq_rows = [], []
    for q in range(4):
        sq, tq = bn_fold("bnq%d" % q)
        wqf = sq[:, None, None, None] * params["wq%d" % q]          # (CQ, CQ, 3, 3)
        wq_rows.append(jnp.transpose(wqf, (2, 3, 0, 1)).reshape(9 * CQ, CQ))
        bq_rows.append(tq)
    wq = jnp.concatenate(wq_rows, axis=0).astype(jnp.float32)       # (4*9*CQ, CQ)

    biases = jnp.stack(
        [b0, b5, b6, jnp.concatenate(bq_rows)], axis=1).astype(jnp.float32)  # (C, 4)

    # Lane masks: for a column shift of -d / +d, which output columns have an
    # in-bounds source column (otherwise the flat shift wrapped to another row).
    cols = jnp.arange(HW) % W
    mrows = []
    for d in DILS:
        mrows.append(cols >= d)         # shift -d
        mrows.append(cols < W - d)      # shift +d
    masks = jnp.stack(mrows).astype(jnp.float32)                    # (8, HW)

    lf_flat = lf_nchw.reshape(bsz, C, HW).astype(jnp.float32)

    out_flat = pl.pallas_call(
        kffm_kernel,
        out_shape=jax.ShapeDtypeStruct((bsz, C, HW), jnp.float32),
        grid=(bsz,),
        in_specs=[
            pl.BlockSpec((1, C, HW), lambda b: (b, 0, 0)),          # lf
            pl.BlockSpec((11 * C, C), lambda b: (0, 0)),            # packed weights
            pl.BlockSpec((4 * 9 * CQ, CQ), lambda b: (0, 0)),       # quarter taps
            pl.BlockSpec((C, 4), lambda b: (0, 0)),                 # packed biases
            pl.BlockSpec((2 * len(DILS), HW), lambda b: (0, 0)),    # column masks
        ],
        out_specs=pl.BlockSpec((1, C, HW), lambda b: (b, 0, 0)),
        scratch_shapes=[pltpu.VMEM((C, SEG), jnp.float32)],
        compiler_params=pltpu.CompilerParams(
            dimension_semantics=("parallel",)),
    )(lf_flat, wmat, wq, biases, masks)

    return out_flat.reshape(bsz, C, H, W)


# --------------------------- pure-JAX reference ----------------------------- #
def kffm_reference(lf, params):
    hi = lax.Precision.HIGHEST

    def conv2d(x, w, d=1, pad=0):
        return lax.conv_general_dilated(
            x, w, (1, 1), ((pad, pad), (pad, pad)), rhs_dilation=(d, d),
            dimension_numbers=("NCHW", "OIHW", "NCHW"), precision=hi)

    def bn(x, pre):
        scale = params[pre + "_gamma"] / jnp.sqrt(params[pre + "_var"] + EPS)
        bias = params[pre + "_beta"] - scale * params[pre + "_mean"]
        return x * scale[None, :, None, None] + bias[None, :, None, None]

    x = conv2d(jnp.concatenate([lf, lf], axis=1), params["w1"]) \
        + params["b1"][None, :, None, None]
    x = jnp.maximum(bn(x, "bn1"), 0.0)

    xc = [x[:, q * CQ:(q + 1) * CQ] for q in range(4)]

    def convbnr(t, q, d):
        return jnp.maximum(
            bn(conv2d(t, params["wq%d" % q], d, d), "bnq%d" % q), 0.0)

    x0 = convbnr(xc[0] + xc[1], 0, 1)
    x1 = convbnr(xc[1] + x0 + xc[2], 1, 2)
    x2 = convbnr(xc[2] + x1 + xc[3], 2, 3)
    x3 = convbnr(xc[3] + x2, 3, 4)

    xx = conv2d(jnp.concatenate([x0, x1, x2, x3], axis=1), params["w5"]) \
        + params["b5"][None, :, None, None]
    xx = jnp.maximum(bn(xx, "bn5"), 0.0)

    y = conv2d(x + xx, params["w6"], 1, 1)   # KAN_Convolution approximation
    return jnp.maximum(bn(y, "bn6"), 0.0)


# ----------------------------------- main ----------------------------------- #
if __name__ == "__main__":
    key = jax.random.PRNGKey(0)
    kit = iter(jax.random.split(key, 64))

    def bn_params(n):
        return {
            "_gamma": 1.0 + 0.1 * jax.random.normal(next(kit), (n,), jnp.float32),
            "_beta": 0.1 * jax.random.normal(next(kit), (n,), jnp.float32),
            "_mean": 0.1 * jax.random.normal(next(kit), (n,), jnp.float32),
            "_var": jax.random.uniform(next(kit), (n,), jnp.float32, 0.5, 1.5),
        }

    params = {}
    params["w1"] = 0.2 * jax.random.normal(next(kit), (C, 2 * C, 1, 1), jnp.float32)
    params["b1"] = 0.1 * jax.random.normal(next(kit), (C,), jnp.float32)
    for suf, val in bn_params(C).items():
        params["bn1" + suf] = val
    for q in range(4):
        params["wq%d" % q] = 0.2 * jax.random.normal(
            next(kit), (CQ, CQ, 3, 3), jnp.float32)
        for suf, val in bn_params(CQ).items():
            params["bnq%d" % q + suf] = val
    params["w5"] = 0.2 * jax.random.normal(next(kit), (C, C, 1, 1), jnp.float32)
    params["b5"] = 0.1 * jax.random.normal(next(kit), (C,), jnp.float32)
    for suf, val in bn_params(C).items():
        params["bn5" + suf] = val
    params["w6"] = 0.2 * jax.random.normal(next(kit), (C, C, 3, 3), jnp.float32)
    for suf, val in bn_params(C).items():
        params["bn6" + suf] = val

    lf = jax.random.normal(next(kit), (B, C, H, W), jnp.float32)

    out = jax.block_until_ready(kffm_forward(lf, params))
    ref = kffm_reference(lf, params)

    assert out.shape == (B, C, H, W), out.shape
    max_err = float(jnp.max(jnp.abs(out - ref)))
    # Tolerance covers default in-kernel MXU matmul precision vs the
    # HIGHEST-precision XLA reference across the 6 chained conv stages.
    assert max_err < 2e-3, "max abs error %g" % max_err
    print("KERNEL_OK")
</pallas_src>

<mosaic_0001>
module attributes {stable_mosaic.version = 11 : i64} {
  func.func @kffm_kernel(%arg0: i32, %arg1: memref<1x8x256xf32, #tpu.memory_space<vmem>>, %arg2: memref<88x8xf32, #tpu.memory_space<vmem>>, %arg3: memref<72x2xf32, #tpu.memory_space<vmem>>, %arg4: memref<8x4xf32, #tpu.memory_space<vmem>>, %arg5: memref<8x256xf32, #tpu.memory_space<vmem>>, %arg6: memref<1x8x256xf32, #tpu.memory_space<vmem>>, %arg7: memref<8x512xf32, #tpu.memory_space<vmem>>) attributes {dimension_semantics = [#tpu.dimension_semantics<parallel>], iteration_bounds = array<i64: 2>, scalar_prefetch = 0 : i64, scratch_operands = 1 : i64, tpu.core_type = #tpu.core_type<tc>, window_params = [{transform_indices = @transform_0, window_bounds = array<i64: 1, 8, 256>}, {pipeline_mode = #tpu.pipeline_mode<synchronous>, transform_indices = @transform_1, window_bounds = array<i64: 88, 8>}, {pipeline_mode = #tpu.pipeline_mode<synchronous>, transform_indices = @transform_2, window_bounds = array<i64: 72, 2>}, {pipeline_mode = #tpu.pipeline_mode<synchronous>, transform_indices = @transform_3, window_bounds = array<i64: 8, 4>}, {pipeline_mode = #tpu.pipeline_mode<synchronous>, transform_indices = @transform_4, window_bounds = array<i64: 8, 256>}, {transform_indices = @transform_5, window_bounds = array<i64: 1, 8, 256>}]} {
    %cst = arith.constant 0.000000e+00 : f32
    %0 = vector.broadcast %cst : f32 to vector<8x512xf32>
    %c0 = arith.constant 0 : index
    %c0_0 = arith.constant 0 : index
    %1 = vector.load %arg7[%c0, %c0_0] : memref<8x512xf32, #tpu.memory_space<vmem>>, vector<8x512xf32>
    tpu.vector_store %arg7[%c0, %c0_0], %0 {strides = array<i32>} : memref<8x512xf32, #tpu.memory_space<vmem>>, vector<8x512xf32>,
    %c0_1 = arith.constant 0 : index
    %c0_2 = arith.constant 0 : index
    %c0_3 = arith.constant 0 : index
    %2 = vector.load %arg1[%c0_1, %c0_2, %c0_3] : memref<1x8x256xf32, #tpu.memory_space<vmem>>, vector<1x8x256xf32>
    %3 = vector.shape_cast %2 : vector<1x8x256xf32> to vector<8x256xf32>
    %c0_4 = arith.constant 0 : index
    %c0_5 = arith.constant 0 : index
    %4 = vector.load %arg2[%c0_4, %c0_5] : memref<88x8xf32, #tpu.memory_space<vmem>>, vector<8x8xf32>
    %cst_6 = arith.constant dense<0.000000e+00> : vector<8x256xf32>
    %5 = tpu.matmul %4, %3, %cst_6 {dimension_numbers = #tpu.dot_dimension_numbers<[1], [0], [0], [1], [0, 0, 1, 1], [], []>} : vector<8x8xf32>, vector<8x256xf32>, vector<8x256xf32> -> vector<8x256xf32>
    %c0_7 = arith.constant 0 : index
    %c0_8 = arith.constant 0 : index
    %6 = vector.load %arg4[%c0_7, %c0_8] : memref<8x4xf32, #tpu.memory_space<vmem>>, vector<8x1xf32>
    %7 = vector.broadcast %6 : vector<8x1xf32> to vector<8x256xf32>
    %8 = arith.addf %5, %7 : vector<8x256xf32>
    %cst_9 = arith.constant 0.000000e+00 : f32
    %9 = vector.broadcast %cst_9 : f32 to vector<8x256xf32>
    %10 = arith.maximumf %8, %9 : vector<8x256xf32>
    %11 = vector.extract_strided_slice %10 {offsets = [0, 0], sizes = [2, 256], strides = [1, 1]} : vector<8x256xf32> to vector<2x256xf32>
    %12 = vector.extract_strided_slice %10 {offsets = [2, 0], sizes = [2, 256], strides = [1, 1]} : vector<8x256xf32> to vector<2x256xf32>
    %13 = vector.extract_strided_slice %10 {offsets = [4, 0], sizes = [2, 256], strides = [1, 1]} : vector<8x256xf32> to vector<2x256xf32>
    %14 = vector.extract_strided_slice %10 {offsets = [6, 0], sizes = [2, 256], strides = [1, 1]} : vector<8x256xf32> to vector<2x256xf32>
    %15 = arith.addf %11, %12 : vector<2x256xf32>
    %c0_10 = arith.constant 0 : index
    %c3 = arith.constant 3 : index
    %16 = vector.load %arg4[%c0_10, %c3] : memref<8x4xf32, #tpu.memory_space<vmem>>, vector<2x1xf32>
    %c0_11 = arith.constant 0 : index
    %c128 = arith.constant 128 : index
    %17 = vector.load %arg7[%c0_11, %c128] : memref<8x512xf32, #tpu.memory_space<vmem>>, vector<2x256xf32>
    tpu.vector_store %arg7[%c0_11, %c128], %15 {strides = array<i32>} : memref<8x512xf32, #tpu.memory_space<vmem>>, vector<2x256xf32>,
    %c0_12 = arith.constant 0 : index
    %c111 = arith.constant 111 : index
    %18 = vector.load %arg7[%c0_12, %c111] : memref<8x512xf32, #tpu.memory_space<vmem>>, vector<2x256xf32>
    %c0_13 = arith.constant 0 : index
    %c0_14 = arith.constant 0 : index
    %19 = vector.load %arg5[%c0_13, %c0_14] : memref<8x256xf32, #tpu.memory_space<vmem>>, vector<1x256xf32>
    %20 = vector.broadcast %19 : vector<1x256xf32> to vector<2x256xf32>
    %21 = arith.mulf %18, %20 : vector<2x256xf32>
    %c0_15 = arith.constant 0 : index
    %c0_16 = arith.constant 0 : index
    %22 = vector.load %arg3[%c0_15, %c0_16] : memref<72x2xf32, #tpu.memory_space<vmem>>, vector<2x2xf32>
    %cst_17 = arith.constant dense<0.000000e+00> : vector<2x256xf32>
    %23 = tpu.matmul %22, %21, %cst_17 {dimension_numbers = #tpu.dot_dimension_numbers<[1], [0], [0], [1], [0, 0, 1, 1], [], []>} : vector<2x2xf32>, vector<2x256xf32>, vector<2x256xf32> -> vector<2x256xf32>
    %c0_18 = arith.constant 0 : index
    %c112 = arith.constant 112 : index
    %24 = vector.load %arg7[%c0_18, %c112] : memref<8x512xf32, #tpu.memory_space<vmem>>, vector<2x256xf32>
    %c2 = arith.constant 2 : index
    %c0_19 = arith.constant 0 : index
    %25 = vector.load %arg3[%c2, %c0_19] : memref<72x2xf32, #tpu.memory_space<vmem>>, vector<2x2xf32>
    %cst_20 = arith.constant dense<0.000000e+00> : vector<2x256xf32>
    %26 = tpu.matmul %25, %24, %cst_20 {dimension_numbers = #tpu.dot_dimension_numbers<[1], [0], [0], [1], [0, 0, 1, 1], [], []>} : vector<2x2xf32>, vector<2x256xf32>, vector<2x256xf32> -> vector<2x256xf32>
    %27 = arith.addf %23, %26 : vector<2x256xf32>
    %c0_21 = arith.constant 0 : index
    %c113 = arith.constant 113 : index
    %28 = vector.load %arg7[%c0_21, %c113] : memref<8x512xf32, #tpu.memory_space<vmem>>, vector<2x256xf32>
    %c1 = arith.constant 1 : index
    %c0_22 = arith.constant 0 : index
    %29 = vector.load %arg5[%c1, %c0_22] : memref<8x256xf32, #tpu.memory_space<vmem>>, vector<1x256xf32>
    %30 = vector.broadcast %29 : vector<1x256xf32> to vector<2x256xf32>
    %31 = arith.mulf %28, %30 : vector<2x256xf32>
    %c4 = arith.constant 4 : index
    %c0_23 = arith.constant 0 : index
    %32 = vector.load %arg3[%c4, %c0_23] : memref<72x2xf32, #tpu.memory_space<vmem>>, vector<2x2xf32>
    %cst_24 = arith.constant dense<0.000000e+00> : vector<2x256xf32>
    %33 = tpu.matmul %32, %31, %cst_24 {dimension_numbers = #tpu.dot_dimension_numbers<[1], [0], [0], [1], [0, 0, 1, 1], [], []>} : vector<2x2xf32>, vector<2x256xf32>, vector<2x256xf32> -> vector<2x256xf32>
    %34 = arith.addf %27, %33 : vector<2x256xf32>
    %c0_25 = arith.constant 0 : index
    %c127 = arith.constant 127 : index
    %35 = vector.load %arg7[%c0_25, %c127] : memref<8x512xf32, #tpu.memory_space<vmem>>, vector<2x256xf32>
    %c0_26 = arith.constant 0 : index
    %c0_27 = arith.constant 0 : index
    %36 = vector.load %arg5[%c0_26, %c0_27] : memref<8x256xf32, #tpu.memory_space<vmem>>, vector<1x256xf32>
    %37 = vector.broadcast %36 : vector<1x256xf32> to vector<2x256xf32>
    %38 = arith.mulf %35, %37 : vector<2x256xf32>
    %c6 = arith.constant 6 : index
    %c0_28 = arith.constant 0 : index
    %39 = vector.load %arg3[%c6, %c0_28] : memref<72x2xf32, #tpu.memory_space<vmem>>, vector<2x2xf32>
    %cst_29 = arith.constant dense<0.000000e+00> : vector<2x256xf32>
    %40 = tpu.matmul %39, %38, %cst_29 {dimension_numbers = #tpu.dot_dimension_numbers<[1], [0], [0], [1], [0, 0, 1, 1], [], []>} : vector<2x2xf32>, vector<2x256xf32>, vector<2x256xf32> -> vector<2x256xf32>
    %41 = arith.addf %34, %40 : vector<2x256xf32>
    %c0_30 = arith.constant 0 : index
    %c128_31 = arith.constant 128 : index
    %42 = vector.load %arg7[%c0_30, %c128_31] : memref<8x512xf32, #tpu.memory_space<vmem>>, vector<2x256xf32>
    %c8 = arith.constant 8 : index
    %c0_32 = arith.constant 0 : index
    %43 = vector.load %arg3[%c8, %c0_32] : memref<72x2xf32, #tpu.memory_space<vmem>>, vector<2x2xf32>
    %cst_33 = arith.constant dense<0.000000e+00> : vector<2x256xf32>
    %44 = tpu.matmul %43, %42, %cst_33 {dimension_numbers = #tpu.dot_dimension_numbers<[1], [0], [0], [1], [0, 0, 1, 1], [], []>} : vector<2x2xf32>, vector<2x256xf32>, vector<2x256xf32> -> vector<2x256xf32>
    %45 = arith.addf %41, %44 : vector<2x256xf32>
    %c0_34 = arith.constant 0 : index
    %c129 = arith.constant 129 : index
    %46 = vector.load %arg7[%c0_34, %c129] : memref<8x512xf32, #tpu.memory_space<vmem>>, vector<2x256xf32>
    %c1_35 = arith.constant 1 : index
    %c0_36 = arith.constant 0 : index
    %47 = vector.load %arg5[%c1_35, %c0_36] : memref<8x256xf32, #tpu.memory_space<vmem>>, vector<1x256xf32>
    %48 = vector.broadcast %47 : vector<1x256xf32> to vector<2x256xf32>
    %49 = arith.mulf %46, %48 : vector<2x256xf32>
    %c10 = arith.constant 10 : index
    %c0_37 = arith.constant 0 : index
    %50 = vector.load %arg3[%c10, %c0_37] : memref<72x2xf32, #tpu.memory_space<vmem>>, vector<2x2xf32>
    %cst_38 = arith.constant dense<0.000000e+00> : vector<2x256xf32>
    %51 = tpu.matmul %50, %49, %cst_38 {dimension_numbers = #tpu.dot_dimension_numbers<[1], [0], [0], [1], [0, 0, 1, 1], [], []>} : vector<2x2xf32>, vector<2x256xf32>, vector<2x256xf32> -> vector<2x256xf32>
    %52 = arith.addf %45, %51 : vector<2x256xf32>
    %c0_39 = arith.constant 0 : index
    %c143 = arith.constant 143 : index
    %53 = vector.load %arg7[%c0_39, %c143] : memref<8x512xf32, #tpu.memory_space<vmem>>, vector<2x256xf32>
    %c0_40 = arith.constant 0 : index
    %c0_41 = arith.constant 0 : index
    %54 = vector.load %arg5[%c0_40, %c0_41] : memref<8x256xf32, #tpu.memory_space<vmem>>, vector<1x256xf32>
    %55 = vector.broadcast %54 : vector<1x256xf32> to vector<2x256xf32>
    %56 = arith.mulf %53, %55 : vector<2x256xf32>
    %c12 = arith.constant 12 : index
    %c0_42 = arith.constant 0 : index
    %57 = vector.load %arg3[%c12, %c0_42] : memref<72x2xf32, #tpu.memory_space<vmem>>, vector<2x2xf32>
    %cst_43 = arith.constant dense<0.000000e+00> : vector<2x256xf32>
    %58 = tpu.matmul %57, %56, %cst_43 {dimension_numbers = #tpu.dot_dimension_numbers<[1], [0], [0], [1], [0, 0, 1, 1], [], []>} : vector<2x2xf32>, vector<2x256xf32>, vector<2x256xf32> -> vector<2x256xf32>
    %59 = arith.addf %52, %58 : vector<2x256xf32>
    %c0_44 = arith.constant 0 : index
    %c144 = arith.constant 144 : index
    %60 = vector.load %arg7[%c0_44, %c144] : memref<8x512xf32, #tpu.memory_space<vmem>>, vector<2x256xf32>
    %c14 = arith.constant 14 : index
    %c0_45 = arith.constant 0 : index
    %61 = vector.load %arg3[%c14, %c0_45] : memref<72x2xf32, #tpu.memory_space<vmem>>, vector<2x2xf32>
    %cst_46 = arith.constant dense<0.000000e+00> : vector<2x256xf32>
    %62 = tpu.matmul %61, %60, %cst_46 {dimension_numbers = #tpu.dot_dimension_numbers<[1], [0], [0], [1], [0, 0, 1, 1], [], []>} : vector<2x2xf32>, vector<2x256xf32>, vector<2x256xf32> -> vector<2x256xf32>
    %63 = arith.addf %59, %62 : vector<2x256xf32>
    %c0_47 = arith.constant 0 : index
    %c145 = arith.constant 145 : index
    %64 = vector.load %arg7[%c0_47, %c145] : memref<8x512xf32, #tpu.memory_space<vmem>>, vector<2x256xf32>
    %c1_48 = arith.constant 1 : index
    %c0_49 = arith.constant 0 : index
    %65 = vector.load %arg5[%c1_48, %c0_49] : memref<8x256xf32, #tpu.memory_space<vmem>>, vector<1x256xf32>
    %66 = vector.broadcast %65 : vector<1x256xf32> to vector<2x256xf32>
    %67 = arith.mulf %64, %66 : vector<2x256xf32>
    %c16 = arith.constant 16 : index
    %c0_50 = arith.constant 0 : index
    %68 = vector.load %arg3[%c16, %c0_50] : memref<72x2xf32, #tpu.memory_space<vmem>>, vector<2x2xf32>
    %cst_51 = arith.constant dense<0.000000e+00> : vector<2x256xf32>
    %69 = tpu.matmul %68, %67, %cst_51 {dimension_numbers = #tpu.dot_dimension_numbers<[1], [0], [0], [1], [0, 0, 1, 1], [], []>} : vector<2x2xf32>, vector<2x256xf32>, vector<2x256xf32> -> vector<2x256xf32>
    %70 = arith.addf %63, %69 : vector<2x256xf32>
    %71 = vector.broadcast %16 : vector<2x1xf32> to vector<2x256xf32>
    %72 = arith.addf %70, %71 : vector<2x256xf32>
    %cst_52 = arith.constant 0.000000e+00 : f32
    %73 = vector.broadcast %cst_52 : f32 to vector<2x256xf32>
    %74 = arith.maximumf %72, %73 : vector<2x256xf32>
    %75 = arith.addf %12, %74 : vector<2x256xf32>
    %76 = arith.addf %75, %13 : vector<2x256xf32>
    %c2_53 = arith.constant 2 : index
    %c3_54 = arith.constant 3 : index
    %77 = vector.load %arg4[%c2_53, %c3_54] : memref<8x4xf32, #tpu.memory_space<vmem>>, vector<2x1xf32>
    %c0_55 = arith.constant 0 : index
    %c128_56 = arith.constant 128 : index
    %78 = vector.load %arg7[%c0_55, %c128_56] : memref<8x512xf32, #tpu.memory_space<vmem>>, vector<2x256xf32>
    tpu.vector_store %arg7[%c0_55, %c128_56], %76 {strides = array<i32>} : memref<8x512xf32, #tpu.memory_space<vmem>>, vector<2x256xf32>,
    %c0_57 = arith.constant 0 : index
    %c94 = arith.constant 94 : index
    %79 = vector.load %arg7[%c0_57, %c94] : memref<8x512xf32, #tpu.memory_space<vmem>>, vector<2x256xf32>
    %c2_58 = arith.constant 2 : index
    %c0_59 = arith.constant 0 : index
    %80 = vector.load %arg5[%c2_58, %c0_59] : memref<8x256xf32, #tpu.memory_space<vmem>>, vector<1x256xf32>
    %81 = vector.broadcast %80 : vector<1x256xf32> to vector<2x256xf32>
    %82 = arith.mulf %79, %81 : vector<2x256xf32>
    %c18 = arith.constant 18 : index
    %c0_60 = arith.constant 0 : index
    %83 = vector.load %arg3[%c18, %c0_60] : memref<72x2xf32, #tpu.memory_space<vmem>>, vector<2x2xf32>
    %cst_61 = arith.constant dense<0.000000e+00> : vector<2x256xf32>
    %84 = tpu.matmul %83, %82, %cst_61 {dimension_numbers = #tpu.dot_dimension_numbers<[1], [0], [0], [1], [0, 0, 1, 1], [], []>} : vector<2x2xf32>, vector<2x256xf32>, vector<2x256xf32> -> vector<2x256xf32>
    %c0_62 = arith.constant 0 : index
    %c96 = arith.constant 96 : index
    %85 = vector.load %arg7[%c0_62, %c96] : memref<8x512xf32, #tpu.memory_space<vmem>>, vector<2x256xf32>
    %c20 = arith.constant 20 : index
    %c0_63 = arith.constant 0 : index
    %86 = vector.load %arg3[%c20, %c0_63] : memref<72x2xf32, #tpu.memory_space<vmem>>, vector<2x2xf32>
    %cst_64 = arith.constant dense<0.000000e+00> : vector<2x256xf32>
    %87 = tpu.matmul %86, %85, %cst_64 {dimension_numbers = #tpu.dot_dimension_numbers<[1], [0], [0], [1], [0, 0, 1, 1], [], []>} : vector<2x2xf32>, vector<2x256xf32>, vector<2x256xf32> -> vector<2x256xf32>
    %88 = arith.addf %84, %87 : vector<2x256xf32>
    %c0_65 = arith.constant 0 : index
    %c98 = arith.constant 98 : index
    %89 = vector.load %arg7[%c0_65, %c98] : memref<8x512xf32, #tpu.memory_space<vmem>>, vector<2x256xf32>
    %c3_66 = arith.constant 3 : index
    %c0_67 = arith.constant 0 : index
    %90 = vector.load %arg5[%c3_66, %c0_67] : memref<8x256xf32, #tpu.memory_space<vmem>>, vector<1x256xf32>
    %91 = vector.broadcast %90 : vector<1x256xf32> to vector<2x256xf32>
    %92 = arith.mulf %89, %91 : vector<2x256xf32>
    %c22 = arith.constant 22 : index
    %c0_68 = arith.constant 0 : index
    %93 = vector.load %arg3[%c22, %c0_68] : memref<72x2xf32, #tpu.memory_space<vmem>>, vector<2x2xf32>
    %cst_69 = arith.constant dense<0.000000e+00> : vector<2x256xf32>
    %94 = tpu.matmul %93, %92, %cst_69 {dimension_numbers = #tpu.dot_dimension_numbers<[1], [0], [0], [1], [0, 0, 1, 1], [], []>} : vector<2x2xf32>, vector<2x256xf32>, vector<2x256xf32> -> vector<2x256xf32>
    %95 = arith.addf %88, %94 : vector<2x256xf32>
    %c0_70 = arith.constant 0 : index
    %c126 = arith.constant 126 : index
    %96 = vector.load %arg7[%c0_70, %c126] : memref<8x512xf32, #tpu.memory_space<vmem>>, vector<2x256xf32>
    %c2_71 = arith.constant 2 : index
    %c0_72 = arith.constant 0 : index
    %97 = vector.load %arg5[%c2_71, %c0_72] : memref<8x256xf32, #tpu.memory_space<vmem>>, vector<1x256xf32>
    %98 = vector.broadcast %97 : vector<1x256xf32> to vector<2x256xf32>
    %99 = arith.mulf %96, %98 : vector<2x256xf32>
    %c24 = arith.constant 24 : index
    %c0_73 = arith.constant 0 : index
    %100 = vector.load %arg3[%c24, %c0_73] : memref<72x2xf32, #tpu.memory_space<vmem>>, vector<2x2xf32>
    %cst_74 = arith.constant dense<0.000000e+00> : vector<2x256xf32>
    %101 = tpu.matmul %100, %99, %cst_74 {dimension_numbers = #tpu.dot_dimension_numbers<[1], [0], [0], [1], [0, 0, 1, 1], [], []>} : vector<2x2xf32>, vector<2x256xf32>, vector<2x256xf32> -> vector<2x256xf32>
    %102 = arith.addf %95, %101 : vector<2x256xf32>
    %c0_75 = arith.constant 0 : index
    %c128_76 = arith.constant 128 : index
    %103 = vector.load %arg7[%c0_75, %c128_76] : memref<8x512xf32, #tpu.memory_space<vmem>>, vector<2x256xf32>
    %c26 = arith.constant 26 : index
    %c0_77 = arith.constant 0 : index
    %104 = vector.load %arg3[%c26, %c0_77] : memref<72x2xf32, #tpu.memory_space<vmem>>, vector<2x2xf32>
    %cst_78 = arith.constant dense<0.000000e+00> : vector<2x256xf32>
    %105 = tpu.matmul %104, %103, %cst_78 {dimension_numbers = #tpu.dot_dimension_numbers<[1], [0], [0], [1], [0, 0, 1, 1], [], []>} : vector<2x2xf32>, vector<2x256xf32>, vector<2x256xf32> -> vector<2x256xf32>
    %106 = arith.addf %102, %105 : vector<2x256xf32>
    %c0_79 = arith.constant 0 : index
    %c130 = arith.constant 130 : index
    %107 = vector.load %arg7[%c0_79, %c130] : memref<8x512xf32, #tpu.memory_space<vmem>>, vector<2x256xf32>
    %c3_80 = arith.constant 3 : index
    %c0_81 = arith.constant 0 : index
    %108 = vector.load %arg5[%c3_80, %c0_81] : memref<8x256xf32, #tpu.memory_space<vmem>>, vector<1x256xf32>
    %109 = vector.broadcast %108 : vector<1x256xf32> to vector<2x256xf32>
    %110 = arith.mulf %107, %109 : vector<2x256xf32>
    %c28 = arith.constant 28 : index
    %c0_82 = arith.constant 0 : index
    %111 = vector.load %arg3[%c28, %c0_82] : memref<72x2xf32, #tpu.memory_space<vmem>>, vector<2x2xf32>
    %cst_83 = arith.constant dense<0.000000e+00> : vector<2x256xf32>
    %112 = tpu.matmul %111, %110, %cst_83 {dimension_numbers = #tpu.dot_dimension_numbers<[1], [0], [0], [1], [0, 0, 1, 1], [], []>} : vector<2x2xf32>, vector<2x256xf32>, vector<2x256xf32> -> vector<2x256xf32>
    %113 = arith.addf %106, %112 : vector<2x256xf32>
    %c0_84 = arith.constant 0 : index
    %c158 = arith.constant 158 : index
    %114 = vector.load %arg7[%c0_84, %c158] : memref<8x512xf32, #tpu.memory_space<vmem>>, vector<2x256xf32>
    %c2_85 = arith.constant 2 : index
    %c0_86 = arith.constant 0 : index
    %115 = vector.load %arg5[%c2_85, %c0_86] : memref<8x256xf32, #tpu.memory_space<vmem>>, vector<1x256xf32>
    %116 = vector.broadcast %115 : vector<1x256xf32> to vector<2x256xf32>
    %117 = arith.mulf %114, %116 : vector<2x256xf32>
    %c30 = arith.constant 30 : index
    %c0_87 = arith.constant 0 : index
    %118 = vector.load %arg3[%c30, %c0_87] : memref<72x2xf32, #tpu.memory_space<vmem>>, vector<2x2xf32>
    %cst_88 = arith.constant dense<0.000000e+00> : vector<2x256xf32>
    %119 = tpu.matmul %118, %117, %cst_88 {dimension_numbers = #tpu.dot_dimension_numbers<[1], [0], [0], [1], [0, 0, 1, 1], [], []>} : vector<2x2xf32>, vector<2x256xf32>, vector<2x256xf32> -> vector<2x256xf32>
    %120 = arith.addf %113, %119 : vector<2x256xf32>
    %c0_89 = arith.constant 0 : index
    %c160 = arith.constant 160 : index
    %121 = vector.load %arg7[%c0_89, %c160] : memref<8x512xf32, #tpu.memory_space<vmem>>, vector<2x256xf32>
    %c32 = arith.constant 32 : index
    %c0_90 = arith.constant 0 : index
    %122 = vector.load %arg3[%c32, %c0_90] : memref<72x2xf32, #tpu.memory_space<vmem>>, vector<2x2xf32>
    %cst_91 = arith.constant dense<0.000000e+00> : vector<2x256xf32>
    %123 = tpu.matmul %122, %121, %cst_91 {dimension_numbers = #tpu.dot_dimension_numbers<[1], [0], [0], [1], [0, 0, 1, 1], [], []>} : vector<2x2xf32>, vector<2x256xf32>, vector<2x256xf32> -> vector<2x256xf32>
    %124 = arith.addf %120, %123 : vector<2x256xf32>
    %c0_92 = arith.constant 0 : index
    %c162 = arith.constant 162 : index
    %125 = vector.load %arg7[%c0_92, %c162] : memref<8x512xf32, #tpu.memory_space<vmem>>, vector<2x256xf32>
    %c3_93 = arith.constant 3 : index
    %c0_94 = arith.constant 0 : index
    %126 = vector.load %arg5[%c3_93, %c0_94] : memref<8x256xf32, #tpu.memory_space<vmem>>, vector<1x256xf32>
    %127 = vector.broadcast %126 : vector<1x256xf32> to vector<2x256xf32>
    %128 = arith.mulf %125, %127 : vector<2x256xf32>
    %c34 = arith.constant 34 : index
    %c0_95 = arith.constant 0 : index
    %129 = vector.load %arg3[%c34, %c0_95] : memref<72x2xf32, #tpu.memory_space<vmem>>, vector<2x2xf32>
    %cst_96 = arith.constant dense<0.000000e+00> : vector<2x256xf32>
    %130 = tpu.matmul %129, %128, %cst_96 {dimension_numbers = #tpu.dot_dimension_numbers<[1], [0], [0], [1], [0, 0, 1, 1], [], []>} : vector<2x2xf32>, vector<2x256xf32>, vector<2x256xf32> -> vector<2x256xf32>
    %131 = arith.addf %124, %130 : vector<2x256xf32>
    %132 = vector.broadcast %77 : vector<2x1xf32> to vector<2x256xf32>
    %133 = arith.addf %131, %132 : vector<2x256xf32>
    %cst_97 = arith.constant 0.000000e+00 : f32
    %134 = vector.broadcast %cst_97 : f32 to vector<2x256xf32>
    %135 = arith.maximumf %133, %134 : vector<2x256xf32>
    %136 = arith.addf %13, %135 : vector<2x256xf32>
    %137 = arith.addf %136, %14 : vector<2x256xf32>
    %c4_98 = arith.constant 4 : index
    %c3_99 = arith.constant 3 : index
    %138 = vector.load %arg4[%c4_98, %c3_99] : memref<8x4xf32, #tpu.memory_space<vmem>>, vector<2x1xf32>
    %c0_100 = arith.constant 0 : index
    %c128_101 = arith.constant 128 : index
    %139 = vector.load %arg7[%c0_100, %c128_101] : memref<8x512xf32, #tpu.memory_space<vmem>>, vector<2x256xf32>
    tpu.vector_store %arg7[%c0_100, %c128_101], %137 {strides = array<i32>} : memref<8x512xf32, #tpu.memory_space<vmem>>, vector<2x256xf32>,
    %c0_102 = arith.constant 0 : index
    %c77 = arith.constant 77 : index
    %140 = vector.load %arg7[%c0_102, %c77] : memref<8x512xf32, #tpu.memory_space<vmem>>, vector<2x256xf32>
    %c4_103 = arith.constant 4 : index
    %c0_104 = arith.constant 0 : index
    %141 = vector.load %arg5[%c4_103, %c0_104] : memref<8x256xf32, #tpu.memory_space<vmem>>, vector<1x256xf32>
    %142 = vector.broadcast %141 : vector<1x256xf32> to vector<2x256xf32>
    %143 = arith.mulf %140, %142 : vector<2x256xf32>
    %c36 = arith.constant 36 : index
    %c0_105 = arith.constant 0 : index
    %144 = vector.load %arg3[%c36, %c0_105] : memref<72x2xf32, #tpu.memory_space<vmem>>, vector<2x2xf32>
    %cst_106 = arith.constant dense<0.000000e+00> : vector<2x256xf32>
    %145 = tpu.matmul %144, %143, %cst_106 {dimension_numbers = #tpu.dot_dimension_numbers<[1], [0], [0], [1], [0, 0, 1, 1], [], []>} : vector<2x2xf32>, vector<2x256xf32>, vector<2x256xf32> -> vector<2x256xf32>
    %c0_107 = arith.constant 0 : index
    %c80 = arith.constant 80 : index
    %146 = vector.load %arg7[%c0_107, %c80] : memref<8x512xf32, #tpu.memory_space<vmem>>, vector<2x256xf32>
    %c38 = arith.constant 38 : index
    %c0_108 = arith.constant 0 : index
    %147 = vector.load %arg3[%c38, %c0_108] : memref<72x2xf32, #tpu.memory_space<vmem>>, vector<2x2xf32>
    %cst_109 = arith.constant dense<0.000000e+00> : vector<2x256xf32>
    %148 = tpu.matmul %147, %146, %cst_109 {dimension_numbers = #tpu.dot_dimension_numbers<[1], [0], [0], [1], [0, 0, 1, 1], [], []>} : vector<2x2xf32>, vector<2x256xf32>, vector<2x256xf32> -> vector<2x256xf32>
    %149 = arith.addf %145, %148 : vector<2x256xf32>
    %c0_110 = arith.constant 0 : index
    %c83 = arith.constant 83 : index
    %150 = vector.load %arg7[%c0_110, %c83] : memref<8x512xf32, #tpu.memory_space<vmem>>, vector<2x256xf32>
    %c5 = arith.constant 5 : index
    %c0_111 = arith.constant 0 : index
    %151 = vector.load %arg5[%c5, %c0_111] : memref<8x256xf32, #tpu.memory_space<vmem>>, vector<1x256xf32>
    %152 = vector.broadcast %151 : vector<1x256xf32> to vector<2x256xf32>
    %153 = arith.mulf %150, %152 : vector<2x256xf32>
    %c40 = arith.constant 40 : index
    %c0_112 = arith.constant 0 : index
    %154 = vector.load %arg3[%c40, %c0_112] : memref<72x2xf32, #tpu.memory_space<vmem>>, vector<2x2xf32>
    %cst_113 = arith.constant dense<0.000000e+00> : vector<2x256xf32>
    %155 = tpu.matmul %154, %153, %cst_113 {dimension_numbers = #tpu.dot_dimension_numbers<[1], [0], [0], [1], [0, 0, 1, 1], [], []>} : vector<2x2xf32>, vector<2x256xf32>, vector<2x256xf32> -> vector<2x256xf32>
    %156 = arith.addf %149, %155 : vector<2x256xf32>
    %c0_114 = arith.constant 0 : index
    %c125 = arith.constant 125 : index
    %157 = vector.load %arg7[%c0_114, %c125] : memref<8x512xf32, #tpu.memory_space<vmem>>, vector<2x256xf32>
    %c4_115 = arith.constant 4 : index
    %c0_116 = arith.constant 0 : index
    %158 = vector.load %arg5[%c4_115, %c0_116] : memref<8x256xf32, #tpu.memory_space<vmem>>, vector<1x256xf32>
    %159 = vector.broadcast %158 : vector<1x256xf32> to vector<2x256xf32>
    %160 = arith.mulf %157, %159 : vector<2x256xf32>
    %c42 = arith.constant 42 : index
    %c0_117 = arith.constant 0 : index
    %161 = vector.load %arg3[%c42, %c0_117] : memref<72x2xf32, #tpu.memory_space<vmem>>, vector<2x2xf32>
    %cst_118 = arith.constant dense<0.000000e+00> : vector<2x256xf32>
    %162 = tpu.matmul %161, %160, %cst_118 {dimension_numbers = #tpu.dot_dimension_numbers<[1], [0], [0], [1], [0, 0, 1, 1], [], []>} : vector<2x2xf32>, vector<2x256xf32>, vector<2x256xf32> -> vector<2x256xf32>
    %163 = arith.addf %156, %162 : vector<2x256xf32>
    %c0_119 = arith.constant 0 : index
    %c128_120 = arith.constant 128 : index
    %164 = vector.load %arg7[%c0_119, %c128_120] : memref<8x512xf32, #tpu.memory_space<vmem>>, vector<2x256xf32>
    %c44 = arith.constant 44 : index
    %c0_121 = arith.constant 0 : index
    %165 = vector.load %arg3[%c44, %c0_121] : memref<72x2xf32, #tpu.memory_space<vmem>>, vector<2x2xf32>
    %cst_122 = arith.constant dense<0.000000e+00> : vector<2x256xf32>
    %166 = tpu.matmul %165, %164, %cst_122 {dimension_numbers = #tpu.dot_dimension_numbers<[1], [0], [0], [1], [0, 0, 1, 1], [], []>} : vector<2x2xf32>, vector<2x256xf32>, vector<2x256xf32> -> vector<2x256xf32>
    %167 = arith.addf %163, %166 : vector<2x256xf32>
    %c0_123 = arith.constant 0 : index
    %c131 = arith.constant 131 : index
    %168 = vector.load %arg7[%c0_123, %c131] : memref<8x512xf32, #tpu.memory_space<vmem>>, vector<2x256xf32>
    %c5_124 = arith.constant 5 : index
    %c0_125 = arith.constant 0 : index
    %169 = vector.load %arg5[%c5_124, %c0_125] : memref<8x256xf32, #tpu.memory_space<vmem>>, vector<1x256xf32>
    %170 = vector.broadcast %169 : vector<1x256xf32> to vector<2x256xf32>
    %171 = arith.mulf %168, %170 : vector<2x256xf32>
    %c46 = arith.constant 46 : index
    %c0_126 = arith.constant 0 : index
    %172 = vector.load %arg3[%c46, %c0_126] : memref<72x2xf32, #tpu.memory_space<vmem>>, vector<2x2xf32>
    %cst_127 = arith.constant dense<0.000000e+00> : vector<2x256xf32>
    %173 = tpu.matmul %172, %171, %cst_127 {dimension_numbers = #tpu.dot_dimension_numbers<[1], [0], [0], [1], [0, 0, 1, 1], [], []>} : vector<2x2xf32>, vector<2x256xf32>, vector<2x256xf32> -> vector<2x256xf32>
    %174 = arith.addf %167, %173 : vector<2x256xf32>
    %c0_128 = arith.constant 0 : index
    %c173 = arith.constant 173 : index
    %175 = vector.load %arg7[%c0_128, %c173] : memref<8x512xf32, #tpu.memory_space<vmem>>, vector<2x256xf32>
    %c4_129 = arith.constant 4 : index
    %c0_130 = arith.constant 0 : index
    %176 = vector.load %arg5[%c4_129, %c0_130] : memref<8x256xf32, #tpu.memory_space<vmem>>, vector<1x256xf32>
    %177 = vector.broadcast %176 : vector<1x256xf32> to vector<2x256xf32>
    %178 = arith.mulf %175, %177 : vector<2x256xf32>
    %c48 = arith.constant 48 : index
    %c0_131 = arith.constant 0 : index
    %179 = vector.load %arg3[%c48, %c0_131] : memref<72x2xf32, #tpu.memory_space<vmem>>, vector<2x2xf32>
    %cst_132 = arith.constant dense<0.000000e+00> : vector<2x256xf32>
    %180 = tpu.matmul %179, %178, %cst_132 {dimension_numbers = #tpu.dot_dimension_numbers<[1], [0], [0], [1], [0, 0, 1, 1], [], []>} : vector<2x2xf32>, vector<2x256xf32>, vector<2x256xf32> -> vector<2x256xf32>
    %181 = arith.addf %174, %180 : vector<2x256xf32>
    %c0_133 = arith.constant 0 : index
    %c176 = arith.constant 176 : index
    %182 = vector.load %arg7[%c0_133, %c176] : memref<8x512xf32, #tpu.memory_space<vmem>>, vector<2x256xf32>
    %c50 = arith.constant 50 : index
    %c0_134 = arith.constant 0 : index
    %183 = vector.load %arg3[%c50, %c0_134] : memref<72x2xf32, #tpu.memory_space<vmem>>, vector<2x2xf32>
    %cst_135 = arith.constant dense<0.000000e+00> : vector<2x256xf32>
    %184 = tpu.matmul %183, %182, %cst_135 {dimension_numbers = #tpu.dot_dimension_numbers<[1], [0], [0], [1], [0, 0, 1, 1], [], []>} : vector<2x2xf32>, vector<2x256xf32>, vector<2x256xf32> -> vector<2x256xf32>
    %185 = arith.addf %181, %184 : vector<2x256xf32>
    %c0_136 = arith.constant 0 : index
    %c179 = arith.constant 179 : index
    %186 = vector.load %arg7[%c0_136, %c179] : memref<8x512xf32, #tpu.memory_space<vmem>>, vector<2x256xf32>
    %c5_137 = arith.constant 5 : index
    %c0_138 = arith.constant 0 : index
    %187 = vector.load %arg5[%c5_137, %c0_138] : memref<8x256xf32, #tpu.memory_space<vmem>>, vector<1x256xf32>
    %188 = vector.broadcast %187 : vector<1x256xf32> to vector<2x256xf32>
    %189 = arith.mulf %186, %188 : vector<2x256xf32>
    %c52 = arith.constant 52 : index
    %c0_139 = arith.constant 0 : index
    %190 = vector.load %arg3[%c52, %c0_139] : memref<72x2xf32, #tpu.memory_space<vmem>>, vector<2x2xf32>
    %cst_140 = arith.constant dense<0.000000e+00> : vector<2x256xf32>
    %191 = tpu.matmul %190, %189, %cst_140 {dimension_numbers = #tpu.dot_dimension_numbers<[1], [0], [0], [1], [0, 0, 1, 1], [], []>} : vector<2x2xf32>, vector<2x256xf32>, vector<2x256xf32> -> vector<2x256xf32>
    %192 = arith.addf %185, %191 : vector<2x256xf32>
    %193 = vector.broadcast %138 : vector<2x1xf32> to vector<2x256xf32>
    %194 = arith.addf %192, %193 : vector<2x256xf32>
    %cst_141 = arith.constant 0.000000e+00 : f32
    %195 = vector.broadcast %cst_141 : f32 to vector<2x256xf32>
    %196 = arith.maximumf %194, %195 : vector<2x256xf32>
    %197 = arith.addf %14, %196 : vector<2x256xf32>
    %c6_142 = arith.constant 6 : index
    %c3_143 = arith.constant 3 : index
    %198 = vector.load %arg4[%c6_142, %c3_143] : memref<8x4xf32, #tpu.memory_space<vmem>>, vector<2x1xf32>
    %c0_144 = arith.constant 0 : index
    %c128_145 = arith.constant 128 : index
    %199 = vector.load %arg7[%c0_144, %c128_145] : memref<8x512xf32, #tpu.memory_space<vmem>>, vector<2x256xf32>
    tpu.vector_store %arg7[%c0_144, %c128_145], %197 {strides = array<i32>} : memref<8x512xf32, #tpu.memory_space<vmem>>, vector<2x256xf32>,
    %c0_146 = arith.constant 0 : index
    %c60 = arith.constant 60 : index
    %200 = vector.load %arg7[%c0_146, %c60] : memref<8x512xf32, #tpu.memory_space<vmem>>, vector<2x256xf32>
    %c6_147 = arith.constant 6 : index
    %c0_148 = arith.constant 0 : index
    %201 = vector.load %arg5[%c6_147, %c0_148] : memref<8x256xf32, #tpu.memory_space<vmem>>, vector<1x256xf32>
    %202 = vector.broadcast %201 : vector<1x256xf32> to vector<2x256xf32>
    %203 = arith.mulf %200, %202 : vector<2x256xf32>
    %c54 = arith.constant 54 : index
    %c0_149 = arith.constant 0 : index
    %204 = vector.load %arg3[%c54, %c0_149] : memref<72x2xf32, #tpu.memory_space<vmem>>, vector<2x2xf32>
    %cst_150 = arith.constant dense<0.000000e+00> : vector<2x256xf32>
    %205 = tpu.matmul %204, %203, %cst_150 {dimension_numbers = #tpu.dot_dimension_numbers<[1], [0], [0], [1], [0, 0, 1, 1], [], []>} : vector<2x2xf32>, vector<2x256xf32>, vector<2x256xf32> -> vector<2x256xf32>
    %c0_151 = arith.constant 0 : index
    %c64 = arith.constant 64 : index
    %206 = vector.load %arg7[%c0_151, %c64] : memref<8x512xf32, #tpu.memory_space<vmem>>, vector<2x256xf32>
    %c56 = arith.constant 56 : index
    %c0_152 = arith.constant 0 : index
    %207 = vector.load %arg3[%c56, %c0_152] : memref<72x2xf32, #tpu.memory_space<vmem>>, vector<2x2xf32>
    %cst_153 = arith.constant dense<0.000000e+00> : vector<2x256xf32>
    %208 = tpu.matmul %207, %206, %cst_153 {dimension_numbers = #tpu.dot_dimension_numbers<[1], [0], [0], [1], [0, 0, 1, 1], [], []>} : vector<2x2xf32>, vector<2x256xf32>, vector<2x256xf32> -> vector<2x256xf32>
    %209 = arith.addf %205, %208 : vector<2x256xf32>
    %c0_154 = arith.constant 0 : index
    %c68 = arith.constant 68 : index
    %210 = vector.load %arg7[%c0_154, %c68] : memref<8x512xf32, #tpu.memory_space<vmem>>, vector<2x256xf32>
    %c7 = arith.constant 7 : index
    %c0_155 = arith.constant 0 : index
    %211 = vector.load %arg5[%c7, %c0_155] : memref<8x256xf32, #tpu.memory_space<vmem>>, vector<1x256xf32>
    %212 = vector.broadcast %211 : vector<1x256xf32> to vector<2x256xf32>
    %213 = arith.mulf %210, %212 : vector<2x256xf32>
    %c58 = arith.constant 58 : index
    %c0_156 = arith.constant 0 : index
    %214 = vector.load %arg3[%c58, %c0_156] : memref<72x2xf32, #tpu.memory_space<vmem>>, vector<2x2xf32>
    %cst_157 = arith.constant dense<0.000000e+00> : vector<2x256xf32>
    %215 = tpu.matmul %214, %213, %cst_157 {dimension_numbers = #tpu.dot_dimension_numbers<[1], [0], [0], [1], [0, 0, 1, 1], [], []>} : vector<2x2xf32>, vector<2x256xf32>, vector<2x256xf32> -> vector<2x256xf32>
    %216 = arith.addf %209, %215 : vector<2x256xf32>
    %c0_158 = arith.constant 0 : index
    %c124 = arith.constant 124 : index
    %217 = vector.load %arg7[%c0_158, %c124] : memref<8x512xf32, #tpu.memory_space<vmem>>, vector<2x256xf32>
    %c6_159 = arith.constant 6 : index
    %c0_160 = arith.constant 0 : index
    %218 = vector.load %arg5[%c6_159, %c0_160] : memref<8x256xf32, #tpu.memory_space<vmem>>, vector<1x256xf32>
    %219 = vector.broadcast %218 : vector<1x256xf32> to vector<2x256xf32>
    %220 = arith.mulf %217, %219 : vector<2x256xf32>
    %c60_161 = arith.constant 60 : index
    %c0_162 = arith.constant 0 : index
    %221 = vector.load %arg3[%c60_161, %c0_162] : memref<72x2xf32, #tpu.memory_space<vmem>>, vector<2x2xf32>
    %cst_163 = arith.constant dense<0.000000e+00> : vector<2x256xf32>
    %222 = tpu.matmul %221, %220, %cst_163 {dimension_numbers = #tpu.dot_dimension_numbers<[1], [0], [0], [1], [0, 0, 1, 1], [], []>} : vector<2x2xf32>, vector<2x256xf32>, vector<2x256xf32> -> vector<2x256xf32>
    %223 = arith.addf %216, %222 : vector<2x256xf32>
    %c0_164 = arith.constant 0 : index
    %c128_165 = arith.constant 128 : index
    %224 = vector.load %arg7[%c0_164, %c128_165] : memref<8x512xf32, #tpu.memory_space<vmem>>, vector<2x256xf32>
    %c62 = arith.constant 62 : index
    %c0_166 = arith.constant 0 : index
    %225 = vector.load %arg3[%c62, %c0_166] : memref<72x2xf32, #tpu.memory_space<vmem>>, vector<2x2xf32>
    %cst_167 = arith.constant dense<0.000000e+00> : vector<2x256xf32>
    %226 = tpu.matmul %225, %224, %cst_167 {dimension_numbers = #tpu.dot_dimension_numbers<[1], [0], [0], [1], [0, 0, 1, 1], [], []>} : vector<2x2xf32>, vector<2x256xf32>, vector<2x256xf32> -> vector<2x256xf32>
    %227 = arith.addf %223, %226 : vector<2x256xf32>
    %c0_168 = arith.constant 0 : index
    %c132 = arith.constant 132 : index
    %228 = vector.load %arg7[%c0_168, %c132] : memref<8x512xf32, #tpu.memory_space<vmem>>, vector<2x256xf32>
    %c7_169 = arith.constant 7 : index
    %c0_170 = arith.constant 0 : index
    %229 = vector.load %arg5[%c7_169, %c0_170] : memref<8x256xf32, #tpu.memory_space<vmem>>, vector<1x256xf32>
    %230 = vector.broadcast %229 : vector<1x256xf32> to vector<2x256xf32>
    %231 = arith.mulf %228, %230 : vector<2x256xf32>
    %c64_171 = arith.constant 64 : index
    %c0_172 = arith.constant 0 : index
    %232 = vector.load %arg3[%c64_171, %c0_172] : memref<72x2xf32, #tpu.memory_space<vmem>>, vector<2x2xf32>
    %cst_173 = arith.constant dense<0.000000e+00> : vector<2x256xf32>
    %233 = tpu.matmul %232, %231, %cst_173 {dimension_numbers = #tpu.dot_dimension_numbers<[1], [0], [0], [1], [0, 0, 1, 1], [], []>} : vector<2x2xf32>, vector<2x256xf32>, vector<2x256xf32> -> vector<2x256xf32>
    %234 = arith.addf %227, %233 : vector<2x256xf32>
    %c0_174 = arith.constant 0 : index
    %c188 = arith.constant 188 : index
    %235 = vector.load %arg7[%c0_174, %c188] : memref<8x512xf32, #tpu.memory_space<vmem>>, vector<2x256xf32>
    %c6_175 = arith.constant 6 : index
    %c0_176 = arith.constant 0 : index
    %236 = vector.load %arg5[%c6_175, %c0_176] : memref<8x256xf32, #tpu.memory_space<vmem>>, vector<1x256xf32>
    %237 = vector.broadcast %236 : vector<1x256xf32> to vector<2x256xf32>
    %238 = arith.mulf %235, %237 : vector<2x256xf32>
    %c66 = arith.constant 66 : index
    %c0_177 = arith.constant 0 : index
    %239 = vector.load %arg3[%c66, %c0_177] : memref<72x2xf32, #tpu.memory_space<vmem>>, vector<2x2xf32>
    %cst_178 = arith.constant dense<0.000000e+00> : vector<2x256xf32>
    %240 = tpu.matmul %239, %238, %cst_178 {dimension_numbers = #tpu.dot_dimension_numbers<[1], [0], [0], [1], [0, 0, 1, 1], [], []>} : vector<2x2xf32>, vector<2x256xf32>, vector<2x256xf32> -> vector<2x256xf32>
    %241 = arith.addf %234, %240 : vector<2x256xf32>
    %c0_179 = arith.constant 0 : index
    %c192 = arith.constant 192 : index
    %242 = vector.load %arg7[%c0_179, %c192] : memref<8x512xf32, #tpu.memory_space<vmem>>, vector<2x256xf32>
    %c68_180 = arith.constant 68 : index
    %c0_181 = arith.constant 0 : index
    %243 = vector.load %arg3[%c68_180, %c0_181] : memref<72x2xf32, #tpu.memory_space<vmem>>, vector<2x2xf32>
    %cst_182 = arith.constant dense<0.000000e+00> : vector<2x256xf32>
    %244 = tpu.matmul %243, %242, %cst_182 {dimension_numbers = #tpu.dot_dimension_numbers<[1], [0], [0], [1], [0, 0, 1, 1], [], []>} : vector<2x2xf32>, vector<2x256xf32>, vector<2x256xf32> -> vector<2x256xf32>
    %245 = arith.addf %241, %244 : vector<2x256xf32>
    %c0_183 = arith.constant 0 : index
    %c196 = arith.constant 196 : index
    %246 = vector.load %arg7[%c0_183, %c196] : memref<8x512xf32, #tpu.memory_space<vmem>>, vector<2x256xf32>
    %c7_184 = arith.constant 7 : index
    %c0_185 = arith.constant 0 : index
    %247 = vector.load %arg5[%c7_184, %c0_185] : memref<8x256xf32, #tpu.memory_space<vmem>>, vector<1x256xf32>
    %248 = vector.broadcast %247 : vector<1x256xf32> to vector<2x256xf32>
    %249 = arith.mulf %246, %248 : vector<2x256xf32>
    %c70 = arith.constant 70 : index
    %c0_186 = arith.constant 0 : index
    %250 = vector.load %arg3[%c70, %c0_186] : memref<72x2xf32, #tpu.memory_space<vmem>>, vector<2x2xf32>
    %cst_187 = arith.constant dense<0.000000e+00> : vector<2x256xf32>
    %251 = tpu.matmul %250, %249, %cst_187 {dimension_numbers = #tpu.dot_dimension_numbers<[1], [0], [0], [1], [0, 0, 1, 1], [], []>} : vector<2x2xf32>, vector<2x256xf32>, vector<2x256xf32> -> vector<2x256xf32>
    %252 = arith.addf %245, %251 : vector<2x256xf32>
    %253 = vector.broadcast %198 : vector<2x1xf32> to vector<2x256xf32>
    %254 = arith.addf %252, %253 : vector<2x256xf32>
    %cst_188 = arith.constant 0.000000e+00 : f32
    %255 = vector.broadcast %cst_188 : f32 to vector<2x256xf32>
    %256 = arith.maximumf %254, %255 : vector<2x256xf32>
    %c8_189 = arith.constant 8 : index
    %c0_190 = arith.constant 0 : index
    %257 = vector.load %arg2[%c8_189, %c0_190] : memref<88x8xf32, #tpu.memory_space<vmem>>, vector<8x8xf32>
    %258 = vector.extract_strided_slice %257 {offsets = [0, 0], sizes = [8, 2], strides = [1, 1]} : vector<8x8xf32> to vector<8x2xf32>
    %cst_191 = arith.constant dense<0.000000e+00> : vector<8x256xf32>
    %259 = tpu.matmul %258, %74, %cst_191 {dimension_numbers = #tpu.dot_dimension_numbers<[1], [0], [0], [1], [0, 0, 1, 1], [], []>} : vector<8x2xf32>, vector<2x256xf32>, vector<8x256xf32> -> vector<8x256xf32>
    %260 = vector.extract_strided_slice %257 {offsets = [0, 2], sizes = [8, 2], strides = [1, 1]} : vector<8x8xf32> to vector<8x2xf32>
    %cst_192 = arith.constant dense<0.000000e+00> : vector<8x256xf32>
    %261 = tpu.matmul %260, %135, %cst_192 {dimension_numbers = #tpu.dot_dimension_numbers<[1], [0], [0], [1], [0, 0, 1, 1], [], []>} : vector<8x2xf32>, vector<2x256xf32>, vector<8x256xf32> -> vector<8x256xf32>
    %262 = arith.addf %259, %261 : vector<8x256xf32>
    %263 = vector.extract_strided_slice %257 {offsets = [0, 4], sizes = [8, 2], strides = [1, 1]} : vector<8x8xf32> to vector<8x2xf32>
    %cst_193 = arith.constant dense<0.000000e+00> : vector<8x256xf32>
    %264 = tpu.matmul %263, %196, %cst_193 {dimension_numbers = #tpu.dot_dimension_numbers<[1], [0], [0], [1], [0, 0, 1, 1], [], []>} : vector<8x2xf32>, vector<2x256xf32>, vector<8x256xf32> -> vector<8x256xf32>
    %265 = arith.addf %262, %264 : vector<8x256xf32>
    %266 = vector.extract_strided_slice %257 {offsets = [0, 6], sizes = [8, 2], strides = [1, 1]} : vector<8x8xf32> to vector<8x2xf32>
    %cst_194 = arith.constant dense<0.000000e+00> : vector<8x256xf32>
    %267 = tpu.matmul %266, %256, %cst_194 {dimension_numbers = #tpu.dot_dimension_numbers<[1], [0], [0], [1], [0, 0, 1, 1], [], []>} : vector<8x2xf32>, vector<2x256xf32>, vector<8x256xf32> -> vector<8x256xf32>
    %268 = arith.addf %265, %267 : vector<8x256xf32>
    %c0_195 = arith.constant 0 : index
    %c1_196 = arith.constant 1 : index
    %269 = vector.load %arg4[%c0_195, %c1_196] : memref<8x4xf32, #tpu.memory_space<vmem>>, vector<8x1xf32>
    %270 = vector.broadcast %269 : vector<8x1xf32> to vector<8x256xf32>
    %271 = arith.addf %268, %270 : vector<8x256xf32>
    %cst_197 = arith.constant 0.000000e+00 : f32
    %272 = vector.broadcast %cst_197 : f32 to vector<8x256xf32>
    %273 = arith.maximumf %271, %272 : vector<8x256xf32>
    %274 = arith.addf %10, %273 : vector<8x256xf32>
    %c0_198 = arith.constant 0 : index
    %c2_199 = arith.constant 2 : index
    %275 = vector.load %arg4[%c0_198, %c2_199] : memref<8x4xf32, #tpu.memory_space<vmem>>, vector<8x1xf32>
    %c0_200 = arith.constant 0 : index
    %c128_201 = arith.constant 128 : index
    %276 = vector.load %arg7[%c0_200, %c128_201] : memref<8x512xf32, #tpu.memory_space<vmem>>, vector<8x256xf32>
    tpu.vector_store %arg7[%c0_200, %c128_201], %274 {strides = array<i32>} : memref<8x512xf32, #tpu.memory_space<vmem>>, vector<8x256xf32>,
    %c0_202 = arith.constant 0 : index
    %c111_203 = arith.constant 111 : index
    %277 = vector.load %arg7[%c0_202, %c111_203] : memref<8x512xf32, #tpu.memory_space<vmem>>, vector<8x256xf32>
    %c0_204 = arith.constant 0 : index
    %c0_205 = arith.constant 0 : index
    %278 = vector.load %arg5[%c0_204, %c0_205] : memref<8x256xf32, #tpu.memory_space<vmem>>, vector<1x256xf32>
    %279 = vector.broadcast %278 : vector<1x256xf32> to vector<8x256xf32>
    %280 = arith.mulf %277, %279 : vector<8x256xf32>
    %c16_206 = arith.constant 16 : index
    %c0_207 = arith.constant 0 : index
    %281 = vector.load %arg2[%c16_206, %c0_207] : memref<88x8xf32, #tpu.memory_space<vmem>>, vector<8x8xf32>
    %cst_208 = arith.constant dense<0.000000e+00> : vector<8x256xf32>
    %282 = tpu.matmul %281, %280, %cst_208 {dimension_numbers = #tpu.dot_dimension_numbers<[1], [0], [0], [1], [0, 0, 1, 1], [], []>} : vector<8x8xf32>, vector<8x256xf32>, vector<8x256xf32> -> vector<8x256xf32>
    %c0_209 = arith.constant 0 : index
    %c112_210 = arith.constant 112 : index
    %283 = vector.load %arg7[%c0_209, %c112_210] : memref<8x512xf32, #tpu.memory_space<vmem>>, vector<8x256xf32>
    %c24_211 = arith.constant 24 : index
    %c0_212 = arith.constant 0 : index
    %284 = vector.load %arg2[%c24_211, %c0_212] : memref<88x8xf32, #tpu.memory_space<vmem>>, vector<8x8xf32>
    %cst_213 = arith.constant dense<0.000000e+00> : vector<8x256xf32>
    %285 = tpu.matmul %284, %283, %cst_213 {dimension_numbers = #tpu.dot_dimension_numbers<[1], [0], [0], [1], [0, 0, 1, 1], [], []>} : vector<8x8xf32>, vector<8x256xf32>, vector<8x256xf32> -> vector<8x256xf32>
    %286 = arith.addf %282, %285 : vector<8x256xf32>
    %c0_214 = arith.constant 0 : index
    %c113_215 = arith.constant 113 : index
    %287 = vector.load %arg7[%c0_214, %c113_215] : memref<8x512xf32, #tpu.memory_space<vmem>>, vector<8x256xf32>
    %c1_216 = arith.constant 1 : index
    %c0_217 = arith.constant 0 : index
    %288 = vector.load %arg5[%c1_216, %c0_217] : memref<8x256xf32, #tpu.memory_space<vmem>>, vector<1x256xf32>
    %289 = vector.broadcast %288 : vector<1x256xf32> to vector<8x256xf32>
    %290 = arith.mulf %287, %289 : vector<8x256xf32>
    %c32_218 = arith.constant 32 : index
    %c0_219 = arith.constant 0 : index
    %291 = vector.load %arg2[%c32_218, %c0_219] : memref<88x8xf32, #tpu.memory_space<vmem>>, vector<8x8xf32>
    %cst_220 = arith.constant dense<0.000000e+00> : vector<8x256xf32>
    %292 = tpu.matmul %291, %290, %cst_220 {dimension_numbers = #tpu.dot_dimension_numbers<[1], [0], [0], [1], [0, 0, 1, 1], [], []>} : vector<8x8xf32>, vector<8x256xf32>, vector<8x256xf32> -> vector<8x256xf32>
    %293 = arith.addf %286, %292 : vector<8x256xf32>
    %c0_221 = arith.constant 0 : index
    %c127_222 = arith.constant 127 : index
    %294 = vector.load %arg7[%c0_221, %c127_222] : memref<8x512xf32, #tpu.memory_space<vmem>>, vector<8x256xf32>
    %c0_223 = arith.constant 0 : index
    %c0_224 = arith.constant 0 : index
    %295 = vector.load %arg5[%c0_223, %c0_224] : memref<8x256xf32, #tpu.memory_space<vmem>>, vector<1x256xf32>
    %296 = vector.broadcast %295 : vector<1x256xf32> to vector<8x256xf32>
    %297 = arith.mulf %294, %296 : vector<8x256xf32>
    %c40_225 = arith.constant 40 : index
    %c0_226 = arith.constant 0 : index
    %298 = vector.load %arg2[%c40_225, %c0_226] : memref<88x8xf32, #tpu.memory_space<vmem>>, vector<8x8xf32>
    %cst_227 = arith.constant dense<0.000000e+00> : vector<8x256xf32>
    %299 = tpu.matmul %298, %297, %cst_227 {dimension_numbers = #tpu.dot_dimension_numbers<[1], [0], [0], [1], [0, 0, 1, 1], [], []>} : vector<8x8xf32>, vector<8x256xf32>, vector<8x256xf32> -> vector<8x256xf32>
    %300 = arith.addf %293, %299 : vector<8x256xf32>
    %c0_228 = arith.constant 0 : index
    %c128_229 = arith.constant 128 : index
    %301 = vector.load %arg7[%c0_228, %c128_229] : memref<8x512xf32, #tpu.memory_space<vmem>>, vector<8x256xf32>
    %c48_230 = arith.constant 48 : index
    %c0_231 = arith.constant 0 : index
    %302 = vector.load %arg2[%c48_230, %c0_231] : memref<88x8xf32, #tpu.memory_space<vmem>>, vector<8x8xf32>
    %cst_232 = arith.constant dense<0.000000e+00> : vector<8x256xf32>
    %303 = tpu.matmul %302, %301, %cst_232 {dimension_numbers = #tpu.dot_dimension_numbers<[1], [0], [0], [1], [0, 0, 1, 1], [], []>} : vector<8x8xf32>, vector<8x256xf32>, vector<8x256xf32> -> vector<8x256xf32>
    %304 = arith.addf %300, %303 : vector<8x256xf32>
    %c0_233 = arith.constant 0 : index
    %c129_234 = arith.constant 129 : index
    %305 = vector.load %arg7[%c0_233, %c129_234] : memref<8x512xf32, #tpu.memory_space<vmem>>, vector<8x256xf32>
    %c1_235 = arith.constant 1 : index
    %c0_236 = arith.constant 0 : index
    %306 = vector.load %arg5[%c1_235, %c0_236] : memref<8x256xf32, #tpu.memory_space<vmem>>, vector<1x256xf32>
    %307 = vector.broadcast %306 : vector<1x256xf32> to vector<8x256xf32>
    %308 = arith.mulf %305, %307 : vector<8x256xf32>
    %c56_237 = arith.constant 56 : index
    %c0_238 = arith.constant 0 : index
    %309 = vector.load %arg2[%c56_237, %c0_238] : memref<88x8xf32, #tpu.memory_space<vmem>>, vector<8x8xf32>
    %cst_239 = arith.constant dense<0.000000e+00> : vector<8x256xf32>
    %310 = tpu.matmul %309, %308, %cst_239 {dimension_numbers = #tpu.dot_dimension_numbers<[1], [0], [0], [1], [0, 0, 1, 1], [], []>} : vector<8x8xf32>, vector<8x256xf32>, vector<8x256xf32> -> vector<8x256xf32>
    %311 = arith.addf %304, %310 : vector<8x256xf32>
    %c0_240 = arith.constant 0 : index
    %c143_241 = arith.constant 143 : index
    %312 = vector.load %arg7[%c0_240, %c143_241] : memref<8x512xf32, #tpu.memory_space<vmem>>, vector<8x256xf32>
    %c0_242 = arith.constant 0 : index
    %c0_243 = arith.constant 0 : index
    %313 = vector.load %arg5[%c0_242, %c0_243] : memref<8x256xf32, #tpu.memory_space<vmem>>, vector<1x256xf32>
    %314 = vector.broadcast %313 : vector<1x256xf32> to vector<8x256xf32>
    %315 = arith.mulf %312, %314 : vector<8x256xf32>
    %c64_244 = arith.constant 64 : index
    %c0_245 = arith.constant 0 : index
    %316 = vector.load %arg2[%c64_244, %c0_245] : memref<88x8xf32, #tpu.memory_space<vmem>>, vector<8x8xf32>
    %cst_246 = arith.constant dense<0.000000e+00> : vector<8x256xf32>
    %317 = tpu.matmul %316, %315, %cst_246 {dimension_numbers = #tpu.dot_dimension_numbers<[1], [0], [0], [1], [0, 0, 1, 1], [], []>} : vector<8x8xf32>, vector<8x256xf32>, vector<8x256xf32> -> vector<8x256xf32>
    %318 = arith.addf %311, %317 : vector<8x256xf32>
    %c0_247 = arith.constant 0 : index
    %c144_248 = arith.constant 144 : index
    %319 = vector.load %arg7[%c0_247, %c144_248] : memref<8x512xf32, #tpu.memory_space<vmem>>, vector<8x256xf32>
    %c72 = arith.constant 72 : index
    %c0_249 = arith.constant 0 : index
    %320 = vector.load %arg2[%c72, %c0_249] : memref<88x8xf32, #tpu.memory_space<vmem>>, vector<8x8xf32>
    %cst_250 = arith.constant dense<0.000000e+00> : vector<8x256xf32>
    %321 = tpu.matmul %320, %319, %cst_250 {dimension_numbers = #tpu.dot_dimension_numbers<[1], [0], [0], [1], [0, 0, 1, 1], [], []>} : vector<8x8xf32>, vector<8x256xf32>, vector<8x256xf32> -> vector<8x256xf32>
    %322 = arith.addf %318, %321 : vector<8x256xf32>
    %c0_251 = arith.constant 0 : index
    %c145_252 = arith.constant 145 : index
    %323 = vector.load %arg7[%c0_251, %c145_252] : memref<8x512xf32, #tpu.memory_space<vmem>>, vector<8x256xf32>
    %c1_253 = arith.constant 1 : index
    %c0_254 = arith.constant 0 : index
    %324 = vector.load %arg5[%c1_253, %c0_254] : memref<8x256xf32, #tpu.memory_space<vmem>>, vector<1x256xf32>
    %325 = vector.broadcast %324 : vector<1x256xf32> to vector<8x256xf32>
    %326 = arith.mulf %323, %325 : vector<8x256xf32>
    %c80_255 = arith.constant 80 : index
    %c0_256 = arith.constant 0 : index
    %327 = vector.load %arg2[%c80_255, %c0_256] : memref<88x8xf32, #tpu.memory_space<vmem>>, vector<8x8xf32>
    %cst_257 = arith.constant dense<0.000000e+00> : vector<8x256xf32>
    %328 = tpu.matmul %327, %326, %cst_257 {dimension_numbers = #tpu.dot_dimension_numbers<[1], [0], [0], [1], [0, 0, 1, 1], [], []>} : vector<8x8xf32>, vector<8x256xf32>, vector<8x256xf32> -> vector<8x256xf32>
    %329 = arith.addf %322, %328 : vector<8x256xf32>
    %330 = vector.broadcast %275 : vector<8x1xf32> to vector<8x256xf32>
    %331 = arith.addf %329, %330 : vector<8x256xf32>
    %cst_258 = arith.constant 0.000000e+00 : f32
    %332 = vector.broadcast %cst_258 : f32 to vector<8x256xf32>
    %333 = arith.maximumf %331, %332 : vector<8x256xf32>
    %c0_259 = arith.constant 0 : index
    %c0_260 = arith.constant 0 : index
    %c0_261 = arith.constant 0 : index
    %334 = vector.load %arg6[%c0_259, %c0_260, %c0_261] : memref<1x8x256xf32, #tpu.memory_space<vmem>>, vector<1x8x256xf32>
    %335 = vector.shape_cast %334 : vector<1x8x256xf32> to vector<8x256xf32>
    %336 = vector.shape_cast %333 : vector<8x256xf32> to vector<1x8x256xf32>
    tpu.vector_store %arg6[%c0_259, %c0_260, %c0_261], %336 {strides = array<i32>} : memref<1x8x256xf32, #tpu.memory_space<vmem>>, vector<1x8x256xf32>,
    return
  }
  func.func @transform_0(%arg0: i32) -> (i32, i32, i32) {
    %c0_i32 = arith.constant 0 : i32
    %c0_i32_0 = arith.constant 0 : i32
    %c0_i32_1 = arith.constant 0 : i32
    return %arg0, %c0_i32, %c0_i32_0 : i32, i32, i32
  }
  func.func @transform_1(%arg0: i32) -> (i32, i32) {
    %c0_i32 = arith.constant 0 : i32
    %c0_i32_0 = arith.constant 0 : i32
    %c0_i32_1 = arith.constant 0 : i32
    return %c0_i32, %c0_i32_0 : i32, i32
  }
  func.func @transform_2(%arg0: i32) -> (i32, i32) {
    %c0_i32 = arith.constant 0 : i32
    %c0_i32_0 = arith.constant 0 : i32
    %c0_i32_1 = arith.constant 0 : i32
    return %c0_i32, %c0_i32_0 : i32, i32
  }
  func.func @transform_3(%arg0: i32) -> (i32, i32) {
    %c0_i32 = arith.constant 0 : i32
    %c0_i32_0 = arith.constant 0 : i32
    %c0_i32_1 = arith.constant 0 : i32
    return %c0_i32, %c0_i32_0 : i32, i32
  }
  func.func @transform_4(%arg0: i32) -> (i32, i32) {
    %c0_i32 = arith.constant 0 : i32
    %c0_i32_0 = arith.constant 0 : i32
    %c0_i32_1 = arith.constant 0 : i32
    return %c0_i32, %c0_i32_0 : i32, i32
  }
  func.func @transform_5(%arg0: i32) -> (i32, i32, i32) {
    %c0_i32 = arith.constant 0 : i32
    %c0_i32_0 = arith.constant 0 : i32
    %c0_i32_1 = arith.constant 0 : i32
    return %arg0, %c0_i32, %c0_i32_0 : i32, i32, i32
  }
}

</mosaic_0001>

<bundles_post_ra>
// kernel: tpu_custom_call.1
= control target key start
LH: loop header
LB: loop body
LE: loop exit
PB: predicated region body
PF: predicated region fallthrough
CT: control target
= control target key end

     0   :  { %10 = vsyncpa [#allocation4], 0  ;;  %s6772_s0 = inlined_call_operand.vmem [shape: f32[2,8,256], index: 0, kind: input, shape index: {}]   ;;  %s6773_s1 = inlined_call_operand.vmem [shape: f32[88,8], index: 1, kind: input, shape index: {}]   ;;  %s6774_s2 = inlined_call_operand.vmem [shape: f32[72,2], index: 2, kind: input, shape index: {}]   ;;  %s6775_s3 = inlined_call_operand.vmem [shape: f32[8,4], index: 3, kind: input, shape index: {}]   ;;  %s6776_s4 = inlined_call_operand.vmem [shape: f32[8,256], index: 4, kind: input, shape index: {}]   ;;  %s6777_s5 = inlined_call_operand.hbm [shape: f32[2,8,256], index: 5, kind: output, shape index: {}]  }
   0x1   :  { %12 = vsyncpa [#allocation4 + $0x1], 0  ;;  %s5722_s18 = smov 0   ;;  %s5724_s19 = smov 0  }
   0x2   :  { %s5726_s20 = smov 0   ;;  %s5728_s21 = smov 0  }
   0x3 LB: > { %s5743_s22 = sadd.s32 4294967295, %s5654_s21   ;;  %s5361_s23 = sadd.s32 4294967294, %s5654_s21   ;;  %s5654_s21 = sphi %s5728_s21, %s6805_s21   ;;  %s5650_s20 = sphi %s5726_s20, %s6804_s20   ;;  %s5646_s19 = sphi %s5724_s19, %s6803_s19   ;;  %s5642_s18 = sphi %s5722_s18, %s6802_s18  }
   0x4   : > { %s5747_s24 = sadd.s32 1, %s5654_s21   ;;  %s135_s25 = sadd.s32 1, %s5650_s20 }
   0x5   : > { %s132_s26 = ssub.s32 %s5654_s21, %s5747_s24  ;;  %p145_p0 = scmp.ne.s32.totalorder %s5650_s20, %s5646_s19 }
   0x6   : > { %p133_p1 = scmp.eq.s32.totalorder %s132_s26, 0  ;;  %p146_p2 = scmp.eq.s32.totalorder %s5743_s22, 1 }
   0x7   : > { %p151_p3 = scmp.ne.s32.totalorder %s5646_s19, %s5642_s18  ;;  %p152_p4 = scmp.eq.s32.totalorder %s5361_s23, 1 }
   0x8   : > { %s5758_s27 = scalar_select %p133_p1, %s5650_s20, %s135_s25  }
   0x9   : > { %p5760_p5 = por %p146_p2, %p145_p0  ;;  %p5764_p6 = por %p152_p4, %p151_p3 }
   0xa   : > { %p5364_p7 = scmp.ge.s32.totalorder %s5654_s21, 1  ;;  %p190_p8 = scmp.lt.s32.totalorder %s5654_s21, 3 }
   0xc   : > { %p191_p9 = pnand %p5364_p7, %p190_p8 }
   0xd   : > { %p218_p10 = scmp.lt.s32.totalorder (!%p191_p9), %s5743_s22, 1  ;;  %s5658_s23 = smov (!%p191_p9), 111  }
   0xe   : > { %194 = sbr.rel (%p191_p9) target bundleno = 2251 (0x8cb), region = 40  ;;  %s5659_s25 = smov (!%p191_p9), 113  }
   0xf   : > { %s5660_s26 = smov (!%p191_p9), 127   ;;  %s5661_s30 = smov (!%p191_p9), 1  }
  0x10   : > { %s5662_s6 = smov (!%p191_p9), 15   ;;  %s6780_s8 = smov (!%p191_p9), 16  }
  0x11   : > { %s6778_s9 = smov (!%p191_p9), 112   ;;  %s5667_s16 = smov (!%p191_p9), 94  }
  0x12   : > { %s5668_s17 = smov (!%p191_p9), 98   ;;  %s5670_s11 = smov (!%p191_p9), 2  }
  0x13   : > { %v230_v0 = vld [vmem:[%s6775_s3] sm:$0xff]  ;;  %v329_v1 = vlaneseq  ;;  %v5656_v2 = vmov 0.0   ;;  %v5657_v3 = vmov 0   ;;  %s219_s7 = scalar_select %p218_p10, %s5743_s22, 1  ;;  %vm6785_vm0 = vcmask 64512  }
  0x14   : > { %304 = vmatprep.mubr.f32.mxu0 %v5656_v2  ;;  %223 = vst [vmem:[#allocation2 + $0x10] sm:$0xff] %v5656_v2  ;;  %224 = vst [vmem:[#allocation2] sm:$0xff] %v5656_v2  ;;  %5587 = vset.pattern.permute.xlu0 %v5657_v3  ;;  %v327_v5 = vld [vmem:[%s6776_s4] ss:$8 sm:$0x3]  ;;  %vm548_vm1 = vcmask 924672  }
  0x15   : > { %225 = vst [vmem:[#allocation2 + $0x18] sm:$0xff] %v5656_v2  ;;  %226 = vst [vmem:[#allocation2 + $0x8] sm:$0xff] %v5656_v2  ;;  %233 = vperm.xlu0 %5587, %v230_v0   ;;  %v330_v4 = vshrl.u32 %v329_v1, 7  ;;  %436 = vmatprep.mubr.f32.mxu1 %v5656_v2  ;;  %s5511_s10 = sshll.u32 %s219_s7, 4  ;;  %v229_v11 = vld [vmem:[%s6773_s1] sm:$0xff]  ;;  %s6783_s7 = smov 17  }
  0x16   : > { %s222_s13 = scalar_lea.vmem %s6772_s0, %s5511_s10  ;;  %v5375_v8 = vld [vmem:[%s6776_s4 + $0x1] ss:$8 sm:$0x3]  ;;  %vm341_vm2 = vcmask 908288   ;;  %vm653_vm3 = vcmask 1039360   ;;  %vm671_vm4 = vcmask 7168  }
  0x17   : > { %v5784_v6 = vsub.s32 0, %v330_v4  ;;  %v5786_v7 = vsub.s32 1, %v330_v4  ;;  %v228_v9 = vld [vmem:[%s222_s13 + $0x8] sm:$0xff]  ;;  %v227_v10 = vld [vmem:[%s222_s13] sm:$0xff]  ;;  %vm566_vm5 = vcmask 121856   ;;  %vm452_vm6 = vcmask 138240  }
  0x18   : > { %270 = vmatprep.subr.mxu0 %v228_v9  ;;  %v5666_v1 = vmov 3   ;;  %s5669_s10 = smov 126   ;;  %s5671_s12 = smov 30   ;;  %vm360_vm7 = vcmask 130048   ;;  %vm367_vm8 = vcmask 1041408   ;;  %vm363_vm9 = vcmask 15360  }
  0x19   : > { %v332_v12 = vrot.slane %v327_v5, %v5784_v6  ;;  %v336_v13 = vrot.slane %v327_v5, %v5786_v7  ;;  %271 = vmatpush1.msra.mxu0 %v227_v10  ;;  %v543_v14 = vrot.slane %v5375_v8, %v5786_v7  ;;  %v539_v15 = vrot.slane %v5375_v8, %v5784_v6  ;;  %v5397_v8 = vld [vmem:[%s6776_s4 + $0x2] ss:$8 sm:$0x3]  ;;  %v321_v10 = vld [vmem:[%s6775_s3] sm:$0x3]  ;;  %s5672_s13 = smov 34  }
  0x1a   : > { %5368 = vmatmul.mubr.msk.f32.vlgmr.msra.gmra.mxu0 %vm6785_vm0, %v229_v11  ;;  %5589 = vset.pattern.permute.xlu0 %v5666_v1  ;;  %v1277_v11 = vrot.slane %v5397_v8, %v5784_v6  ;;  %vm6782_vm10 = vcmask 916480   ;;  %s5673_s14 = smov 32   ;;  %vm1491_vm11 = vcmask 801792   ;;  %vm1286_vm12 = vcmask 769024   ;;  %s5674_s15 = smov 96  }
  0x1b   : > { %337 = vrot.lane.b32.xlu0 %v332_v12, %s5658_s23  ;;  %339 = vrot.lane.b32.xlu1 %v336_v13, %s5658_s23  ;;  %v324_v16 = vld [vmem:[#allocation2 + $0x10] sm:$0x3]  ;;  %vm1596_vm13 = vcmask 1031168   ;;  %vm1509_vm14 = vcmask 244736   ;;  %vm1395_vm15 = vcmask 277504   ;;  %vm2247_vm0 = vcmask 392192  }
  0x1c   : > { %526 = vmatprep.mubr.f32.mxu0 %v5656_v2  ;;  %v5819_v27 = vld [vmem:[#allocation2 + $0x8] sm:$0x3]  ;;  %5588 = vset.pattern.permute.xlu1 %v5666_v1 }
  0x1f   : > { %546 = vrot.lane.b32.xlu0 %v543_v14, %s5659_s25  ;;  %544 = vrot.lane.b32.xlu1 %v539_v15, %s5659_s25 }
  0x23   : > { %651 = vrot.lane.b32.xlu0 %v336_v13, %s5660_s26  ;;  %649 = vrot.lane.b32.xlu1 %v332_v12, %s5660_s26 }
  0x27   : > { %840 = vrot.lane.b32.xlu0 %v543_v14, %s5661_s30  ;;  %838 = vrot.lane.b32.xlu1 %v539_v15, %s5661_s30 }
  0x2b   : > { %943 = vrot.lane.b32.xlu0 %v336_v13, %s5662_s6  ;;  %941 = vrot.lane.b32.xlu1 %v332_v12, %s5662_s6  ;;  %v5404_v12 = vld [vmem:[%s6776_s4 + $0x3] ss:$8 sm:$0x3]  ;;  %v1281_v13 = vrot.slane %v5397_v8, %v5786_v7 }
  0x2f   : > { %1139 = vrot.lane.b32.xlu0 %v543_v14, %s6783_s7  ;;  %1137 = vrot.lane.b32.xlu1 %v539_v15, %s6783_s7  ;;  %v1482_v14 = vrot.slane %v5404_v12, %v5784_v6  ;;  %v1486_v15 = vrot.slane %v5404_v12, %v5786_v7  ;;  %v1268_v12 = vld [vmem:[#allocation2 + $0x10] sm:$0x3] }
  0x33   : > { %354 = vrot.lane.b32.xlu1 %v324_v16, %s6780_s8 }
  0x8d   : > { %v340_v17 = vpop.permute.xlu1 %339 }
  0x90   : > { %v234_v18 = vpop.permute.xlu0 %233 }
  0x91   : > { %v545_v19 = vpop.permute.xlu1 %544 }
  0x92   : > { %v553_v20 = vmul.f32 %v545_v19, %v324_v16 }
  0x94   : > { %v338_v21 = vpop.permute.xlu0 %337  ;;  %560 = vrot.lane.b32.xlu1 %v553_v20, %s5662_s6 }
  0x95   : > { %v346_v22 = vmul.f32 %v338_v21, %v324_v16  ;;  %v650_v23 = vpop.permute.xlu1 %649  ;;  %v342_v46 = vsel %vm341_vm2, %v338_v21, %v340_v17 }
  0x96   : > { %v658_v24 = vmul.f32 %v650_v23, %v324_v16 }
  0x97   : > { %446 = vrot.lane.b32.xlu0 %v346_v22, %s6783_s7 }
  0x98   : > { %v547_v25 = vpop.permute.xlu0 %546 }
  0x99   : > { %v549_v43 = vsel %vm548_vm1, %v545_v19, %v547_v25  ;;  %v839_v49 = vpop.permute.xlu1 %838 }
  0x9b   : > { %665 = vrot.lane.b32.xlu0 %v658_v24, %s5661_s30 }
  0x9c   : > { %v652_v26 = vpop.permute.xlu0 %651 }
  0x9d   : > { %v654_v51 = vsel %vm653_vm3, %v650_v23, %v652_v26  ;;  %v942_v53 = vpop.permute.xlu1 %941 }
  0xa0   : > { %v841_v28 = vpop.permute.xlu0 %840 }
  0xa1   : > { %v848_v29 = vmul.f32 %v841_v28, %v5819_v27  ;;  %v842_v59 = vsel %vm671_vm4, %v839_v49, %v841_v28  ;;  %v1138_v60 = vpop.permute.xlu1 %1137 }
  0xa3   : > { %857 = vrot.lane.b32.xlu0 %v848_v29, %s5660_s26 }
  0xa4   : > { %v944_v30 = vpop.permute.xlu0 %943 }
  0xa5   : > { %v951_v31 = vmul.f32 %v944_v30, %v5819_v27  ;;  %v945_v63 = vsel %vm566_vm5, %v942_v53, %v944_v30  ;;  %v355_v16 = vpop.permute.xlu1 %354 }
  0xa7   : > { %960 = vrot.lane.b32.xlu1 %v951_v31, %s5659_s25 }
  0xa8   : > { %v1140_v61 = vpop.permute.xlu0 %1139 }
  0xa9   : > { %v1141_v3 = vsel %vm452_vm6, %v1138_v60, %v1140_v61  ;;  %v1147_v5 = vmul.f32 %v1140_v61, %v5819_v27 }
  0xda   : > { %v306_v32 = vpop.f32.mrf.mxu0 }
  0xdb   : > { %v307_v33 = vadd.f32 %v306_v32, %v234_v18 }
  0xdc   : > { %v308_v34 = vpop.f32.mrf.mxu0 }
  0xdd   : > { %v5825_v35 = vmax.f32 %v307_v33, 0.0  ;;  %v309_v36 = vadd.f32 %v308_v34, %v234_v18 }
  0xdf   : > { %v5828_v37 = vrot.slane %v5825_v35, 2  ;;  %v5830_v38 = vmax.f32 %v309_v36, 0.0  ;;  %v349_v36 = vld [vmem:[%s6774_s2] sm:$0x3] }
  0xe1   : > { %v319_v39 = vadd.f32 %v5828_v37, %v5825_v35  ;;  %v5835_v40 = vrot.slane %v5830_v38, 2 }
  0xe3   : > { %322 = vst [vmem:[#allocation2] sm:$0x3] %v319_v39  ;;  %v320_v41 = vadd.f32 %v5835_v40, %v5830_v38 }
  0xe5   : > { %323 = vst [vmem:[#allocation2 + $0x18] sm:$0x3] %v320_v41 }
  0xea   : > { %v5839_v42 = vld [vmem:[#allocation2] sm:$0x3] }
  0xeb   : > { %356 = vrot.lane.b32.xlu1 %v5839_v42, %s6780_s8  ;;  %v554_v45 = vmul.f32 %v549_v43, %v5839_v42  ;;  %v835_v47 = vld [vmem:[#allocation2] sm:$0x3]  ;;  %v347_v48 = vmul.f32 %v342_v46, %v5839_v42  ;;  %v659_v52 = vmul.f32 %v654_v51, %v5839_v42 }
  0xec   : > { %v5844_v44 = vld [vmem:[#allocation2 + $0x18] sm:$0x3]  ;;  %v846_v50 = vmul.f32 %v839_v49, %v835_v47  ;;  %v949_v55 = vmul.f32 %v942_v53, %v835_v47  ;;  %v1145_v9 = vmul.f32 %v1138_v60, %v835_v47  ;;  %v661_v49 = vld [vmem:[%s6774_s2 + $0x6] sm:$0x3] }
  0xed   : > { %358 = vrot.lane.b32.xlu0 %v5844_v44, %s6780_s8  ;;  %v836_v54 = vld [vmem:[#allocation2 + $0x18] sm:$0x3]  ;;  %v348_v56 = vmul.f32 %v340_v17, %v5844_v44  ;;  %v555_v57 = vmul.f32 %v547_v25, %v5844_v44  ;;  %v660_v58 = vmul.f32 %v652_v26, %v5844_v44  ;;  %v350_v25 = vld [vmem:[%s6774_s2 + $0x2] sm:$0x3]  ;;  %s5682_s8 = smov 80  }
  0xee   : > { %v847_v62 = vmul.f32 %v842_v59, %v836_v54  ;;  %v950_v0 = vmul.f32 %v945_v63, %v836_v54  ;;  %v1146_v4 = vmul.f32 %v1141_v3, %v836_v54 }
  0xef   : > { %562 = vrot.lane.b32.xlu1 %v554_v45, %s5662_s6  ;;  %v556_v45 = vld [vmem:[%s6774_s2 + $0x4] sm:$0x3] }
  0xf1   : > { %448 = vrot.lane.b32.xlu0 %v347_v48, %s6783_s7 }
  0xf3   : > { %853 = vrot.lane.b32.xlu1 %v846_v50, %s5660_s26 }
  0xf5   : > { %667 = vrot.lane.b32.xlu0 %v659_v52, %s5661_s30  ;;  %v754_v52 = vld [vmem:[%s6774_s2 + $0x8] sm:$0x3] }
  0xf7   : > { %1050 = vrot.lane.b32.xlu1 %v836_v54, %s6778_s9 }
  0xf9   : > { %956 = vrot.lane.b32.xlu0 %v949_v55, %s5659_s25 }
  0xfb   : > { %450 = vrot.lane.b32.xlu1 %v348_v56, %s6783_s7  ;;  %s5688_s7 = smov 122  }
  0xfd   : > { %564 = vrot.lane.b32.xlu0 %v555_v57, %s5662_s6 }
  0xff   : > { %669 = vrot.lane.b32.xlu1 %v660_v58, %s5661_s30  ;;  %v952_v58 = vld [vmem:[%s6774_s2 + $0xc] sm:$0x3] }
 0x101   : > { %1052 = vrot.lane.b32.xlu0 %v5819_v27, %s6778_s9 }
 0x103   : > { %855 = vrot.lane.b32.xlu1 %v847_v62, %s5660_s26  ;;  %v1044_v62 = vld [vmem:[%s6774_s2 + $0xe] sm:$0x3] }
 0x105   : > { %958 = vrot.lane.b32.xlu0 %v950_v0, %s5659_s25 }
 0x106   : > { %v561_v18 = vpop.permute.xlu1 %560 }
 0x107   : > { %1048 = vrot.lane.b32.xlu1 %v835_v47, %s6778_s9  ;;  %s5683_s9 = smov 60  }
 0x109   : > { %1154 = vrot.lane.b32.xlu0 %v1146_v4, %s5658_s23  ;;  %v447_v17 = vpop.permute.xlu0 %446  ;;  %v1148_v4 = vld [vmem:[%s6774_s2 + $0x10] sm:$0x3] }
 0x10b   : > { %1156 = vrot.lane.b32.xlu1 %v1147_v5, %s5658_s23 }
 0x10d   : > { %1152 = vrot.lane.b32.xlu0 %v1145_v9, %s5658_s23  ;;  %v666_v19 = vpop.permute.xlu0 %665 }
 0x10f   : > { %1242 = vperm.xlu1 %5588, %v321_v10  }
 0x111   : > { %1282 = vrot.lane.b32.xlu0 %v1277_v11, %s5667_s16 }
 0x113   : > { %1284 = vrot.lane.b32.xlu1 %v1281_v13, %s5667_s16 }
 0x115   : > { %1487 = vrot.lane.b32.xlu0 %v1482_v14, %s5668_s17  ;;  %v858_v21 = vpop.permute.xlu0 %857 }
 0x117   : > { %1489 = vrot.lane.b32.xlu1 %v1486_v15, %s5668_s17 }
 0x119   : > { %1592 = vrot.lane.b32.xlu0 %v1277_v11, %s5669_s10  ;;  %v961_v20 = vpop.permute.xlu1 %960 }
 0x11b   : > { %1594 = vrot.lane.b32.xlu1 %v1281_v13, %s5669_s10 }
 0x11d   : > { %1780 = vrot.lane.b32.xlu0 %v1482_v14, %s5670_s11 }
 0x11f   : > { %1782 = vrot.lane.b32.xlu1 %v1486_v15, %s5670_s11 }
 0x121   : > { %1883 = vrot.lane.b32.xlu0 %v1277_v11, %s5671_s12 }
 0x123   : > { %1885 = vrot.lane.b32.xlu1 %v1281_v13, %s5671_s12 }
 0x125   : > { %2079 = vrot.lane.b32.xlu0 %v1482_v14, %s5672_s13 }
 0x127   : > { %2081 = vrot.lane.b32.xlu1 %v1486_v15, %s5672_s13 }
 0x129   : > { %1299 = vrot.lane.b32.xlu0 %v1268_v12, %s5673_s14 }
 0x15d   : > { %v357_v22 = vpop.permute.xlu1 %356 }
 0x15e   : > { %v361_v27 = vsel %vm360_vm7, %v355_v16, %v357_v22 }
 0x15f   : > { %v359_v23 = vpop.permute.xlu0 %358 }
 0x160   : > { %v362_v24 = vsel %vm360_vm7, %v357_v22, %v359_v23 }
 0x161   : > { %5369 = vmatprep.subr.msk.mxu1 %vm367_vm8, %v362_v24  ;;  %v563_v26 = vpop.permute.xlu1 %562 }
 0x162   : > { %5370 = vmatpush1.msk.msra.mxu1 %vm367_vm8, %v361_v27  ;;  %v567_v46 = vsel %vm566_vm5, %v561_v18, %v563_v26 }
 0x163   : > { %v449_v28 = vpop.permute.xlu0 %448  ;;  %5371 = vmatmul.mubr.msk.f32.vlgmr.msra.gmra.mxu1 %vm363_vm9, %v350_v25 }
 0x164   : > { %640 = vmatprep.mubr.f32.mxu1 %v5656_v2  ;;  %v453_v39 = vsel %vm452_vm6, %v447_v17, %v449_v28 }
 0x165   : > { %v854_v29 = vpop.permute.xlu1 %853 }
 0x167   : > { %v668_v30 = vpop.permute.xlu0 %667 }
 0x168   : > { %v672_v50 = vsel %vm671_vm4, %v666_v19, %v668_v30 }
 0x169   : > { %v1051_v31 = vpop.permute.xlu1 %1050 }
 0x16b   : > { %v957_v32 = vpop.permute.xlu0 %956 }
 0x16d   : > { %v451_v33 = vpop.permute.xlu1 %450 }
 0x16e   : > { %v454_v34 = vsel %vm452_vm6, %v449_v28, %v451_v33 }
 0x16f   : > { %5372 = vmatprep.subr.msk.mxu0 %vm367_vm8, %v454_v34  ;;  %v565_v41 = vpop.permute.xlu0 %564 }
 0x170   : > { %v568_v43 = vsel %vm566_vm5, %v563_v26, %v565_v41  ;;  %5373 = vmatpush1.msk.msra.mxu0 %vm367_vm8, %v453_v39 }
 0x171   : > { %v670_v47 = vpop.permute.xlu1 %669  ;;  %5374 = vmatmul.mubr.msk.f32.vlgmr.msra.gmra.mxu0 %vm363_vm9, %v349_v36  ;;  %5376 = vmatprep.subr.msk.mxu1 %vm367_vm8, %v568_v43 }
 0x172   : > { %v673_v48 = vsel %vm671_vm4, %v668_v30, %v670_v47  ;;  %5377 = vmatpush1.msk.msra.mxu1 %vm367_vm8, %v567_v46  ;;  %745 = vmatprep.mubr.f32.mxu0 %v5656_v2 }
 0x173   : > { %5378 = vmatmul.mubr.msk.f32.vlgmr.msra.gmra.mxu1 %vm363_vm9, %v556_v45  ;;  %5379 = vmatprep.subr.msk.mxu0 %vm367_vm8, %v673_v48  ;;  %v1053_v51 = vpop.permute.xlu0 %1052 }
 0x174   : > { %5382 = vmatprep.subr.msk.mxu1 %vm367_vm8, %v5844_v44  ;;  %5380 = vmatpush1.msk.msra.mxu0 %vm367_vm8, %v672_v50  ;;  %v849_v44 = vld [vmem:[%s6774_s2 + $0xa] sm:$0x3]  ;;  %v1056_v59 = vsel %vm6782_vm10, %v1051_v31, %v1053_v51 }
 0x175   : > { %5383 = vmatpush1.msk.msra.mxu1 %vm367_vm8, %v5839_v42  ;;  %v856_v53 = vpop.permute.xlu1 %855  ;;  %5381 = vmatmul.mubr.msk.f32.vlgmr.msra.gmra.mxu0 %vm363_vm9, %v661_v49 }
 0x176   : > { %v859_v54 = vsel %vm653_vm3, %v854_v29, %v856_v53  ;;  %826 = vmatprep.mubr.f32.mxu1 %v5656_v2  ;;  %v860_v55 = vsel %vm653_vm3, %v856_v53, %v858_v21  ;;  %932 = vmatprep.mubr.f32.mxu0 %v5656_v2 }
 0x177   : > { %5384 = vmatmul.mubr.msk.f32.vlgmr.msra.gmra.mxu1 %vm363_vm9, %v754_v52  ;;  %5385 = vmatprep.subr.msk.mxu0 %vm367_vm8, %v860_v55  ;;  %v959_v42 = vpop.permute.xlu0 %958 }
 0x178   : > { %v962_v56 = vsel %vm548_vm1, %v957_v32, %v959_v42  ;;  %5386 = vmatpush1.msk.msra.mxu0 %vm367_vm8, %v859_v54  ;;  %v963_v57 = vsel %vm548_vm1, %v959_v42, %v961_v20  ;;  %1035 = vmatprep.mubr.f32.mxu1 %v5656_v2  ;;  %v6003_v20 = vld [vmem:[#allocation2 + $0x8] sm:$0x3] }
 0x179   : > { %v1049_v60 = vpop.permute.xlu1 %1048  ;;  %5387 = vmatmul.mubr.msk.f32.vlgmr.msra.gmra.mxu0 %vm363_vm9, %v849_v44  ;;  %5388 = vmatprep.subr.msk.mxu1 %vm367_vm8, %v963_v57 }
 0x17a   : > { %v1055_v61 = vsel %vm6782_vm10, %v1049_v60, %v1051_v31  ;;  %5391 = vmatprep.subr.msk.mxu0 %vm367_vm8, %v1056_v59  ;;  %5389 = vmatpush1.msk.msra.mxu1 %vm367_vm8, %v962_v56  ;;  %vm1305_vm10 = vcmask 261120  }
 0x17b   : > { %5390 = vmatmul.mubr.msk.f32.vlgmr.msra.gmra.mxu1 %vm363_vm9, %v952_v58  ;;  %5392 = vmatpush1.msk.msra.mxu0 %vm367_vm8, %v1055_v61  ;;  %v1155_v63 = vpop.permute.xlu0 %1154 }
 0x17c   : > { %1128 = vmatprep.mubr.f32.mxu0 %v5656_v2  ;;  %1231 = vmatprep.mubr.f32.mxu1 %v5656_v2 }
 0x17d   : > { %v1157_v0 = vpop.permute.xlu1 %1156  ;;  %5393 = vmatmul.mubr.msk.f32.vlgmr.msra.gmra.mxu0 %vm363_vm9, %v1044_v62 }
 0x17e   : > { %v1159_v1 = vsel %vm341_vm2, %v1155_v63, %v1157_v0  ;;  %1379 = vmatprep.mubr.f32.mxu0 %v5656_v2 }
 0x17f   : > { %5394 = vmatprep.subr.msk.mxu1 %vm367_vm8, %v1159_v1  ;;  %v1153_v3 = vpop.permute.xlu0 %1152 }
 0x180   : > { %v1158_v5 = vsel %vm341_vm2, %v1153_v3, %v1155_v63 }
 0x181   : > { %5395 = vmatpush1.msk.msra.mxu1 %vm367_vm8, %v1158_v5 }
 0x182   : > { %5396 = vmatmul.mubr.msk.f32.vlgmr.msra.gmra.mxu1 %vm363_vm9, %v1148_v4 }
 0x183   : > { %1469 = vmatprep.mubr.f32.mxu1 %v5656_v2  ;;  %v5985_v10 = vpop.permute.xlu0 %1282 }
 0x184   : > { %v1291_v14 = vmul.f32 %v5985_v10, %v1268_v12 }
 0x186   : > { %1389 = vrot.lane.b32.xlu1 %v1291_v14, %s5672_s13 }
 0x187   : > { %v5989_v13 = vpop.permute.xlu0 %1487 }
 0x188   : > { %v1496_v18 = vmul.f32 %v5989_v13, %v1268_v12 }
 0x18a   : > { %v1243_v8 = vpop.permute.xlu1 %1242  ;;  %1503 = vrot.lane.b32.xlu0 %v1496_v18, %s5671_s12 }
 0x18b   : > { %v5996_v16 = vpop.permute.xlu0 %1592 }
 0x18c   : > { %v1601_v17 = vmul.f32 %v5996_v16, %v1268_v12 }
 0x18e   : > { %v5983_v9 = vpop.permute.xlu1 %1284  ;;  %1608 = vrot.lane.b32.xlu1 %v1601_v17, %s5670_s11 }
 0x192   : > { %v5987_v11 = vpop.permute.xlu1 %1489 }
 0x196   : > { %v5992_v15 = vpop.permute.xlu1 %1594 }
 0x19a   : > { %v6000_v19 = vpop.permute.xlu1 %1782 }
 0x19b   : > { %v1790_v21 = vmul.f32 %v6000_v19, %v6003_v20 }
 0x19d   : > { %1799 = vrot.lane.b32.xlu1 %v1790_v21, %s5669_s10 }
 0x19e   : > { %v6008_v22 = vpop.permute.xlu1 %1885 }
 0x19f   : > { %v1893_v23 = vmul.f32 %v6008_v22, %v6003_v20 }
 0x1a1   : > { %1902 = vrot.lane.b32.xlu0 %v1893_v23, %s5668_s17 }
 0x223   : > { %v438_v24 = vpop.f32.mrf.mxu1 }
 0x225   : > { %v440_v25 = vpop.f32.mrf.mxu1 }
 0x231   : > { %v528_v26 = vpop.f32.mrf.mxu0 }
 0x232   : > { %v529_v27 = vadd.f32 %v528_v26, %v438_v24  ;;  %v1492_v24 = vsel %vm1491_vm11, %v5989_v13, %v5987_v11  ;;  %v1287_v26 = vsel %vm1286_vm12, %v5985_v10, %v5983_v9  ;;  %v1597_v13 = vsel %vm1596_vm13, %v5996_v16, %v5992_v15 }
 0x233   : > { %v530_v28 = vpop.f32.mrf.mxu0  ;;  %v642_v29 = vpop.f32.mrf.mxu1 }
 0x234   : > { %v531_v30 = vadd.f32 %v530_v28, %v440_v25  ;;  %v647_v31 = vadd.f32 %v642_v29, %v529_v27  ;;  %v1781_v29 = vpop.permute.xlu0 %1780 }
 0x235   : > { %v644_v32 = vpop.f32.mrf.mxu1  ;;  %v747_v33 = vpop.f32.mrf.mxu0 }
 0x236   : > { %v648_v34 = vadd.f32 %v644_v32, %v531_v30  ;;  %v752_v36 = vadd.f32 %v747_v33, %v647_v31 }
 0x237   : > { %v749_v39 = vpop.f32.mrf.mxu0  ;;  %v828_v41 = vpop.f32.mrf.mxu1 }
 0x238   : > { %v753_v43 = vadd.f32 %v749_v39, %v648_v34  ;;  %v833_v45 = vadd.f32 %v828_v41, %v752_v36  ;;  %v1884_v10 = vpop.permute.xlu0 %1883  ;;  %v1784_v39 = vsel %vm363_vm9, %v1781_v29, %v6000_v19 }
 0x239   : > { %v830_v46 = vpop.f32.mrf.mxu1  ;;  %v934_v47 = vpop.f32.mrf.mxu0 }
 0x23a   : > { %v834_v48 = vadd.f32 %v830_v46, %v753_v43  ;;  %v939_v49 = vadd.f32 %v934_v47, %v833_v45  ;;  %v2082_v43 = vpop.permute.xlu1 %2081  ;;  %v5426_v47 = vld [vmem:[%s6776_s4 + $0x4] ss:$8 sm:$0x3] }
 0x23b   : > { %v936_v50 = vpop.f32.mrf.mxu0  ;;  %v1037_v51 = vpop.f32.mrf.mxu1  ;;  %v2089_v19 = vmul.f32 %v2082_v43, %v6003_v20 }
 0x23c   : > { %v940_v52 = vadd.f32 %v936_v50, %v834_v48  ;;  %v1042_v53 = vadd.f32 %v1037_v51, %v939_v49  ;;  %v2080_v41 = vpop.permute.xlu0 %2079  ;;  %v5433_v49 = vld [vmem:[%s6776_s4 + $0x5] ss:$8 sm:$0x3]  ;;  %v2223_v51 = vrot.slane %v5426_v47, %v5786_v7 }
 0x23d   : > { %v1039_v54 = vpop.f32.mrf.mxu1  ;;  %v1130_v55 = vpop.f32.mrf.mxu0  ;;  %v2083_v45 = vsel %vm1395_vm15, %v2080_v41, %v2082_v43  ;;  %v2424_v50 = vrot.slane %v5433_v49, %v5784_v6  ;;  %v1894_v43 = vld [vmem:[%s6774_s2 + $0x1e] sm:$0x3] }
 0x23e   : > { %v1043_v44 = vadd.f32 %v1039_v54, %v940_v52  ;;  %v1135_v56 = vadd.f32 %v1130_v55, %v1042_v53  ;;  %v2428_v52 = vrot.slane %v5433_v49, %v5786_v7  ;;  %v1390_v54 = vpop.permute.xlu1 %1389 }
 0x23f   : > { %v1132_v42 = vpop.f32.mrf.mxu0 }
 0x240   : > { %v1136_v58 = vadd.f32 %v1132_v42, %v1043_v44  ;;  %v1300_v53 = vpop.permute.xlu0 %1299 }
 0x242   : > { %v1233_v57 = vpop.f32.mrf.mxu1  ;;  %v1609_v44 = vpop.permute.xlu1 %1608 }
 0x243   : > { %v1238_v59 = vadd.f32 %v1233_v57, %v1135_v56 }
 0x244   : > { %v1235_v60 = vpop.f32.mrf.mxu1  ;;  %v1504_v55 = vpop.permute.xlu0 %1503 }
 0x245   : > { %v6014_v61 = vadd.f32 %v1243_v8, %v1238_v59  ;;  %v1239_v62 = vadd.f32 %v1235_v60, %v1136_v58  ;;  %v1295_v60 = vld [vmem:[%s6774_s2 + $0x14] sm:$0x3] }
 0x246   : > { %v1800_v56 = vpop.permute.xlu1 %1799 }
 0x247   : > { %v1247_v63 = vmax.f32 %v6014_v61, 0.0  ;;  %v6017_v0 = vadd.f32 %v1243_v8, %v1239_v62 }
 0x248   : > { %v1903_v42 = vpop.permute.xlu0 %1902 }
 0x249   : > { %v1251_v1 = vrot.slane %v1247_v63, 6  ;;  %v1248_v3 = vmax.f32 %v6017_v0, 0.0 }
 0x24b   : > { %v1255_v4 = vadd.f32 %v1251_v1, %v5825_v35  ;;  %v1252_v5 = vrot.slane %v1248_v3, 6 }
 0x24d   : > { %v1257_v12 = vadd.f32 %v1255_v4, %v5828_v37  ;;  %v1256_v14 = vadd.f32 %v1252_v5, %v5830_v38 }
 0x24f   : > { %v1262_v17 = vrot.slane %v1257_v12, 2  ;;  %v1258_v18 = vadd.f32 %v1256_v14, %v5835_v40 }
 0x251   : > { %1266 = vst [vmem:[#allocation2] sm:$0x3] %v1262_v17  ;;  %v1263_v8 = vrot.slane %v1258_v18, 2 }
 0x253   : > { %1267 = vst [vmem:[#allocation2 + $0x18] sm:$0x3] %v1263_v8 }
 0x258   : > { %v6028_v21 = vld [vmem:[#allocation2] sm:$0x3] }
 0x259   : > { %1301 = vrot.lane.b32.xlu0 %v6028_v21, %s5673_s14  ;;  %v1497_v25 = vmul.f32 %v1492_v24, %v6028_v21  ;;  %v1777_v27 = vld [vmem:[#allocation2] sm:$0x3]  ;;  %v1292_v28 = vmul.f32 %v1287_v26, %v6028_v21  ;;  %v1602_v31 = vmul.f32 %v1597_v13, %v6028_v21  ;;  %v1294_v24 = vld [vmem:[%s6774_s2 + $0x12] sm:$0x3] }
 0x25a   : > { %v6032_v23 = vld [vmem:[#allocation2 + $0x18] sm:$0x3]  ;;  %v1788_v30 = vmul.f32 %v1781_v29, %v1777_v27  ;;  %v1891_v33 = vmul.f32 %v1884_v10, %v1777_v27  ;;  %v2087_v48 = vmul.f32 %v2080_v41, %v1777_v27 }
 0x25b   : > { %1303 = vrot.lane.b32.xlu1 %v6032_v23, %s5673_s14  ;;  %v1778_v32 = vld [vmem:[#allocation2 + $0x18] sm:$0x3]  ;;  %v1293_v34 = vmul.f32 %v5983_v9, %v6032_v23  ;;  %v1498_v36 = vmul.f32 %v5987_v11, %v6032_v23  ;;  %v1603_v16 = vmul.f32 %v5992_v15, %v6032_v23  ;;  %v1887_v11 = vsel %vm1509_vm14, %v1884_v10, %v6008_v22  ;;  %v1259_v22 = vld [vmem:[%s6775_s3 + $0x2] sm:$0x3]  ;;  %s5681_s14 = smov 48  }
 0x25c   : > { %v1789_v9 = vmul.f32 %v1784_v39, %v1778_v32  ;;  %v1892_v15 = vmul.f32 %v1887_v11, %v1778_v32  ;;  %v2088_v46 = vmul.f32 %v2083_v45, %v1778_v32  ;;  %v1986_v45 = vld [vmem:[%s6774_s2 + $0x20] sm:$0x3] }
 0x25d   : > { %1505 = vrot.lane.b32.xlu0 %v1497_v25, %s5671_s12 }
 0x25f   : > { %1391 = vrot.lane.b32.xlu1 %v1292_v28, %s5672_s13  ;;  %v1499_v28 = vld [vmem:[%s6774_s2 + $0x16] sm:$0x3] }
 0x261   : > { %1795 = vrot.lane.b32.xlu0 %v1788_v30, %s5669_s10 }
 0x263   : > { %1610 = vrot.lane.b32.xlu1 %v1602_v31, %s5670_s11  ;;  %v1604_v31 = vld [vmem:[%s6774_s2 + $0x18] sm:$0x3] }
 0x265   : > { %1992 = vrot.lane.b32.xlu0 %v1778_v32, %s5674_s15 }
 0x267   : > { %1898 = vrot.lane.b32.xlu1 %v1891_v33, %s5668_s17  ;;  %v1696_v33 = vld [vmem:[%s6774_s2 + $0x1a] sm:$0x3] }
 0x269   : > { %1393 = vrot.lane.b32.xlu0 %v1293_v34, %s5672_s13  ;;  %s5680_s13 = smov 51  }
 0x26b   : > { %1507 = vrot.lane.b32.xlu1 %v1498_v36, %s5671_s12  ;;  %s5679_s12 = smov 45  }
 0x26d   : > { %1612 = vrot.lane.b32.xlu0 %v1603_v16, %s5670_s11  ;;  %s5677_s11 = smov 125  }
 0x26f   : > { %1994 = vrot.lane.b32.xlu1 %v6003_v20, %s5674_s15  ;;  %v2219_v20 = vrot.slane %v5426_v47, %v5784_v6 }
 0x271   : > { %1797 = vrot.lane.b32.xlu0 %v1789_v9, %s5669_s10 }
 0x273   : > { %1900 = vrot.lane.b32.xlu1 %v1892_v15, %s5668_s17  ;;  %s5675_s17 = smov 77  }
 0x275   : > { %1990 = vrot.lane.b32.xlu0 %v1777_v27, %s5674_s15  ;;  %s5676_s15 = smov 83  }
 0x277   : > { %2096 = vrot.lane.b32.xlu1 %v2088_v46, %s5667_s16 }
 0x279   : > { %2098 = vrot.lane.b32.xlu0 %v2089_v19, %s5667_s16 }
 0x27b   : > { %2094 = vrot.lane.b32.xlu1 %v2087_v48, %s5667_s16  ;;  %s5678_s16 = smov 3  }
 0x27d   : > { %2184 = vperm.xlu0 %5589, %v1259_v22   ;;  %v2090_v22 = vld [vmem:[%s6774_s2 + $0x22] sm:$0x3] }
 0x27f   : > { %2224 = vrot.lane.b32.xlu1 %v2219_v20, %s5675_s17 }
 0x281   : > { %2429 = vrot.lane.b32.xlu0 %v2424_v50, %s5676_s15 }
 0x283   : > { %2226 = vrot.lane.b32.xlu1 %v2223_v51, %s5675_s17 }
 0x285   : > { %2534 = vrot.lane.b32.xlu0 %v2219_v20, %s5677_s11 }
 0x287   : > { %2431 = vrot.lane.b32.xlu1 %v2428_v52, %s5676_s15 }
 0x289   : > { %2723 = vrot.lane.b32.xlu0 %v2424_v50, %s5678_s16 }
 0x28b   : > { %2536 = vrot.lane.b32.xlu1 %v2223_v51, %s5677_s11 }
 0x28d   : > { %2826 = vrot.lane.b32.xlu0 %v2219_v20, %s5679_s12  ;;  %v2210_v20 = vld [vmem:[#allocation2 + $0x10] sm:$0x3] }
 0x28f   : > { %2725 = vrot.lane.b32.xlu1 %v2428_v52, %s5678_s16 }
 0x291   : > { %3022 = vrot.lane.b32.xlu0 %v2424_v50, %s5680_s13 }
 0x293   : > { %2828 = vrot.lane.b32.xlu1 %v2223_v51, %s5679_s12 }
 0x295   : > { %2241 = vrot.lane.b32.xlu0 %v2210_v20, %s5681_s14 }
 0x297   : > { %3024 = vrot.lane.b32.xlu1 %v2428_v52, %s5680_s13 }
 0x2cb   : > { %v1302_v57 = vpop.permute.xlu0 %1301 }
 0x2cc   : > { %v1306_v62 = vsel %vm1305_vm10, %v1300_v53, %v1302_v57 }
 0x2cd   : > { %v1304_v58 = vpop.permute.xlu1 %1303 }
 0x2ce   : > { %v1307_v59 = vsel %vm1305_vm10, %v1302_v57, %v1304_v58  ;;  %vm1996_vm10 = vcmask 785408   ;;  %v6198_v58 = vld [vmem:[#allocation2 + $0x8] sm:$0x3] }
 0x2cf   : > { %5398 = vmatprep.subr.msk.mxu0 %vm367_vm8, %v1307_v59  ;;  %v1506_v1 = vpop.permute.xlu0 %1505 }
 0x2d0   : > { %5399 = vmatpush1.msk.msra.mxu0 %vm367_vm8, %v1306_v62  ;;  %v1510_v29 = vsel %vm1509_vm14, %v1504_v55, %v1506_v1 }
 0x2d1   : > { %v1392_v4 = vpop.permute.xlu1 %1391  ;;  %5400 = vmatmul.mubr.msk.f32.vlgmr.msra.gmra.mxu0 %vm363_vm9, %v1295_v60 }
 0x2d2   : > { %1583 = vmatprep.mubr.f32.mxu0 %v5656_v2  ;;  %v1396_v25 = vsel %vm1395_vm15, %v1390_v54, %v1392_v4 }
 0x2d3   : > { %v1796_v5 = vpop.permute.xlu0 %1795 }
 0x2d5   : > { %v1611_v12 = vpop.permute.xlu1 %1610 }
 0x2d6   : > { %v1614_v10 = vsel %vm363_vm9, %v1609_v44, %v1611_v12 }
 0x2d7   : > { %v1993_v14 = vpop.permute.xlu0 %1992 }
 0x2d9   : > { %v1899_v17 = vpop.permute.xlu1 %1898 }
 0x2db   : > { %v1394_v18 = vpop.permute.xlu0 %1393 }
 0x2dc   : > { %v1397_v8 = vsel %vm1395_vm15, %v1392_v4, %v1394_v18  ;;  %vm2451_vm15 = vcmask 367616  }
 0x2dd   : > { %v1508_v26 = vpop.permute.xlu1 %1507  ;;  %5401 = vmatprep.subr.msk.mxu1 %vm367_vm8, %v1397_v8 }
 0x2de   : > { %v1511_v27 = vsel %vm1509_vm14, %v1506_v1, %v1508_v26  ;;  %5402 = vmatpush1.msk.msra.mxu1 %vm367_vm8, %v1396_v25  ;;  %vm2556_vm14 = vcmask 23552  }
 0x2df   : > { %5403 = vmatmul.mubr.msk.f32.vlgmr.msra.gmra.mxu1 %vm363_vm9, %v1294_v24  ;;  %5405 = vmatprep.subr.msk.mxu0 %vm367_vm8, %v1511_v27  ;;  %v1613_v30 = vpop.permute.xlu0 %1612 }
 0x2e0   : > { %v1615_v13 = vsel %vm363_vm9, %v1611_v12, %v1613_v30  ;;  %5406 = vmatpush1.msk.msra.mxu0 %vm367_vm8, %v1510_v29  ;;  %1687 = vmatprep.mubr.f32.mxu1 %v5656_v2 }
 0x2e1   : > { %v1995_v32 = vpop.permute.xlu1 %1994  ;;  %5407 = vmatmul.mubr.msk.f32.vlgmr.msra.gmra.mxu0 %vm363_vm9, %v1499_v28  ;;  %5408 = vmatprep.subr.msk.mxu1 %vm367_vm8, %v1615_v13 }
 0x2e2   : > { %5411 = vmatprep.subr.msk.mxu0 %vm367_vm8, %v6032_v23  ;;  %5409 = vmatpush1.msk.msra.mxu1 %vm367_vm8, %v1614_v10  ;;  %v1791_v23 = vld [vmem:[%s6774_s2 + $0x1c] sm:$0x3]  ;;  %v1998_v9 = vsel %vm1996_vm10, %v1993_v14, %v1995_v32 }
 0x2e3   : > { %5412 = vmatpush1.msk.msra.mxu0 %vm367_vm8, %v6028_v21  ;;  %5410 = vmatmul.mubr.msk.f32.vlgmr.msra.gmra.mxu1 %vm363_vm9, %v1604_v31  ;;  %v1798_v34 = vpop.permute.xlu0 %1797 }
 0x2e4   : > { %v1801_v36 = vsel %vm1596_vm13, %v1796_v5, %v1798_v34  ;;  %1768 = vmatprep.mubr.f32.mxu0 %v5656_v2  ;;  %v1802_v16 = vsel %vm1596_vm13, %v1798_v34, %v1800_v56  ;;  %1874 = vmatprep.mubr.f32.mxu1 %v5656_v2  ;;  %vm2538_vm13 = vcmask 1022976  }
 0x2e5   : > { %v1901_v39 = vpop.permute.xlu1 %1900  ;;  %5413 = vmatmul.mubr.msk.f32.vlgmr.msra.gmra.mxu0 %vm363_vm9, %v1696_v33  ;;  %5414 = vmatprep.subr.msk.mxu1 %vm367_vm8, %v1802_v16 }
 0x2e6   : > { %v1904_v21 = vsel %vm1491_vm11, %v1899_v17, %v1901_v39  ;;  %5415 = vmatpush1.msk.msra.mxu1 %vm367_vm8, %v1801_v36  ;;  %v1905_v41 = vsel %vm1491_vm11, %v1901_v39, %v1903_v42  ;;  %1977 = vmatprep.mubr.f32.mxu0 %v5656_v2  ;;  %vm2433_vm11 = vcmask 678912  }
 0x2e7   : > { %5416 = vmatmul.mubr.msk.f32.vlgmr.msra.gmra.mxu1 %vm363_vm9, %v1791_v23  ;;  %5417 = vmatprep.subr.msk.mxu0 %vm367_vm8, %v1905_v41  ;;  %v1991_v11 = vpop.permute.xlu0 %1990 }
 0x2e8   : > { %5420 = vmatprep.subr.msk.mxu1 %vm367_vm8, %v1998_v9  ;;  %v1997_v15 = vsel %vm1996_vm10, %v1991_v11, %v1993_v14  ;;  %5418 = vmatpush1.msk.msra.mxu0 %vm367_vm8, %v1904_v21  ;;  %vm2337_vm10 = vcmask 416768  }
 0x2e9   : > { %v2097_v46 = vpop.permute.xlu1 %2096  ;;  %5419 = vmatmul.mubr.msk.f32.vlgmr.msra.gmra.mxu0 %vm363_vm9, %v1894_v43  ;;  %5421 = vmatpush1.msk.msra.mxu1 %vm367_vm8, %v1997_v15 }
 0x2ea   : > { %2070 = vmatprep.mubr.f32.mxu1 %v5656_v2  ;;  %2173 = vmatprep.mubr.f32.mxu0 %v5656_v2 }
 0x2eb   : > { %5422 = vmatmul.mubr.msk.f32.vlgmr.msra.gmra.mxu1 %vm363_vm9, %v1986_v45  ;;  %v2099_v19 = vpop.permute.xlu0 %2098 }
 0x2ec   : > { %v2101_v47 = vsel %vm1286_vm12, %v2097_v46, %v2099_v19  ;;  %2321 = vmatprep.mubr.f32.mxu1 %v5656_v2 }
 0x2ed   : > { %v2095_v48 = vpop.permute.xlu1 %2094  ;;  %5423 = vmatprep.subr.msk.mxu0 %vm367_vm8, %v2101_v47 }
 0x2ee   : > { %v2100_v49 = vsel %vm1286_vm12, %v2095_v48, %v2097_v46  ;;  %vm2228_vm12 = vcmask 629760  }
 0x2ef   : > { %5424 = vmatpush1.msk.msra.mxu0 %vm367_vm8, %v2100_v49 }
 0x2f0   : > { %5425 = vmatmul.mubr.msk.f32.vlgmr.msra.gmra.mxu0 %vm363_vm9, %v2090_v22 }
 0x2f1   : > { %2411 = vmatprep.mubr.f32.mxu0 %v5656_v2  ;;  %v6178_v50 = vpop.permute.xlu1 %2224 }
 0x2f2   : > { %v2233_v51 = vmul.f32 %v6178_v50, %v2210_v20 }
 0x2f4   : > { %2331 = vrot.lane.b32.xlu1 %v2233_v51, %s5680_s13 }
 0x2f5   : > { %v6182_v52 = vpop.permute.xlu1 %2226 }
 0x2f8   : > { %v2185_v53 = vpop.permute.xlu0 %2184 }
 0x2f9   : > { %v6184_v54 = vpop.permute.xlu1 %2431 }
 0x2fc   : > { %v6186_v55 = vpop.permute.xlu0 %2429 }
 0x2fd   : > { %v6188_v44 = vpop.permute.xlu1 %2536  ;;  %v2438_v56 = vmul.f32 %v6186_v55, %v2210_v20 }
 0x2ff   : > { %2445 = vrot.lane.b32.xlu0 %v2438_v56, %s5679_s12 }
 0x300   : > { %v6191_v2 = vpop.permute.xlu0 %2534 }
 0x301   : > { %v2543_v42 = vmul.f32 %v6191_v2, %v2210_v20  ;;  %v6195_v57 = vpop.permute.xlu1 %2725 }
 0x302   : > { %v2733_v59 = vmul.f32 %v6195_v57, %v6198_v58 }
 0x303   : > { %2550 = vrot.lane.b32.xlu1 %v2543_v42, %s5678_s16 }
 0x305   : > { %v6203_v60 = vpop.permute.xlu1 %2828 }
 0x306   : > { %v2836_v62 = vmul.f32 %v6203_v60, %v6198_v58 }
 0x307   : > { %2742 = vrot.lane.b32.xlu1 %v2733_v59, %s5677_s11 }
 0x308   : > { %2845 = vrot.lane.b32.xlu0 %v2836_v62, %s5676_s15 }
 0x391   : > { %v1381_v1 = vpop.f32.mrf.mxu0 }
 0x393   : > { %v1383_v4 = vpop.f32.mrf.mxu0 }
 0x39f   : > { %v1471_v5 = vpop.f32.mrf.mxu1 }
 0x3a0   : > { %v1472_v12 = vadd.f32 %v1471_v5, %v1381_v1 }
 0x3a1   : > { %v1473_v14 = vpop.f32.mrf.mxu1  ;;  %v1585_v17 = vpop.f32.mrf.mxu0 }
 0x3a2   : > { %v1474_v18 = vadd.f32 %v1473_v14, %v1383_v4  ;;  %v1590_v8 = vadd.f32 %v1585_v17, %v1472_v12  ;;  %v2229_v12 = vsel %vm2228_vm12, %v6178_v50, %v6182_v52 }
 0x3a3   : > { %v1587_v24 = vpop.f32.mrf.mxu0  ;;  %v1689_v25 = vpop.f32.mrf.mxu1 }
 0x3a4   : > { %v1591_v26 = vadd.f32 %v1587_v24, %v1474_v18  ;;  %v1694_v27 = vadd.f32 %v1689_v25, %v1590_v8  ;;  %v2724_v18 = vpop.permute.xlu0 %2723 }
 0x3a5   : > { %v1691_v28 = vpop.f32.mrf.mxu1  ;;  %v1770_v29 = vpop.f32.mrf.mxu0 }
 0x3a6   : > { %v1695_v30 = vadd.f32 %v1691_v28, %v1591_v26  ;;  %v1775_v13 = vadd.f32 %v1770_v29, %v1694_v27  ;;  %v2727_v29 = vsel %vm2556_vm14, %v2724_v18, %v6195_v57 }
 0x3a7   : > { %v1772_v31 = vpop.f32.mrf.mxu0  ;;  %v1876_v10 = vpop.f32.mrf.mxu1 }
 0x3a8   : > { %v1776_v32 = vadd.f32 %v1772_v31, %v1695_v30  ;;  %v1881_v33 = vadd.f32 %v1876_v10, %v1775_v13  ;;  %v2827_v25 = vpop.permute.xlu0 %2826 }
 0x3a9   : > { %v1878_v34 = vpop.f32.mrf.mxu1  ;;  %v1979_v36 = vpop.f32.mrf.mxu0 }
 0x3aa   : > { %v1882_v16 = vadd.f32 %v1878_v34, %v1776_v32  ;;  %v1984_v23 = vadd.f32 %v1979_v36, %v1881_v33  ;;  %v5455_v32 = vld [vmem:[%s6776_s4 + $0x6] ss:$8 sm:$0x3] }
 0x3ab   : > { %v1981_v39 = vpop.f32.mrf.mxu0  ;;  %v2072_v21 = vpop.f32.mrf.mxu1  ;;  %v3160_v34 = vrot.slane %v5455_v32, %v5784_v6  ;;  %v3164_v36 = vrot.slane %v5455_v32, %v5786_v7 }
 0x3ac   : > { %v1985_v41 = vadd.f32 %v1981_v39, %v1882_v16  ;;  %v2077_v9 = vadd.f32 %v2072_v21, %v1984_v23  ;;  %v3023_v13 = vpop.permute.xlu0 %3022 }
 0x3ad   : > { %v2074_v43 = vpop.f32.mrf.mxu1 }
 0x3ae   : > { %v2078_v15 = vadd.f32 %v2074_v43, %v1985_v41 }
 0x3b0   : > { %v2175_v11 = vpop.f32.mrf.mxu0  ;;  %v2242_v39 = vpop.permute.xlu0 %2241 }
 0x3b1   : > { %v2180_v45 = vadd.f32 %v2175_v11, %v2077_v9 }
 0x3b2   : > { %v2177_v46 = vpop.f32.mrf.mxu0 }
 0x3b3   : > { %v6209_v19 = vadd.f32 %v2185_v53, %v2180_v45  ;;  %v2181_v47 = vadd.f32 %v2177_v46, %v2078_v15 }
 0x3b4   : > { %v2446_v41 = vpop.permute.xlu0 %2445 }
 0x3b5   : > { %v2189_v48 = vmax.f32 %v6209_v19, 0.0  ;;  %v6212_v22 = vadd.f32 %v2185_v53, %v2181_v47  ;;  %v2237_v47 = vld [vmem:[%s6774_s2 + $0x26] sm:$0x3] }
 0x3b7   : > { %v2193_v49 = vrot.slane %v2189_v48, 4  ;;  %v2190_v20 = vmax.f32 %v6212_v22, 0.0 }
 0x3b8   : > { %v2846_v9 = vpop.permute.xlu0 %2845 }
 0x3b9   : > { %v2197_v51 = vadd.f32 %v2193_v49, %v5825_v35  ;;  %v2194_v42 = vrot.slane %v2190_v20, 4 }
 0x3bb   : > { %v2199_v56 = vadd.f32 %v2197_v51, %v5828_v37  ;;  %v2198_v59 = vadd.f32 %v2194_v42, %v5830_v38  ;;  %v2434_v37 = vsel %vm2433_vm11, %v6186_v55, %v6184_v54  ;;  %v2539_v55 = vsel %vm2538_vm13, %v6191_v2, %v6188_v44 }
 0x3bd   : > { %v2204_v62 = vrot.slane %v2199_v56, 4  ;;  %v2200_v1 = vadd.f32 %v2198_v59, %v5835_v40  ;;  %v6296_v56 = vld [vmem:[#allocation2 + $0x10] sm:$0xff] }
 0x3bf   : > { %2208 = vst [vmem:[#allocation2] sm:$0x3] %v2204_v62  ;;  %v2205_v53 = vrot.slane %v2200_v1, 4 }
 0x3c1   : > { %2209 = vst [vmem:[#allocation2 + $0x18] sm:$0x3] %v2205_v53 }
 0x3c6   : > { %v6223_v4 = vld [vmem:[#allocation2] sm:$0x3] }
 0x3c7   : > { %2243 = vrot.lane.b32.xlu0 %v6223_v4, %s5681_s14  ;;  %v2439_v40 = vmul.f32 %v2434_v37, %v6223_v4  ;;  %v2720_v14 = vld [vmem:[#allocation2] sm:$0x3]  ;;  %v2234_v17 = vmul.f32 %v2229_v12, %v6223_v4  ;;  %v2544_v24 = vmul.f32 %v2539_v55, %v6223_v4  ;;  %v2236_v12 = vld [vmem:[%s6774_s2 + $0x24] sm:$0x3] }
 0x3c8   : > { %v6227_v5 = vld [vmem:[#allocation2 + $0x18] sm:$0x3]  ;;  %v2731_v8 = vmul.f32 %v2724_v18, %v2720_v14  ;;  %v2834_v26 = vmul.f32 %v2827_v25, %v2720_v14  ;;  %v3030_v33 = vmul.f32 %v3023_v13, %v2720_v14 }
 0x3c9   : > { %2245 = vrot.lane.b32.xlu1 %v6227_v5, %s5681_s14  ;;  %v2721_v50 = vld [vmem:[#allocation2 + $0x18] sm:$0x3]  ;;  %v2235_v27 = vmul.f32 %v6182_v52, %v6227_v5  ;;  %v2440_v28 = vmul.f32 %v6184_v54, %v6227_v5  ;;  %v2545_v2 = vmul.f32 %v6188_v44, %v6227_v5  ;;  %v3025_v52 = vpop.permute.xlu1 %3024  ;;  %v2830_v54 = vsel %vm2451_vm15, %v2827_v25, %v6203_v60  ;;  %v2201_v60 = vld [vmem:[%s6775_s3 + $0x4] sm:$0x3]  ;;  %s5684_s14 = smov 68  }
 0x3ca   : > { %v2732_v30 = vmul.f32 %v2727_v29, %v2721_v50  ;;  %v2835_v31 = vmul.f32 %v2830_v54, %v2721_v50  ;;  %v3026_v44 = vsel %vm2337_vm10, %v3023_v13, %v3025_v52  ;;  %v3032_v57 = vmul.f32 %v3025_v52, %v6198_v58  ;;  %v2546_v25 = vld [vmem:[%s6774_s2 + $0x2a] sm:$0x3]  ;;  %v2837_v54 = vld [vmem:[%s6774_s2 + $0x30] sm:$0x3] }
 0x3cb   : > { %2447 = vrot.lane.b32.xlu0 %v2439_v40, %s5679_s12  ;;  %v3031_v10 = vmul.f32 %v3026_v44, %v2721_v50 }
 0x3cd   : > { %2333 = vrot.lane.b32.xlu1 %v2234_v17, %s5680_s13  ;;  %v2332_v21 = vpop.permute.xlu1 %2331 }
 0x3cf   : > { %2738 = vrot.lane.b32.xlu0 %v2731_v8, %s5677_s11  ;;  %v2441_v8 = vld [vmem:[%s6774_s2 + $0x28] sm:$0x3] }
 0x3d1   : > { %2552 = vrot.lane.b32.xlu1 %v2544_v24, %s5678_s16  ;;  %v2551_v43 = vpop.permute.xlu1 %2550 }
 0x3d3   : > { %2935 = vrot.lane.b32.xlu0 %v2721_v50, %s5682_s8 }
 0x3d5   : > { %2841 = vrot.lane.b32.xlu1 %v2834_v26, %s5676_s15  ;;  %v2743_v11 = vpop.permute.xlu1 %2742 }
 0x3d7   : > { %2335 = vrot.lane.b32.xlu0 %v2235_v27, %s5680_s13 }
 0x3d9   : > { %2449 = vrot.lane.b32.xlu1 %v2440_v28, %s5679_s12  ;;  %v2639_v28 = vld [vmem:[%s6774_s2 + $0x2c] sm:$0x3] }
 0x3db   : > { %2554 = vrot.lane.b32.xlu0 %v2545_v2, %s5678_s16  ;;  %s5687_s16 = smov 64  }
 0x3dd   : > { %2937 = vrot.lane.b32.xlu1 %v6198_v58, %s5682_s8  ;;  %v5462_v58 = vld [vmem:[%s6776_s4 + $0x7] ss:$8 sm:$0x3] }
 0x3de   : > { %v3365_v16 = vrot.slane %v5462_v58, %v5784_v6  ;;  %v3369_v23 = vrot.slane %v5462_v58, %v5786_v7  ;;  %v3033_v58 = vld [vmem:[%s6774_s2 + $0x34] sm:$0x3] }
 0x3df   : > { %2740 = vrot.lane.b32.xlu0 %v2732_v30, %s5677_s11  ;;  %s6790_s11 = smov 112  }
 0x3e1   : > { %2843 = vrot.lane.b32.xlu1 %v2835_v31, %s5676_s15  ;;  %s5691_s15 = smov [#allocation3]  }
 0x3e3   : > { %2933 = vrot.lane.b32.xlu0 %v2720_v14, %s5682_s8  ;;  %s5686_s8 = smov 4  }
 0x3e5   : > { %3039 = vrot.lane.b32.xlu1 %v3031_v10, %s5675_s17 }
 0x3e7   : > { %3041 = vrot.lane.b32.xlu0 %v3032_v57, %s5675_s17  ;;  %v2929_v57 = vld [vmem:[%s6774_s2 + $0x32] sm:$0x3] }
 0x3e9   : > { %3037 = vrot.lane.b32.xlu1 %v3030_v33, %s5675_s17  ;;  %s5685_s17 = smov 124  }
 0x3eb   : > { %3127 = vperm.xlu0 %5589, %v2201_v60  }
 0x3ed   : > { %3165 = vrot.lane.b32.xlu1 %v3160_v34, %s5683_s9 }
 0x3ef   : > { %3167 = vrot.lane.b32.xlu0 %v3164_v36, %s5683_s9 }
 0x3f1   : > { %3370 = vrot.lane.b32.xlu1 %v3365_v16, %s5684_s14 }
 0x3f3   : > { %3372 = vrot.lane.b32.xlu0 %v3369_v23, %s5684_s14 }
 0x3f5   : > { %3473 = vrot.lane.b32.xlu1 %v3160_v34, %s5685_s17 }
 0x3f7   : > { %3475 = vrot.lane.b32.xlu0 %v3164_v36, %s5685_s17 }
 0x3f9   : > { %3662 = vrot.lane.b32.xlu1 %v3365_v16, %s5686_s8  ;;  %v3151_v16 = vld [vmem:[#allocation2 + $0x10] sm:$0x3] }
 0x3fb   : > { %3664 = vrot.lane.b32.xlu0 %v3369_v23, %s5686_s8 }
 0x3fd   : > { %3182 = vrot.lane.b32.xlu1 %v3151_v16, %s5687_s16 }
 0x439   : > { %v2244_v15 = vpop.permute.xlu0 %2243 }
 0x43a   : > { %v2248_v49 = vsel %vm2247_vm0, %v2242_v39, %v2244_v15 }
 0x43b   : > { %v2246_v45 = vpop.permute.xlu1 %2245 }
 0x43c   : > { %v2249_v46 = vsel %vm2247_vm0, %v2244_v15, %v2246_v45  ;;  %vm2939_vm0 = vcmask 654336  }
 0x43d   : > { %5427 = vmatprep.subr.msk.mxu1 %vm367_vm8, %v2249_v46  ;;  %v2448_v51 = vpop.permute.xlu0 %2447 }
 0x43e   : > { %5428 = vmatpush1.msk.msra.mxu1 %vm367_vm8, %v2248_v49  ;;  %v2452_v55 = vsel %vm2451_vm15, %v2446_v41, %v2448_v51 }
 0x43f   : > { %v2334_v42 = vpop.permute.xlu1 %2333  ;;  %5429 = vmatmul.mubr.msk.f32.vlgmr.msra.gmra.mxu1 %vm363_vm9, %v2237_v47 }
 0x440   : > { %2525 = vmatprep.mubr.f32.mxu1 %v6296_v56  ;;  %v2338_v14 = vsel %vm2337_vm10, %v2332_v21, %v2334_v42 }
 0x441   : > { %v2739_v59 = vpop.permute.xlu0 %2738 }
 0x443   : > { %v2553_v62 = vpop.permute.xlu1 %2552 }
 0x444   : > { %v2557_v26 = vsel %vm2556_vm14, %v2551_v43, %v2553_v62 }
 0x445   : > { %v2936_v1 = vpop.permute.xlu0 %2935 }
 0x447   : > { %v2842_v53 = vpop.permute.xlu1 %2841 }
 0x449   : > { %v2336_v37 = vpop.permute.xlu0 %2335 }
 0x44a   : > { %v2339_v40 = vsel %vm2337_vm10, %v2334_v42, %v2336_v37 }
 0x44b   : > { %v2450_v17 = vpop.permute.xlu1 %2449  ;;  %5430 = vmatprep.subr.msk.mxu0 %vm367_vm8, %v2339_v40 }
 0x44c   : > { %v2453_v18 = vsel %vm2451_vm15, %v2448_v51, %v2450_v17  ;;  %5431 = vmatpush1.msk.msra.mxu0 %vm367_vm8, %v2338_v14  ;;  %vm3188_vm15 = vcmask 523264  }
 0x44d   : > { %5432 = vmatmul.mubr.msk.f32.vlgmr.msra.gmra.mxu0 %vm363_vm9, %v2236_v12  ;;  %5434 = vmatprep.subr.msk.mxu1 %vm367_vm8, %v2453_v18  ;;  %v2555_v24 = vpop.permute.xlu0 %2554 }
 0x44e   : > { %v2558_v50 = vsel %vm2556_vm14, %v2553_v62, %v2555_v24  ;;  %5435 = vmatpush1.msk.msra.mxu1 %vm367_vm8, %v2452_v55  ;;  %2630 = vmatprep.mubr.f32.mxu0 %v6296_v56  ;;  %vm3495_vm14 = vcmask 31744  }
 0x44f   : > { %v2938_v27 = vpop.permute.xlu1 %2937  ;;  %5436 = vmatmul.mubr.msk.f32.vlgmr.msra.gmra.mxu1 %vm363_vm9, %v2441_v8  ;;  %5437 = vmatprep.subr.msk.mxu0 %vm367_vm8, %v2558_v50 }
 0x450   : > { %5440 = vmatprep.subr.msk.mxu1 %vm367_vm8, %v6227_v5  ;;  %5438 = vmatpush1.msk.msra.mxu0 %vm367_vm8, %v2557_v26  ;;  %v2734_v5 = vld [vmem:[%s6774_s2 + $0x2e] sm:$0x3]  ;;  %v2941_v31 = vsel %vm2939_vm0, %v2936_v1, %v2938_v27 }
 0x451   : > { %5441 = vmatpush1.msk.msra.mxu1 %vm367_vm8, %v6223_v4  ;;  %5439 = vmatmul.mubr.msk.f32.vlgmr.msra.gmra.mxu0 %vm363_vm9, %v2546_v25  ;;  %v2741_v2 = vpop.permute.xlu0 %2740 }
 0x452   : > { %v2744_v29 = vsel %vm2538_vm13, %v2739_v59, %v2741_v2  ;;  %v2745_v30 = vsel %vm2538_vm13, %v2741_v2, %v2743_v11  ;;  %2711 = vmatprep.mubr.f32.mxu1 %v6296_v56  ;;  %2817 = vmatprep.mubr.f32.mxu0 %v6296_v56  ;;  %vm3477_vm13 = vcmask 1014784  }
 0x453   : > { %v2844_v13 = vpop.permute.xlu1 %2843  ;;  %5442 = vmatmul.mubr.msk.f32.vlgmr.msra.gmra.mxu1 %vm363_vm9, %v2639_v28  ;;  %5443 = vmatprep.subr.msk.mxu0 %vm367_vm8, %v2745_v30 }
 0x454   : > { %v2847_v4 = vsel %vm2433_vm11, %v2842_v53, %v2844_v13  ;;  %v2848_v52 = vsel %vm2433_vm11, %v2844_v13, %v2846_v9  ;;  %5444 = vmatpush1.msk.msra.mxu0 %vm367_vm8, %v2744_v29  ;;  %2920 = vmatprep.mubr.f32.mxu1 %v6296_v56  ;;  %v6380_v9 = vld [vmem:[#allocation2 + $0x8] sm:$0x3]  ;;  %vm3278_vm11 = vcmask 556032  }
 0x455   : > { %5445 = vmatmul.mubr.msk.f32.vlgmr.msra.gmra.mxu0 %vm363_vm9, %v2734_v5  ;;  %5446 = vmatprep.subr.msk.mxu1 %vm367_vm8, %v2848_v52  ;;  %v2934_v44 = vpop.permute.xlu0 %2933 }
 0x456   : > { %5449 = vmatprep.subr.msk.mxu0 %vm367_vm8, %v2941_v31  ;;  %v2940_v10 = vsel %vm2939_vm0, %v2934_v44, %v2936_v1  ;;  %5447 = vmatpush1.msk.msra.mxu1 %vm367_vm8, %v2847_v4 }
 0x457   : > { %v3040_v32 = vpop.permute.xlu1 %3039  ;;  %5448 = vmatmul.mubr.msk.f32.vlgmr.msra.gmra.mxu1 %vm363_vm9, %v2837_v54  ;;  %5450 = vmatpush1.msk.msra.mxu0 %vm367_vm8, %v2940_v10 }
 0x458   : > { %3013 = vmatprep.mubr.f32.mxu0 %v6296_v56  ;;  %3116 = vmatprep.mubr.f32.mxu1 %v6296_v56 }
 0x459   : > { %5451 = vmatmul.mubr.msk.f32.vlgmr.msra.gmra.mxu0 %vm363_vm9, %v2929_v57  ;;  %v3042_v33 = vpop.permute.xlu0 %3041 }
 0x45a   : > { %v3044_v60 = vsel %vm2228_vm12, %v3040_v32, %v3042_v33  ;;  %3262 = vmatprep.mubr.f32.mxu0 %v6296_v56 }
 0x45b   : > { %v3038_v34 = vpop.permute.xlu1 %3037  ;;  %5452 = vmatprep.subr.msk.mxu1 %vm367_vm8, %v3044_v60 }
 0x45c   : > { %v3043_v36 = vsel %vm2228_vm12, %v3038_v34, %v3040_v32  ;;  %vm3169_vm12 = vcmask 490496  }
 0x45d   : > { %5453 = vmatpush1.msk.msra.mxu1 %vm367_vm8, %v3043_v36 }
 0x45e   : > { %5454 = vmatmul.mubr.msk.f32.vlgmr.msra.gmra.mxu1 %vm363_vm9, %v3033_v58 }
 0x45f   : > { %3352 = vmatprep.mubr.f32.mxu1 %v6296_v56  ;;  %v6371_v23 = vpop.permute.xlu1 %3165 }
 0x460   : > { %v3174_v39 = vmul.f32 %v6371_v23, %v3151_v16 }
 0x462   : > { %3272 = vrot.lane.b32.xlu0 %v3174_v39, %s5684_s14 }
 0x463   : > { %v6376_v21 = vpop.permute.xlu1 %3370 }
 0x464   : > { %v3378_v43 = vmul.f32 %v6376_v21, %v3151_v16 }
 0x466   : > { %v3128_v41 = vpop.permute.xlu0 %3127  ;;  %3385 = vrot.lane.b32.xlu1 %v3378_v43, %s5683_s9 }
 0x467   : > { %v6389_v46 = vpop.permute.xlu1 %3473 }
 0x468   : > { %v3482_v49 = vmul.f32 %v6389_v46, %v3151_v16 }
 0x46a   : > { %v6382_v11 = vpop.permute.xlu0 %3167  ;;  %3489 = vrot.lane.b32.xlu0 %v3482_v49, %s5686_s8 }
 0x46b   : > { %v3767_v15 = vmul.f32 %v6380_v9, %v6382_v11 }
 0x46d   : > { %3776 = vrot.lane.b32.xlu1 %v3767_v15, %s5684_s14 }
 0x46e   : > { %v6387_v45 = vpop.permute.xlu0 %3372 }
 0x472   : > { %v6391_v47 = vpop.permute.xlu0 %3475 }
 0x476   : > { %v6395_v51 = vpop.permute.xlu0 %3664 }
 0x477   : > { %v3672_v42 = vmul.f32 %v6395_v51, %v6380_v9 }
 0x479   : > { %3681 = vrot.lane.b32.xlu0 %v3672_v42, %s5685_s17 }
 0x4ff   : > { %v2323_v59 = vpop.f32.mrf.mxu1 }
 0x501   : > { %v2325_v62 = vpop.f32.mrf.mxu1 }
 0x50d   : > { %v2413_v1 = vpop.f32.mrf.mxu0 }
 0x50e   : > { %v2414_v53 = vadd.f32 %v2413_v1, %v2323_v59 }
 0x50f   : > { %v2415_v37 = vpop.f32.mrf.mxu0  ;;  %v2527_v40 = vpop.f32.mrf.mxu1 }
 0x510   : > { %v2416_v12 = vadd.f32 %v2415_v37, %v2325_v62  ;;  %v2532_v14 = vadd.f32 %v2527_v40, %v2414_v53  ;;  %v3374_v53 = vsel %vm3278_vm11, %v6376_v21, %v6387_v45  ;;  %v3170_v40 = vsel %vm3169_vm12, %v6371_v23, %v6382_v11 }
 0x511   : > { %v2529_v17 = vpop.f32.mrf.mxu1  ;;  %v2632_v18 = vpop.f32.mrf.mxu0 }
 0x512   : > { %v2533_v8 = vadd.f32 %v2529_v17, %v2416_v12  ;;  %v2637_v55 = vadd.f32 %v2632_v18, %v2532_v14  ;;  %v3663_v17 = vpop.permute.xlu1 %3662 }
 0x513   : > { %v2634_v24 = vpop.f32.mrf.mxu0  ;;  %v2713_v50 = vpop.f32.mrf.mxu1 }
 0x514   : > { %v2638_v25 = vadd.f32 %v2634_v24, %v2533_v8  ;;  %v2718_v26 = vadd.f32 %v2713_v50, %v2637_v55  ;;  %v3478_v8 = vsel %vm3477_vm13, %v6389_v46, %v6391_v47 }
 0x515   : > { %v2715_v27 = vpop.f32.mrf.mxu1  ;;  %v2819_v28 = vpop.f32.mrf.mxu0 }
 0x516   : > { %v2719_v2 = vadd.f32 %v2715_v27, %v2638_v25  ;;  %v2824_v29 = vadd.f32 %v2819_v28, %v2718_v26 }
 0x517   : > { %v2821_v30 = vpop.f32.mrf.mxu0  ;;  %v2922_v5 = vpop.f32.mrf.mxu1 }
 0x518   : > { %v2825_v13 = vadd.f32 %v2821_v30, %v2719_v2  ;;  %v2927_v4 = vadd.f32 %v2922_v5, %v2824_v29  ;;  %v3142_v2 = vld [vmem:[%s6775_s3 + $0x6] sm:$0x3]  ;;  %v6467_v29 = vld [vmem:[%s6773_s1 + $0x8] sm:$0xff] }
 0x519   : > { %v2924_v52 = vpop.f32.mrf.mxu1  ;;  %v3015_v54 = vpop.f32.mrf.mxu0 }
 0x51a   : > { %v2928_v31 = vadd.f32 %v2924_v52, %v2825_v13  ;;  %v3020_v10 = vadd.f32 %v3015_v54, %v2927_v4 }
 0x51b   : > { %v3017_v44 = vpop.f32.mrf.mxu0 }
 0x51c   : > { %v3021_v32 = vadd.f32 %v3017_v44, %v2928_v31  ;;  %v3178_v31 = vld [vmem:[%s6774_s2 + $0x38] sm:$0x3] }
 0x51e   : > { %v3118_v57 = vpop.f32.mrf.mxu1 }
 0x51f   : > { %v3123_v33 = vadd.f32 %v3118_v57, %v3020_v10 }
 0x520   : > { %v3120_v60 = vpop.f32.mrf.mxu1 }
 0x521   : > { %v6400_v34 = vadd.f32 %v3128_v41, %v3123_v33  ;;  %v3124_v58 = vadd.f32 %v3120_v60, %v3021_v32 }
 0x523   : > { %v3132_v36 = vmax.f32 %v6400_v34, 0.0  ;;  %v6403_v16 = vadd.f32 %v3128_v41, %v3124_v58 }
 0x525   : > { %v3136_v39 = vrot.slane %v3132_v36, 2  ;;  %v3133_v43 = vmax.f32 %v6403_v16, 0.0 }
 0x527   : > { %v3140_v15 = vadd.f32 %v3136_v39, %v5825_v35  ;;  %v3137_v49 = vrot.slane %v3133_v43, 2 }
 0x529   : > { %v3145_v42 = vrot.slane %v3140_v15, 6  ;;  %v3141_v59 = vadd.f32 %v3137_v49, %v5830_v38  ;;  %v3177_v49 = vld [vmem:[%s6774_s2 + $0x36] sm:$0x3] }
 0x52b   : > { %3149 = vst [vmem:[#allocation2] sm:$0x3] %v3145_v42  ;;  %v3146_v62 = vrot.slane %v3141_v59, 6 }
 0x52d   : > { %3150 = vst [vmem:[#allocation2 + $0x18] sm:$0x3] %v3146_v62 }
 0x532   : > { %v6412_v1 = vld [vmem:[#allocation2] sm:$0x3] }
 0x533   : > { %3184 = vrot.lane.b32.xlu1 %v6412_v1, %s5687_s16  ;;  %v3379_v37 = vmul.f32 %v3374_v53, %v6412_v1  ;;  %v3659_v12 = vld [vmem:[#allocation2] sm:$0x3]  ;;  %v3175_v14 = vmul.f32 %v3170_v40, %v6412_v1  ;;  %v3483_v55 = vmul.f32 %v3478_v8, %v6412_v1  ;;  %v3578_v8 = vld [vmem:[%s6774_s2 + $0x3e] sm:$0x3] }
 0x534   : > { %v6416_v41 = vld [vmem:[#allocation2 + $0x18] sm:$0x3]  ;;  %v3670_v18 = vmul.f32 %v3663_v17, %v3659_v12  ;;  %v3765_v50 = vmul.f32 %v3659_v12, %v6371_v23  ;;  %v3666_v23 = vsel %vm3495_vm14, %v3663_v17, %v6395_v51  ;;  %v3952_v51 = vmul.f32 %v3659_v12, %v6376_v21  ;;  %v3183_v21 = vpop.permute.xlu1 %3182 }
 0x535   : > { %3186 = vrot.lane.b32.xlu0 %v6416_v41, %s5687_s16  ;;  %v3660_v24 = vld [vmem:[#allocation2 + $0x18] sm:$0x3]  ;;  %v3176_v25 = vmul.f32 %v6382_v11, %v6416_v41  ;;  %v3380_v26 = vmul.f32 %v6387_v45, %v6416_v41  ;;  %v3484_v46 = vmul.f32 %v6391_v47, %v6416_v41  ;;  %v3954_v47 = vmul.f32 %v6380_v9, %v6387_v45 }
 0x536   : > { %v3671_v27 = vmul.f32 %v3666_v23, %v3660_v24  ;;  %v3766_v11 = vmul.f32 %v3660_v24, %v3170_v40  ;;  %v3953_v28 = vmul.f32 %v3660_v24, %v3374_v53  ;;  %v3381_v53 = vld [vmem:[%s6774_s2 + $0x3a] sm:$0x3] }
 0x537   : > { %3387 = vrot.lane.b32.xlu1 %v3379_v37, %s5683_s9 }
 0x538   : > { %v3386_v45 = vpop.permute.xlu1 %3385 }
 0x539   : > { %3274 = vrot.lane.b32.xlu0 %v3175_v14, %s5684_s14  ;;  %v3485_v14 = vld [vmem:[%s6774_s2 + $0x3c] sm:$0x3] }
 0x53b   : > { %3677 = vrot.lane.b32.xlu1 %v3670_v18, %s5685_s17 }
 0x53c   : > { %v3777_v5 = vpop.permute.xlu1 %3776 }
 0x53d   : > { %3491 = vrot.lane.b32.xlu0 %v3483_v55, %s5686_s8 }
 0x53f   : > { %3866 = vrot.lane.b32.xlu1 %v3660_v24, %s5687_s16 }
 0x541   : > { %3772 = vrot.lane.b32.xlu0 %v3765_v50, %s5684_s14 }
 0x543   : > { %3276 = vrot.lane.b32.xlu1 %v3176_v25, %s5684_s14 }
 0x545   : > { %3389 = vrot.lane.b32.xlu0 %v3380_v26, %s5683_s9 }
 0x547   : > { %3493 = vrot.lane.b32.xlu1 %v3484_v46, %s5686_s8  ;;  %v3768_v46 = vld [vmem:[%s6774_s2 + $0x42] sm:$0x3] }
 0x549   : > { %3868 = vrot.lane.b32.xlu0 %v6380_v9, %s5687_s16  ;;  %v3273_v9 = vpop.permute.xlu0 %3272 }
 0x54b   : > { %3679 = vrot.lane.b32.xlu1 %v3671_v27, %s5685_s17 }
 0x54d   : > { %3774 = vrot.lane.b32.xlu0 %v3766_v11, %s5684_s14  ;;  %v3490_v30 = vpop.permute.xlu0 %3489 }
 0x54f   : > { %3864 = vrot.lane.b32.xlu1 %v3659_v12, %s5687_s16 }
 0x551   : > { %3961 = vrot.lane.b32.xlu0 %v3953_v28, %s5683_s9  ;;  %v3682_v13 = vpop.permute.xlu0 %3681  ;;  %v3860_v28 = vld [vmem:[%s6774_s2 + $0x44] sm:$0x3] }
 0x553   : > { %3963 = vrot.lane.b32.xlu1 %v3954_v47, %s5683_s9 }
 0x555   : > { %3959 = vrot.lane.b32.xlu0 %v3952_v51, %s5683_s9 }
 0x557   : > { %4049 = vperm.xlu1 %5588, %v3142_v2  }
 0x559   : > { %4058 = vrot.lane.b32.xlu0 %v6467_v29, %s5669_s10  ;;  %s6788_s10 = smov 17  }
 0x55b   : > { %4214 = vrot.lane.b32.xlu1 %v6467_v29, %s5685_s17  ;;  %s6789_s17 = smov 16  }
 0x55d   : > { %4295 = vrot.lane.b32.xlu0 %v6467_v29, %s5688_s7 }
 0x5a5   : > { %v3185_v4 = vpop.permute.xlu1 %3184 }
 0x5a6   : > { %v3189_v44 = vsel %vm3188_vm15, %v3183_v21, %v3185_v4 }
 0x5a7   : > { %v3187_v52 = vpop.permute.xlu0 %3186 }
 0x5a8   : > { %v3190_v54 = vsel %vm3188_vm15, %v3185_v4, %v3187_v52 }
 0x5a9   : > { %v3388_v10 = vpop.permute.xlu1 %3387  ;;  %5456 = vmatprep.subr.msk.mxu0 %vm367_vm8, %v3190_v54 }
 0x5aa   : > { %5457 = vmatpush1.msk.msra.mxu0 %vm367_vm8, %v3189_v44  ;;  %v3391_v37 = vsel %vm3169_vm12, %v3386_v45, %v3388_v10 }
 0x5ab   : > { %v3275_v57 = vpop.permute.xlu0 %3274  ;;  %5458 = vmatmul.mubr.msk.f32.vlgmr.msra.gmra.mxu0 %vm363_vm9, %v3178_v31 }
 0x5ac   : > { %3464 = vmatprep.mubr.f32.mxu0 %v6296_v56  ;;  %v3279_v42 = vsel %vm3278_vm11, %v3273_v9, %v3275_v57 }
 0x5ad   : > { %v3678_v32 = vpop.permute.xlu1 %3677 }
 0x5af   : > { %v3492_v33 = vpop.permute.xlu0 %3491 }
 0x5b0   : > { %v3496_v17 = vsel %vm3495_vm14, %v3490_v30, %v3492_v33 }
 0x5b1   : > { %v3867_v60 = vpop.permute.xlu1 %3866 }
 0x5b3   : > { %v3773_v58 = vpop.permute.xlu0 %3772 }
 0x5b5   : > { %v3277_v39 = vpop.permute.xlu1 %3276 }
 0x5b6   : > { %v3280_v15 = vsel %vm3278_vm11, %v3275_v57, %v3277_v39 }
 0x5b7   : > { %5459 = vmatprep.subr.msk.mxu1 %vm367_vm8, %v3280_v15  ;;  %v3390_v59 = vpop.permute.xlu0 %3389 }
 0x5b8   : > { %v3392_v62 = vsel %vm3169_vm12, %v3388_v10, %v3390_v59  ;;  %5460 = vmatpush1.msk.msra.mxu1 %vm367_vm8, %v3279_v42 }
 0x5b9   : > { %v3494_v40 = vpop.permute.xlu1 %3493  ;;  %5461 = vmatmul.mubr.msk.f32.vlgmr.msra.gmra.mxu1 %vm363_vm9, %v3177_v49  ;;  %5463 = vmatprep.subr.msk.mxu0 %vm367_vm8, %v3392_v62 }
 0x5ba   : > { %v3497_v12 = vsel %vm3495_vm14, %v3492_v33, %v3494_v40  ;;  %5464 = vmatpush1.msk.msra.mxu0 %vm367_vm8, %v3391_v37  ;;  %3569 = vmatprep.mubr.f32.mxu1 %v6296_v56 }
 0x5bb   : > { %5465 = vmatmul.mubr.msk.f32.vlgmr.msra.gmra.mxu0 %vm363_vm9, %v3381_v53  ;;  %5466 = vmatprep.subr.msk.mxu1 %vm367_vm8, %v3497_v12  ;;  %v3869_v18 = vpop.permute.xlu0 %3868 }
 0x5bc   : > { %5469 = vmatprep.subr.msk.mxu0 %vm367_vm8, %v6416_v41  ;;  %5467 = vmatpush1.msk.msra.mxu1 %vm367_vm8, %v3496_v17  ;;  %v3673_v41 = vld [vmem:[%s6774_s2 + $0x40] sm:$0x3]  ;;  %v3871_v23 = vsel %vm3188_vm15, %v3867_v60, %v3869_v18 }
 0x5bd   : > { %5470 = vmatpush1.msk.msra.mxu0 %vm367_vm8, %v6412_v1  ;;  %v3680_v55 = vpop.permute.xlu1 %3679  ;;  %5468 = vmatmul.mubr.msk.f32.vlgmr.msra.gmra.mxu1 %vm363_vm9, %v3485_v14 }
 0x5be   : > { %v3683_v24 = vsel %vm3477_vm13, %v3678_v32, %v3680_v55  ;;  %v3684_v50 = vsel %vm3477_vm13, %v3680_v55, %v3682_v13  ;;  %3650 = vmatprep.mubr.f32.mxu0 %v6296_v56  ;;  %3756 = vmatprep.mubr.f32.mxu1 %v6296_v56 }
 0x5bf   : > { %5471 = vmatmul.mubr.msk.f32.vlgmr.msra.gmra.mxu0 %vm363_vm9, %v3578_v8  ;;  %5472 = vmatprep.subr.msk.mxu1 %vm367_vm8, %v3684_v50  ;;  %v3775_v1 = vpop.permute.xlu0 %3774 }
 0x5c0   : > { %v3778_v25 = vsel %vm3278_vm11, %v3773_v58, %v3775_v1  ;;  %v3779_v26 = vsel %vm3278_vm11, %v3775_v1, %v3777_v5  ;;  %5473 = vmatpush1.msk.msra.mxu1 %vm367_vm8, %v3683_v24  ;;  %3851 = vmatprep.mubr.f32.mxu0 %v6296_v56 }
 0x5c1   : > { %v3865_v27 = vpop.permute.xlu1 %3864  ;;  %5474 = vmatmul.mubr.msk.f32.vlgmr.msra.gmra.mxu1 %vm363_vm9, %v3673_v41  ;;  %5475 = vmatprep.subr.msk.mxu0 %vm367_vm8, %v3779_v26 }
 0x5c2   : > { %v3870_v11 = vsel %vm3188_vm15, %v3865_v27, %v3867_v60  ;;  %5478 = vmatprep.subr.msk.mxu1 %vm367_vm8, %v3871_v23  ;;  %5476 = vmatpush1.msk.msra.mxu0 %vm367_vm8, %v3778_v25 }
 0x5c3   : > { %5477 = vmatmul.mubr.msk.f32.vlgmr.msra.gmra.mxu0 %vm363_vm9, %v3768_v46  ;;  %5479 = vmatpush1.msk.msra.mxu1 %vm367_vm8, %v3870_v11  ;;  %v3962_v47 = vpop.permute.xlu0 %3961 }
 0x5c4   : > { %3943 = vmatprep.mubr.f32.mxu1 %v6296_v56  ;;  %5484 = vmatprep.subr.msk.mxu1 %vm367_vm8, %v2190_v20  ;;  %v3955_v20 = vld [vmem:[%s6774_s2 + $0x46] sm:$0x3] }
 0x5c5   : > { %v3964_v51 = vpop.permute.xlu1 %3963  ;;  %5480 = vmatmul.mubr.msk.f32.vlgmr.msra.gmra.mxu1 %vm363_vm9, %v3860_v28  ;;  %4038 = vmatprep.mubr.f32.mxu0 %v6296_v56 }
 0x5c6   : > { %v3966_v2 = vsel %vm3169_vm12, %v3962_v47, %v3964_v51  ;;  %5485 = vmatpush1.msk.msra.mxu1 %vm367_vm8, %v2189_v48  ;;  %4130 = vmatprep.mubr.f32.mxu1 %v6296_v56  ;;  %v5689_v48 = vmov 1  }
 0x5c7   : > { %5490 = vmatprep.subr.msk.mxu1 %vm367_vm8, %v3133_v43  ;;  %5481 = vmatprep.subr.msk.mxu0 %vm367_vm8, %v3966_v2  ;;  %v3960_v22 = vpop.permute.xlu0 %3959 }
 0x5c8   : > { %v3965_v21 = vsel %vm3169_vm12, %v3960_v22, %v3962_v47  ;;  %5590 = vset.pattern.permute.xlu1 %v5689_v48 }
 0x5c9   : > { %5482 = vmatpush1.msk.msra.mxu0 %vm367_vm8, %v3965_v21 }
 0x5ca   : > { %5483 = vmatmul.mubr.msk.f32.vlgmr.msra.gmra.mxu0 %vm363_vm9, %v3955_v20  ;;  %5487 = vmatprep.subr.msk.mxu0 %vm367_vm8, %v1248_v3  ;;  %v4395_v3 = vld [vmem:[%s6776_s4] ss:$8 sm:$0x3] }
 0x5cb   : > { %5488 = vmatpush1.msk.msra.mxu0 %vm367_vm8, %v1247_v63  ;;  %v4059_v19 = vpop.permute.xlu0 %4058  ;;  %4207 = vmatprep.mubr.f32.mxu0 %v6296_v56  ;;  %v6585_v63 = vld [vmem:[%s6775_s3] sm:$0xff]  ;;  %v4400_v34 = vrot.slane %v4395_v3, %v5784_v6  ;;  %v4404_v16 = vrot.slane %v4395_v3, %v5786_v7 }
 0x5cc   : > { %5486 = vmatmul.mubr.msk.f32.vlgmr.msra.gmra.mxu1 %vm363_vm9, %v4059_v19  ;;  %4381 = vperm.xlu1 %5590, %v6585_v63  }
 0x5cd   : > { %5491 = vmatpush1.msk.msra.mxu1 %vm367_vm8, %v3132_v36  ;;  %4286 = vmatprep.mubr.f32.mxu1 %v6296_v56  ;;  %v5498_v36 = vld [vmem:[%s6776_s4 + $0x1] ss:$8 sm:$0x3] }
 0x5ce   : > { %5489 = vmatmul.mubr.msk.f32.vlgmr.msra.gmra.mxu0 %vm363_vm9, %v6467_v29  ;;  %4405 = vrot.lane.b32.xlu0 %v4400_v34, %s5658_s23  ;;  %v4597_v43 = vrot.slane %v5498_v36, %v5784_v6  ;;  %v4601_v29 = vrot.slane %v5498_v36, %v5786_v7 }
 0x5cf   : > { %4369 = vmatprep.mubr.f32.mxu0 %v6296_v56  ;;  %v4296_v40 = vpop.permute.xlu0 %4295 }
 0x5d0   : > { %4407 = vrot.lane.b32.xlu1 %v4404_v16, %s5658_s23 }
 0x5d2   : > { %v6578_v0 = vpop.permute.xlu1 %4049  ;;  %4602 = vrot.lane.b32.xlu0 %v4597_v43, %s5659_s25 }
 0x5d4   : > { %4604 = vrot.lane.b32.xlu1 %v4601_v29, %s5659_s25 }
 0x5d6   : > { %v4215_v61 = vpop.permute.xlu1 %4214  ;;  %4703 = vrot.lane.b32.xlu0 %v4400_v34, %s5660_s26 }
 0x5d7   : > { %5492 = vmatmul.mubr.msk.f32.vlgmr.msra.gmra.mxu1 %vm363_vm9, %v4215_v61 }
 0x5d8   : > { %4498 = vmatprep.mubr.f32.mxu1 %v6296_v56  ;;  %4705 = vrot.lane.b32.xlu1 %v4404_v16, %s5660_s26 }
 0x5da   : > { %4884 = vrot.lane.b32.xlu0 %v4597_v43, %s5661_s30 }
 0x5dc   : > { %4886 = vrot.lane.b32.xlu1 %v4601_v29, %s5661_s30 }
 0x5de   : > { %4985 = vrot.lane.b32.xlu0 %v4400_v34, %s5662_s6 }
 0x5e0   : > { %4987 = vrot.lane.b32.xlu1 %v4404_v16, %s5662_s6 }
 0x5e2   : > { %5176 = vrot.lane.b32.xlu0 %v4597_v43, %s6788_s10 }
 0x5e4   : > { %5178 = vrot.lane.b32.xlu1 %v4601_v29, %s6788_s10 }
 0x5e6   : > { %4421 = vrot.lane.b32.xlu0 %v6296_v56, %s6789_s17 }
 0x640   : > { %v4406_v8 = vpop.permute.xlu0 %4405 }
 0x641   : > { %v4413_v50 = vmul.f32 %v6296_v56, %v4406_v8 }
 0x643   : > { %4508 = vrot.lane.b32.xlu1 %v4413_v50, %s6788_s10 }
 0x644   : > { %v4603_v46 = vpop.permute.xlu0 %4602 }
 0x645   : > { %v4610_v23 = vmul.f32 %v6296_v56, %v4603_v46 }
 0x647   : > { %4617 = vrot.lane.b32.xlu0 %v4610_v23, %s5662_s6  ;;  %v4382_v28 = vpop.permute.xlu1 %4381 }
 0x648   : > { %v4704_v22 = vpop.permute.xlu0 %4703 }
 0x649   : > { %v4711_v20 = vmul.f32 %v6296_v56, %v4704_v22 }
 0x64b   : > { %v4408_v47 = vpop.permute.xlu1 %4407  ;;  %4718 = vrot.lane.b32.xlu1 %v4711_v20, %s5661_s30 }
 0x64f   : > { %v4605_v51 = vpop.permute.xlu1 %4604 }
 0x653   : > { %v4706_v2 = vpop.permute.xlu1 %4705 }
 0x657   : > { %v4887_v21 = vpop.permute.xlu1 %4886 }
 0x658   : > { %v4894_v19 = vmul.f32 %v6296_v56, %v4887_v21 }
 0x65a   : > { %4903 = vrot.lane.b32.xlu1 %v4894_v19, %s5660_s26 }
 0x66b   : > { %v3264_v6 = vpop.f32.mrf.mxu0 }
 0x66d   : > { %v3266_v7 = vpop.f32.mrf.mxu0 }
 0x679   : > { %v3354_v9 = vpop.f32.mrf.mxu1 }
 0x67a   : > { %v3355_v45 = vadd.f32 %v3354_v9, %v3264_v6 }
 0x67b   : > { %v3356_v30 = vpop.f32.mrf.mxu1  ;;  %v3466_v5 = vpop.f32.mrf.mxu0 }
 0x67c   : > { %v3357_v13 = vadd.f32 %v3356_v30, %v3266_v7  ;;  %v3471_v4 = vadd.f32 %v3466_v5, %v3355_v45 }
 0x67d   : > { %v3468_v52 = vpop.f32.mrf.mxu0  ;;  %v3571_v54 = vpop.f32.mrf.mxu1 }
 0x67e   : > { %v3472_v31 = vadd.f32 %v3468_v52, %v3357_v13  ;;  %v3576_v44 = vadd.f32 %v3571_v54, %v3471_v4 }
 0x67f   : > { %v3573_v10 = vpop.f32.mrf.mxu1  ;;  %v3652_v57 = vpop.f32.mrf.mxu0 }
 0x680   : > { %v3577_v32 = vadd.f32 %v3573_v10, %v3472_v31  ;;  %v3657_v33 = vadd.f32 %v3652_v57, %v3576_v44  ;;  %v4606_v57 = vsel %vm548_vm1, %v4603_v46, %v4605_v51 }
 0x681   : > { %v3654_v60 = vpop.f32.mrf.mxu0  ;;  %v3758_v58 = vpop.f32.mrf.mxu1 }
 0x682   : > { %v3658_v39 = vadd.f32 %v3654_v60, %v3577_v32  ;;  %v3763_v15 = vadd.f32 %v3758_v58, %v3657_v33  ;;  %v4707_v58 = vsel %vm653_vm3, %v4704_v22, %v4706_v2 }
 0x683   : > { %v3760_v49 = vpop.f32.mrf.mxu1  ;;  %v3853_v42 = vpop.f32.mrf.mxu0 }
 0x684   : > { %v3764_v59 = vadd.f32 %v3760_v49, %v3658_v39  ;;  %v3858_v62 = vadd.f32 %v3853_v42, %v3763_v15 }
 0x685   : > { %v3855_v53 = vpop.f32.mrf.mxu0  ;;  %v3945_v37 = vpop.f32.mrf.mxu1 }
 0x686   : > { %v3859_v12 = vadd.f32 %v3855_v53, %v3764_v59  ;;  %v3950_v17 = vadd.f32 %v3945_v37, %v3858_v62 }
 0x687   : > { %v3947_v14 = vpop.f32.mrf.mxu1 }
 0x688   : > { %v3951_v55 = vadd.f32 %v3947_v14, %v3859_v12 }
 0x68a   : > { %v4040_v18 = vpop.f32.mrf.mxu0 }
 0x68b   : > { %v4045_v24 = vadd.f32 %v4040_v18, %v3950_v17 }
 0x68c   : > { %v4042_v41 = vpop.f32.mrf.mxu0  ;;  %v4132_v3 = vpop.f32.mrf.mxu1 }
 0x68d   : > { %v4046_v1 = vadd.f32 %v4042_v41, %v3951_v55  ;;  %v4052_v25 = vadd.f32 %v6578_v0, %v4045_v24 }
 0x68e   : > { %v4134_v48 = vpop.f32.mrf.mxu1  ;;  %v4209_v34 = vpop.f32.mrf.mxu0 }
 0x68f   : > { %v4053_v26 = vadd.f32 %v6578_v0, %v4046_v1  ;;  %v4054_v11 = vmax.f32 %v4052_v25, 0.0  ;;  %v4988_v0 = vpop.permute.xlu1 %4987  ;;  %v4210_v43 = vadd.f32 %v4209_v34, %v4132_v3  ;;  %v4416_v3 = vld [vmem:[%s6773_s1 + $0x10] sm:$0xff] }
 0x690   : > { %v4995_v61 = vmul.f32 %v6296_v56, %v4988_v0  ;;  %v4211_v36 = vpop.f32.mrf.mxu0 }
 0x691   : > { %v4055_v27 = vmax.f32 %v4053_v26, 0.0  ;;  %v4212_v29 = vadd.f32 %v4211_v36, %v4134_v48 }
 0x692   : > { %5004 = vrot.lane.b32.xlu0 %v4995_v61, %s5659_s25 }
 0x693   : > { %5493 = vmatprep.subr.msk.mxu0 %vm367_vm8, %v4055_v27  ;;  %v5179_v12 = vpop.permute.xlu1 %5178 }
 0x694   : > { %5494 = vmatpush1.msk.msra.mxu0 %vm367_vm8, %v4054_v11  ;;  %v5186_v24 = vmul.f32 %v6296_v56, %v5179_v12  ;;  %vm6791_vm8 = vcmask 64512  }
 0x695   : > { %5495 = vmatmul.mubr.msk.f32.vlgmr.msra.gmra.mxu0 %vm363_vm9, %v4296_v40  ;;  %vm6796_vm9 = vcmask 916480  }
 0x696   : > { %4585 = vmatprep.mubr.f32.mxu0 %v6296_v56 }
 0x697   : > { %v4288_v16 = vpop.f32.mrf.mxu1 }
 0x698   : > { %v4293_v7 = vadd.f32 %v4288_v16, %v4210_v43 }
 0x699   : > { %v4290_v6 = vpop.f32.mrf.mxu1 }
 0x69a   : > { %v4294_v45 = vadd.f32 %v4290_v6, %v4212_v29  ;;  %v4613_v29 = vld [vmem:[%s6773_s1 + $0x20] sm:$0xff] }
 0x6b5   : > { %v4509_v1 = vpop.permute.xlu1 %4508 }
 0x6bd   : > { %v4719_v26 = vpop.permute.xlu1 %4718 }
 0x6cc   : > { %v4904_v23 = vpop.permute.xlu1 %4903 }
 0x755   : > { %v4371_v9 = vpop.f32.mrf.mxu0 }
 0x756   : > { %v4376_v30 = vadd.f32 %v4371_v9, %v4293_v7  ;;  %v4714_v7 = vld [vmem:[%s6773_s1 + $0x28] sm:$0xff] }
 0x757   : > { %v4373_v5 = vpop.f32.mrf.mxu0 }
 0x758   : > { %v4384_v13 = vadd.f32 %v4382_v28, %v4376_v30  ;;  %v4377_v4 = vadd.f32 %v4373_v5, %v4294_v45  ;;  %v4804_v5 = vld [vmem:[%s6773_s1 + $0x30] sm:$0xff] }
 0x75a   : > { %v4386_v52 = vmax.f32 %v4384_v13, 0.0  ;;  %v4385_v54 = vadd.f32 %v4382_v28, %v4377_v4 }
 0x75c   : > { %v6629_v31 = vadd.f32 %v4386_v52, %v5825_v35  ;;  %v4387_v44 = vmax.f32 %v4385_v54, 0.0  ;;  %v4409_v35 = vsel %vm341_vm2, %v4406_v8, %v4408_v47  ;;  %v5690_v8 = vmov 2   ;;  %v4895_v54 = vld [vmem:[%s6773_s1 + $0x38] sm:$0xff] }
 0x75d   : > { %5591 = vset.pattern.permute.xlu0 %v5690_v8 }
 0x75e   : > { %4390 = vst [vmem:[#allocation2] sm:$0xff] %v6629_v31  ;;  %v6633_v10 = vadd.f32 %v4387_v44, %v5830_v38  ;;  %4423 = vrot.lane.b32.xlu0 %v6629_v31, %s6789_s17  ;;  %v4611_v32 = vmul.f32 %v4606_v57, %v6629_v31  ;;  %v4414_v33 = vmul.f32 %v4409_v35, %v6629_v31  ;;  %v4885_v38 = vpop.permute.xlu0 %4884 }
 0x75f   : > { %v4892_v60 = vmul.f32 %v4885_v38, %v6629_v31  ;;  %v4712_v39 = vmul.f32 %v4707_v58, %v6629_v31  ;;  %v4888_v53 = vsel %vm671_vm4, %v4885_v38, %v4887_v21  ;;  %v5086_v38 = vld [vmem:[%s6773_s1 + $0x48] sm:$0xff] }
 0x760   : > { %4391 = vst [vmem:[#allocation2 + $0x18] sm:$0xff] %v6633_v10  ;;  %4425 = vrot.lane.b32.xlu1 %v6633_v10, %s6789_s17  ;;  %v4415_v42 = vmul.f32 %v4408_v47, %v6633_v10  ;;  %v4612_v59 = vmul.f32 %v4605_v51, %v6633_v10  ;;  %v4713_v62 = vmul.f32 %v4706_v2, %v6633_v10  ;;  %v4417_v47 = vld [vmem:[%s6773_s1 + $0x18] sm:$0xff] }
 0x761   : > { %v4893_v37 = vmul.f32 %v4888_v53, %v6633_v10 }
 0x762   : > { %4619 = vrot.lane.b32.xlu0 %v4611_v32, %s5662_s6  ;;  %v4986_v15 = vpop.permute.xlu0 %4985  ;;  %v4996_v32 = vld [vmem:[%s6773_s1 + $0x40] sm:$0xff] }
 0x763   : > { %v4993_v49 = vmul.f32 %v4986_v15, %v6629_v31  ;;  %v4989_v14 = vsel %vm566_vm5, %v4986_v15, %v4988_v0 }
 0x764   : > { %4510 = vrot.lane.b32.xlu1 %v4414_v33, %s6788_s10  ;;  %v4994_v17 = vmul.f32 %v4989_v14, %v6633_v10 }
 0x766   : > { %4899 = vrot.lane.b32.xlu0 %v4892_v60, %s5660_s26  ;;  %v5177_v40 = vpop.permute.xlu0 %5176  ;;  %v5593_v60 = vld [vmem:[#allocation2 + $0x10] sm:$0xff] }
 0x767   : > { %v5180_v18 = vsel %vm452_vm6, %v5177_v40, %v5179_v12  ;;  %v5184_v50 = vmul.f32 %v5177_v40, %v6629_v31 }
 0x768   : > { %4720 = vrot.lane.b32.xlu1 %v4712_v39, %s5661_s30  ;;  %v5185_v55 = vmul.f32 %v5180_v18, %v6633_v10 }
 0x76a   : > { %5092 = vrot.lane.b32.xlu0 %v6633_v10, %s6790_s11  ;;  %v4422_v41 = vpop.permute.xlu0 %4421 }
 0x76c   : > { %5000 = vrot.lane.b32.xlu1 %v4993_v49, %s5659_s25 }
 0x76e   : > { %4512 = vrot.lane.b32.xlu0 %v4415_v42, %s6788_s10  ;;  %v4618_v25 = vpop.permute.xlu0 %4617 }
 0x770   : > { %4621 = vrot.lane.b32.xlu1 %v4612_v59, %s5662_s6  ;;  %s5512_s6 = sshll.u32 %s5743_s22, 8  ;;  %s5598_s22 = sshll.u32 %s5691_s15, 4  ;;  %s5599_s22 = int_to_ptr.vmem [resolvable:$false] %s5598_s22 }
 0x771   : > { %s5300_s14 = scalar_lea.hbm %s6777_s5, %s5512_s6  ;;  %s5600_s10 = scalar_lea.vmem %s5599_s22, 512 }
 0x772   : > { %4722 = vrot.lane.b32.xlu0 %v4713_v62, %s5661_s30  ;;  %v5005_v46 = vpop.permute.xlu0 %5004 }
 0x774   : > { %5094 = vrot.lane.b32.xlu1 %v6296_v56, %s6790_s11 }
 0x776   : > { %4901 = vrot.lane.b32.xlu0 %v4893_v37, %s5660_s26 }
 0x778   : > { %5002 = vrot.lane.b32.xlu1 %v4994_v17, %s5659_s25 }
 0x77a   : > { %5090 = vrot.lane.b32.xlu0 %v6629_v31, %s6790_s11 }
 0x77c   : > { %5193 = vrot.lane.b32.xlu1 %v5185_v55, %s5658_s23 }
 0x77e   : > { %5195 = vrot.lane.b32.xlu0 %v5186_v24, %s5658_s23 }
 0x780   : > { %5191 = vrot.lane.b32.xlu1 %v5184_v50, %s5658_s23  ;;  %s215_s23 = sand.u32 1, %s5646_s19  }
 0x781   : > { %s5365_s30 = sshll.u32 %s215_s23, 4  ;;  %s5288_s7 = scalar_lea.sflag [#allocation4], %s215_s23 }
 0x782   : > { %5278 = vperm.xlu0 %5591, %v6585_v63   ;;  %s217_s16 = scalar_lea.vmem [#allocation3], %s5365_s30 }
 0x783   : > { %s5302_s8 = sshll.u32 %s217_s16, 4  ;;  %s5303_s8 = int_to_ptr.vmem [resolvable:$true] %s5302_s8 }
 0x784   : > { %s5594_s9 = scalar_lea.vmem %s5303_s8, 256  ;;  %p5601_p0 = scmp.lt.s32.totalorder %s5303_s8, %s5599_s22 }
 0x785   : > { %p5595_p11 = scmp.ne.s32.totalorder %s5303_s8, %s5594_s9  ;;  %p5602_p1 = scmp.lt.s32.totalorder %s5600_s10, %s5594_s9 }
 0x787   : > { %p5596_p12 = pnand %p5595_p11, %p5760_p5  ;;  %p5603_p2 = por %p5602_p1, %p5601_p0 }
 0x789   : > { %p5597_p13 = pneg %p5596_p12 }
 0x78b   : > { %p5604_p3 = pnand %p5603_p2, %p5597_p13 }
 0x7d0   : > { %v4424_v27 = vpop.permute.xlu0 %4423 }
 0x7d1   : > { %v4427_v51 = vsel %vm360_vm7, %v4422_v41, %v4424_v27 }
 0x7d2   : > { %v4426_v11 = vpop.permute.xlu1 %4425 }
 0x7d3   : > { %v4428_v28 = vsel %vm360_vm7, %v4424_v27, %v4426_v11  ;;  %vm6792_vm7 = vmmov %vm6791_vm8 }
 0x7d4   : > { %4464 = vmatprep.subr.mxu1 %v4428_v28  ;;  %v4620_v2 = vpop.permute.xlu0 %4619 }
 0x7d5   : > { %4465 = vmatpush1.msra.mxu1 %v4427_v51  ;;  %v4623_v16 = vsel %vm566_vm5, %v4618_v25, %v4620_v2 }
 0x7d6   : > { %v4511_v63 = vpop.permute.xlu1 %4510  ;;  %5496 = vmatmul.mubr.msk.f32.vlgmr.msra.gmra.mxu1 %vm6791_vm8, %v4417_v47 }
 0x7d7   : > { %4694 = vmatprep.mubr.f32.mxu1 %v6296_v56  ;;  %v4514_v48 = vsel %vm452_vm6, %v4509_v1, %v4511_v63 }
 0x7d8   : > { %v4900_v22 = vpop.permute.xlu0 %4899 }
 0x7da   : > { %v4721_v20 = vpop.permute.xlu1 %4720 }
 0x7db   : > { %v4724_v9 = vsel %vm671_vm4, %v4719_v26, %v4721_v20 }
 0x7dc   : > { %v5093_v21 = vpop.permute.xlu0 %5092 }
 0x7de   : > { %v5001_v19 = vpop.permute.xlu1 %5000 }
 0x7e0   : > { %v4513_v0 = vpop.permute.xlu0 %4512 }
 0x7e1   : > { %v4515_v61 = vsel %vm452_vm6, %v4511_v63, %v4513_v0 }
 0x7e2   : > { %v4622_v34 = vpop.permute.xlu1 %4621  ;;  %4551 = vmatprep.subr.mxu0 %v4515_v61 }
 0x7e3   : > { %4552 = vmatpush1.msra.mxu0 %v4514_v48  ;;  %v4624_v36 = vsel %vm566_vm5, %v4620_v2, %v4622_v34  ;;  %vm6793_vm5 = vmmov %vm6792_vm7 }
 0x7e4   : > { %4660 = vmatprep.subr.mxu1 %v4624_v36  ;;  %v4723_v43 = vpop.permute.xlu0 %4722  ;;  %5497 = vmatmul.mubr.msk.f32.vlgmr.msra.gmra.mxu0 %vm6792_vm7, %v4416_v3  ;;  %vm6794_vm6 = vmmov %vm6793_vm5 }
 0x7e5   : > { %4661 = vmatpush1.msra.mxu1 %v4623_v16  ;;  %v4725_v6 = vsel %vm671_vm4, %v4721_v20, %v4723_v43  ;;  %4795 = vmatprep.mubr.f32.mxu0 %v6296_v56  ;;  %vm6795_vm4 = vmmov %vm6793_vm5 }
 0x7e6   : > { %v5095_v45 = vpop.permute.xlu1 %5094  ;;  %4761 = vmatprep.subr.mxu0 %v4725_v6  ;;  %4838 = vmatprep.subr.mxu1 %v6633_v10  ;;  %vm6798_vm10 = vmmov %vm6795_vm4 }
 0x7e7   : > { %5499 = vmatmul.mubr.msk.f32.vlgmr.msra.gmra.mxu1 %vm6793_vm5, %v4613_v29  ;;  %4762 = vmatpush1.msra.mxu0 %v4724_v9  ;;  %v5097_v10 = vsel %vm6796_vm9, %v5093_v21, %v5095_v45 }
 0x7e8   : > { %4839 = vmatpush1.msra.mxu1 %v6629_v31  ;;  %v4902_v30 = vpop.permute.xlu0 %4901  ;;  %5500 = vmatmul.mubr.msk.f32.vlgmr.msra.gmra.mxu0 %vm6794_vm6, %v4714_v7 }
 0x7e9   : > { %v4905_v13 = vsel %vm653_vm3, %v4900_v22, %v4902_v30  ;;  %v4906_v4 = vsel %vm653_vm3, %v4902_v30, %v4904_v23  ;;  %4872 = vmatprep.mubr.f32.mxu1 %v6296_v56  ;;  %4976 = vmatprep.mubr.f32.mxu0 %v6296_v56  ;;  %vm6797_vm3 = vmmov %vm6796_vm9 }
 0x7ea   : > { %v5003_v52 = vpop.permute.xlu1 %5002  ;;  %4942 = vmatprep.subr.mxu0 %v4906_v4 }
 0x7eb   : > { %v5006_v31 = vsel %vm548_vm1, %v5001_v19, %v5003_v52  ;;  %4943 = vmatpush1.msra.mxu0 %v4905_v13  ;;  %5501 = vmatmul.mubr.msk.f32.vlgmr.msra.gmra.mxu1 %vm6795_vm4, %v4804_v5  ;;  %v5007_v44 = vsel %vm548_vm1, %v5003_v52, %v5005_v46  ;;  %vm6799_vm1 = vmmov %vm6795_vm4 }
 0x7ec   : > { %5043 = vmatprep.subr.mxu1 %v5007_v44  ;;  %5133 = vmatprep.subr.mxu0 %v5097_v10  ;;  %v5091_v57 = vpop.permute.xlu0 %5090  ;;  %vm6800_vm0 = vmmov %vm6799_vm1 }
 0x7ed   : > { %v5096_v35 = vsel %vm6797_vm3, %v5091_v57, %v5093_v21  ;;  %5044 = vmatpush1.msra.mxu1 %v5006_v31  ;;  %5502 = vmatmul.mubr.msk.f32.vlgmr.msra.gmra.mxu0 %vm6798_vm10, %v4895_v54  ;;  %vm6801_vm11 = vmmov %vm6800_vm0 }
 0x7ee   : > { %v5194_v33 = vpop.permute.xlu1 %5193  ;;  %5134 = vmatpush1.msra.mxu0 %v5096_v35  ;;  %5077 = vmatprep.mubr.f32.mxu1 %v6296_v56  ;;  %v5187_v56 = vld [vmem:[%s6773_s1 + $0x50] sm:$0xff] }
 0x7ef   : > { %5503 = vmatmul.mubr.msk.f32.vlgmr.msra.gmra.mxu1 %vm6799_vm1, %v4996_v32  ;;  %5167 = vmatprep.mubr.f32.mxu0 %v5593_v60 }
 0x7f0   : > { %v5196_v58 = vpop.permute.xlu0 %5195  ;;  %5268 = vmatprep.mubr.f32.mxu1 %v5593_v60 }
 0x7f1   : > { %5504 = vmatmul.mubr.msk.f32.vlgmr.msra.gmra.mxu0 %vm6800_vm0, %v5086_v38  ;;  %v5198_v39 = vsel %vm341_vm2, %v5194_v33, %v5196_v58 }
 0x7f2   : > { %v5192_v15 = vpop.permute.xlu1 %5191  ;;  %5234 = vmatprep.subr.mxu1 %v5198_v39 }
 0x7f3   : > { %v5197_v49 = vsel %vm341_vm2, %v5192_v15, %v5194_v33 }
 0x7f4   : > { %5235 = vmatpush1.msra.mxu1 %v5197_v49 }
 0x7f5   : > { %5505 = vmatmul.mubr.msk.f32.vlgmr.msra.gmra.mxu1 %vm6801_vm11, %v5187_v56 }
 0x7fd   : > { %v5279_v19 = vpop.permute.xlu0 %5278 }
 0x896   : > { %v4500_v42 = vpop.f32.mrf.mxu1 }
 0x898   : > { %v4502_v59 = vpop.f32.mrf.mxu1 }
 0x8a4   : > { %v4587_v62 = vpop.f32.mrf.mxu0 }
 0x8a5   : > { %v4588_v53 = vadd.f32 %v4587_v62, %v4500_v42 }
 0x8a6   : > { %v4589_v37 = vpop.f32.mrf.mxu0 }
 0x8a7   : > { %v4590_v40 = vadd.f32 %v4589_v37, %v4502_v59  ;;  %v4696_v12 = vpop.f32.mrf.mxu1 }
 0x8a8   : > { %v4701_v14 = vadd.f32 %v4696_v12, %v4588_v53  ;;  %v4797_v17 = vpop.f32.mrf.mxu0 }
 0x8a9   : > { %v4698_v18 = vpop.f32.mrf.mxu1 }
 0x8aa   : > { %v4702_v8 = vadd.f32 %v4698_v18, %v4590_v40  ;;  %v4802_v55 = vadd.f32 %v4797_v17, %v4701_v14  ;;  %v4799_v24 = vpop.f32.mrf.mxu0 }
 0x8ab   : > { %v4874_v50 = vpop.f32.mrf.mxu1 }
 0x8ac   : > { %v4803_v41 = vadd.f32 %v4799_v24, %v4702_v8  ;;  %v4879_v1 = vadd.f32 %v4874_v50, %v4802_v55 }
 0x8ad   : > { %v4876_v25 = vpop.f32.mrf.mxu1  ;;  %v4978_v26 = vpop.f32.mrf.mxu0 }
 0x8ae   : > { %v4880_v46 = vadd.f32 %v4876_v25, %v4803_v41  ;;  %v4983_v23 = vadd.f32 %v4978_v26, %v4879_v1 }
 0x8af   : > { %v4980_v27 = vpop.f32.mrf.mxu0  ;;  %v5079_v11 = vpop.f32.mrf.mxu1 }
 0x8b0   : > { %v4984_v28 = vadd.f32 %v4980_v27, %v4880_v46  ;;  %v5084_v47 = vadd.f32 %v5079_v11, %v4983_v23 }
 0x8b1   : > { %v5081_v51 = vpop.f32.mrf.mxu1  ;;  %v5169_v2 = vpop.f32.mrf.mxu0 }
 0x8b2   : > { %v5085_v63 = vadd.f32 %v5081_v51, %v4984_v28  ;;  %v5174_v20 = vadd.f32 %v5169_v2, %v5084_v47 }
 0x8b3   : > { %v5171_v22 = vpop.f32.mrf.mxu0 }
 0x8b4   : > { %v5175_v0 = vadd.f32 %v5171_v22, %v5085_v63 }
 0x8b5   : > { %v5270_v21 = vpop.f32.mrf.mxu1 }
 0x8b6   : > { %v5275_v61 = vadd.f32 %v5270_v21, %v5174_v20 }
 0x8b7   : > { %v5272_v3 = vpop.f32.mrf.mxu1 }
 0x8b8   : > { %v5276_v48 = vadd.f32 %v5272_v3, %v5175_v0  ;;  %v5281_v34 = vadd.f32 %v5279_v19, %v5275_v61 }
 0x8ba   : > { %v5282_v36 = vadd.f32 %v5279_v19, %v5276_v48  ;;  %v5283_v16 = vmax.f32 %v5281_v34, 0.0 }
 0x8bc   : > { %v5284_v43 = vmax.f32 %v5282_v36, 0.0  ;;  %5285 = vst [vmem:[%s217_s16] sm:$0xff] %v5283_v16 }
 0x8be   : > { %5286 = vst [vmem:[%s217_s16 + $0x8] sm:$0xff] %v5284_v43 }
 0x8bf   : > { %5607 = shalt.err (!%p5604_p3)
}
 0x8c0   : > { %s5608_s17 = scalar_lea.hbm %s5300_s14, 256  ;;  %s5612_s26 = scalar_lea.hbm %s6777_s5, 512 }
 0x8c1   : > { %p5609_p4 = scmp.ne.s32.totalorder %s5300_s14, %s5608_s17  ;;  %p5613_p9 = scmp.lt.s32.totalorder %s5300_s14, %s6777_s5 }
 0x8c2   : > { %p5614_p10 = scmp.lt.s32.totalorder %s5612_s26, %s5608_s17 }
 0x8c3   : > { %p5610_p7 = pnand %p5609_p4, %p5760_p5 }
 0x8c4   : > { %p5615_p11 = por %p5614_p10, %p5613_p9 }
 0x8c5   : > { %p5611_p8 = pneg %p5610_p7 }
 0x8c7   : > { %p5616_p12 = pnand %p5615_p11, %p5611_p8 }
 0x8c9   : > { %5619 = shalt.err (!%p5616_p12)
}
 0x8ca   : > { %5513 = dma.vmem_to_hbm [thread:$0]  (%p5760_p5), %s5303_s8, 256, %s5300_s14, %s5288_s7  }
 0x8cb PF: > { %p5519_p13 = scmp.ge.s32.totalorder %s5654_s21, 2  ;;  %s5314_s6 = sand.u32 1, %s5642_s18  }
 0x8cc   : > { %s5315_s16 = scalar_lea.sflag [#allocation4], %s5314_s6 }
 0x8cd   : > { %p5516_p0 = pnand %p5519_p13, %p5764_p6 }
 0x8cf   : > { %p5517_p1 = pneg %p5516_p0 }
 0x8d1   : > { %5637 = dma.done.wait (%p5517_p1), %s5315_s16, 256  }
 0x8d2   : > { %5639 = vsyncadd (%p5517_p1), %s5315_s16, 4294967040  ;;  %p15_p2 = scmp.ge.s32.totalorder %s5747_s24, 4   ;;  %s6802_s18 = smov %s5646_s19 }
 0x8d3   : > { %s6803_s19 = smov %s5650_s20  ;;  %s6804_s20 = smov %s5758_s27 }
 0x8d4   : > { %s6805_s21 = smov %s5747_s24  ;;  %17 = sbr.rel (!%p15_p2) target bundleno = 3 (0x3), region = 82 }
 0x8d9   :  { %5320 = vsyncpa [#allocation4], 1 }
 0x8da   :  { %5322 = vsyncpa [#allocation4 + $0x1], 1 }

</bundles_post_ra>
